<compile_context>
chip_gen: v6e
topology: v6e:2x2x1
jax: 0.10.0
libtpu: 0.0.40
codegen_flags: <defaults>
</compile_context>

<pallas_src>
import numpy as np
import jax
import jax.numpy as jnp
from jax.experimental import pallas as pl
from jax.experimental.pallas import tpu as pltpu


def _round_up(x, m):
    return (x + m - 1) // m * m


# ----------------------------------------------------------------------------
# Fused FPN kernel (one grid step == one image through every level)
# ----------------------------------------------------------------------------
def make_fpn_kernel(level_shapes, out_channel):
    """level_shapes: list of (H, W, Cin), finest level first."""
    L = len(level_shapes)
    C = out_channel

    def kernel(*refs):
        n_in = 6 * L + (L - 1)
        in_refs = refs[:n_in]
        out_refs = refs[n_in:n_in + L]
        scr_refs = refs[n_in + L:]
        per_level = [in_refs[6 * i: 6 * (i + 1)] for i in range(L)]
        u_refs = in_refs[6 * L:]          # L-1 upsample selection matrices

        prev_lat = None
        # Process coarsest level first so its lateral feeds the next-finer add.
        for i in range(L - 1, -1, -1):
            H, W, _ = level_shapes[i]
            HW = H * W
            P = _round_up(W + 1, 8)       # aligned halo rows in the scratch
            x_ref, wl_ref, bl_ref, wf_ref, bf_ref, m_ref = per_level[i]

            # ---- lateral 1x1 conv as an MXU matmul + bias --------------------
            lat = jnp.dot(x_ref[0], wl_ref[...],
                          preferred_element_type=jnp.float32) + bl_ref[...]

            # ---- top-down nearest upsample + add (selection-matrix matmul) ---
            if prev_lat is not None:
                lat = lat + jnp.dot(u_refs[i][...], prev_lat,
                                    preferred_element_type=jnp.float32)

            # ---- 3x3 / stride 1 / pad 1 conv: 9 shifted matmuls --------------
            # Flattened rows: out[r] needs lat[r + dy*W + dx]; vertical OOB is
            # handled by the zero halo, horizontal OOB by the edge masks.
            scr = scr_refs[i]
            scr[...] = jnp.zeros_like(scr)            # zero halo (cheap)
            scr[pl.ds(P, HW), :] = lat                # lateral stays in VMEM

            masks = m_ref[...]                        # (HW, 2) f32
            mask_l = masks[:, 0:1]                    # keep where x > 0
            mask_r = masks[:, 1:2]                    # keep where x < W-1

            acc = jnp.zeros((HW, C), jnp.float32)
            for dy in (-1, 0, 1):
                for dx in (-1, 0, 1):
                    k = (dy + 1) * 3 + (dx + 1)
                    sl = scr[pl.ds(P + dy * W + dx, HW), :]
                    if dx == -1:
                        sl = sl * mask_l
                    elif dx == 1:
                        sl = sl * mask_r
                    acc = acc + jnp.dot(sl, wf_ref[k],
                                        preferred_element_type=jnp.float32)

            out_refs[i][0] = (acc + bf_ref[...]).astype(out_refs[i].dtype)
            prev_lat = lat

    return kernel


# ----------------------------------------------------------------------------
# Host-side static helpers (selection matrices / edge masks; tiny constants)
# ----------------------------------------------------------------------------
def _build_upsample_matrix(hf, wf, hc, wc):
    """U[r, s] = 1 iff coarse pixel s is the nearest source of fine pixel r
    (matches F.interpolate(mode='nearest'): src = (dst * in) // out)."""
    r = np.arange(hf * wf)
    y, x = r // wf, r % wf
    ys = (y * hc) // hf
    xs = (x * wc) // wf
    src = ys * wc + xs
    u = np.zeros((hf * wf, hc * wc), np.float32)
    u[r, src] = 1.0
    return jnp.asarray(u)


def _build_edge_masks(h, w):
    x = np.arange(h * w) % w
    m = np.stack([(x > 0), (x < w - 1)], axis=1).astype(np.float32)
    return jnp.asarray(m)


# ----------------------------------------------------------------------------
# Wrapper: one pallas_call for the whole FPN
# ----------------------------------------------------------------------------
def fpn_forward(inputs_nchw, params):
    """inputs_nchw: list of (N, Cin_i, H_i, W_i). Returns list of NCHW outputs."""
    L = len(inputs_nchw)
    N = inputs_nchw[0].shape[0]
    Cout = params["lateral"][0][0].shape[1]
    dtype = inputs_nchw[0].dtype

    level_shapes = []
    xs = []
    for x in inputs_nchw:
        _, Cin, H, W = x.shape
        level_shapes.append((H, W, Cin))
        xs.append(jnp.transpose(x, (0, 2, 3, 1)).reshape(N, H * W, Cin))

    flat_inputs, in_specs = [], []
    for i, (H, W, Cin) in enumerate(level_shapes):
        HW = H * W
        wl, bl = params["lateral"][i]        # (Cin, Cout), (Cout,)
        wf, bf = params["fpn"][i]            # (9, Cout, Cout), (Cout,)
        flat_inputs += [xs[i], wl, bl.reshape(1, Cout), wf, bf.reshape(1, Cout),
                        _build_edge_masks(H, W)]
        in_specs += [
            pl.BlockSpec((1, HW, Cin), lambda n: (n, 0, 0)),
            pl.BlockSpec((Cin, Cout), lambda n: (0, 0)),
            pl.BlockSpec((1, Cout), lambda n: (0, 0)),
            pl.BlockSpec((9, Cout, Cout), lambda n: (0, 0, 0)),
            pl.BlockSpec((1, Cout), lambda n: (0, 0)),
            pl.BlockSpec((HW, 2), lambda n: (0, 0)),
        ]
    for i in range(L - 1):
        Hf, Wf, _ = level_shapes[i]
        Hc, Wc, _ = level_shapes[i + 1]
        flat_inputs.append(_build_upsample_matrix(Hf, Wf, Hc, Wc))
        in_specs.append(pl.BlockSpec((Hf * Wf, Hc * Wc), lambda n: (0, 0)))

    out_shape = [jax.ShapeDtypeStruct((N, H * W, Cout), dtype)
                 for (H, W, _) in level_shapes]
    out_specs = [pl.BlockSpec((1, H * W, Cout), lambda n: (n, 0, 0))
                 for (H, W, _) in level_shapes]
    scratch_shapes = [
        pltpu.VMEM((H * W + 2 * _round_up(W + 1, 8), Cout), jnp.float32)
        for (H, W, _) in level_shapes
    ]

    outs = pl.pallas_call(
        make_fpn_kernel(level_shapes, Cout),
        out_shape=out_shape,
        grid=(N,),
        in_specs=in_specs,
        out_specs=out_specs,
        scratch_shapes=scratch_shapes,
        compiler_params=pltpu.CompilerParams(
            dimension_semantics=("parallel",)),
    )(*flat_inputs)

    return [jnp.transpose(o.reshape(N, H, W, Cout), (0, 3, 1, 2))
            for o, (H, W, _) in zip(outs, level_shapes)]


# ----------------------------------------------------------------------------
# Parameters (torch Conv2d layouts reshaped for the kernel)
# ----------------------------------------------------------------------------
def init_fpn_params(key, in_channels, out_channel):
    params = {"lateral": [], "fpn": []}
    for cin in in_channels:
        k1, k2, k3, k4, key = jax.random.split(key, 5)
        # lateral 1x1 conv: torch (Cout, Cin, 1, 1) -> (Cin, Cout)
        wl = jax.random.normal(k1, (out_channel, cin, 1, 1), jnp.float32) * 0.05
        bl = jax.random.normal(k2, (out_channel,), jnp.float32) * 0.05
        params["lateral"].append((jnp.transpose(wl[:, :, 0, 0], (1, 0)), bl))
        # fpn 3x3 conv: torch (Cout, Cin, 3, 3) -> (kh*3+kw, Cin, Cout)
        wf = jax.random.normal(k3, (out_channel, out_channel, 3, 3), jnp.float32) * 0.05
        bf = jax.random.normal(k4, (out_channel,), jnp.float32) * 0.05
        wf_taps = jnp.transpose(wf, (2, 3, 1, 0)).reshape(9, out_channel, out_channel)
        params["fpn"].append((wf_taps, bf))
    return params


# ----------------------------------------------------------------------------
# Pure-JAX reference (lax.conv) for a correctness check
# ----------------------------------------------------------------------------
def fpn_reference(inputs_nchw, params, out_channel):
    def conv(x, w4d, b, pad):
        y = jax.lax.conv_general_dilated(
            x, w4d, window_strides=(1, 1), padding=[(pad, pad), (pad, pad)],
            dimension_numbers=("NCHW", "OIHW", "NCHW"))
        return y + b[None, :, None, None]

    laterals = []
    for i, x in enumerate(inputs_nchw):
        w2d, b = params["lateral"][i]                        # (Cin, Cout)
        w4d = jnp.transpose(w2d, (1, 0))[:, :, None, None]   # (Cout, Cin, 1, 1)
        laterals.append(conv(x, w4d, b, 0))
    for i in range(len(laterals) - 1, 0, -1):
        H, W = laterals[i - 1].shape[2], laterals[i - 1].shape[3]
        src = laterals[i]
        idx_h = (jnp.arange(H) * src.shape[2]) // H
        idx_w = (jnp.arange(W) * src.shape[3]) // W
        laterals[i - 1] = laterals[i - 1] + src[:, :, idx_h][:, :, :, idx_w]
    outs = []
    for i, lat in enumerate(laterals):
        wf_taps, b = params["fpn"][i]                        # (9, Cout, Cout)
        w4d = jnp.transpose(wf_taps.reshape(3, 3, out_channel, out_channel),
                            (3, 2, 0, 1))                    # (Cout, Cin, 3, 3)
        outs.append(conv(lat, w4d, b, 1))
    return outs


# ----------------------------------------------------------------------------
if __name__ == "__main__":
    # cfg: fpn_in_channel = [8, 16, 32], neck_dim = 16
    in_channels = [8, 16, 32]
    out_channel = 16
    batch = 2
    spatials = [(16, 16), (8, 8), (4, 4)]

    key = jax.random.PRNGKey(0)
    kp, *kx = jax.random.split(key, 1 + len(in_channels))
    params = init_fpn_params(kp, in_channels, out_channel)

    inputs = [
        jax.random.normal(kx[i], (batch, in_channels[i], h, w), jnp.float32)
        for i, (h, w) in enumerate(spatials)
    ]

    outs = fpn_forward(inputs, params)
    outs = [jax.block_until_ready(o) for o in outs]

    refs = fpn_reference(inputs, params, out_channel)
    for o, r in zip(outs, refs):
        assert o.shape == r.shape, (o.shape, r.shape)
        assert jnp.allclose(o, r, rtol=1e-4, atol=1e-4), float(jnp.max(jnp.abs(o - r)))

    print("KERNEL_OK")
</pallas_src>

<mosaic_0001>
module attributes {stable_mosaic.version = 11 : i64} {
  func.func @kernel(%arg0: i32, %arg1: memref<1x256x8xf32, #tpu.memory_space<vmem>>, %arg2: memref<8x16xf32, #tpu.memory_space<vmem>>, %arg3: memref<1x16xf32, #tpu.memory_space<vmem>>, %arg4: memref<9x16x16xf32, #tpu.memory_space<vmem>>, %arg5: memref<1x16xf32, #tpu.memory_space<vmem>>, %arg6: memref<256x2xf32, #tpu.memory_space<vmem>>, %arg7: memref<1x64x16xf32, #tpu.memory_space<vmem>>, %arg8: memref<16x16xf32, #tpu.memory_space<vmem>>, %arg9: memref<1x16xf32, #tpu.memory_space<vmem>>, %arg10: memref<9x16x16xf32, #tpu.memory_space<vmem>>, %arg11: memref<1x16xf32, #tpu.memory_space<vmem>>, %arg12: memref<64x2xf32, #tpu.memory_space<vmem>>, %arg13: memref<1x16x32xf32, #tpu.memory_space<vmem>>, %arg14: memref<32x16xf32, #tpu.memory_space<vmem>>, %arg15: memref<1x16xf32, #tpu.memory_space<vmem>>, %arg16: memref<9x16x16xf32, #tpu.memory_space<vmem>>, %arg17: memref<1x16xf32, #tpu.memory_space<vmem>>, %arg18: memref<16x2xf32, #tpu.memory_space<vmem>>, %arg19: memref<256x64xf32, #tpu.memory_space<vmem>>, %arg20: memref<64x16xf32, #tpu.memory_space<vmem>>, %arg21: memref<1x256x16xf32, #tpu.memory_space<vmem>>, %arg22: memref<1x64x16xf32, #tpu.memory_space<vmem>>, %arg23: memref<1x16x16xf32, #tpu.memory_space<vmem>>, %arg24: memref<304x16xf32, #tpu.memory_space<vmem>>, %arg25: memref<96x16xf32, #tpu.memory_space<vmem>>, %arg26: memref<32x16xf32, #tpu.memory_space<vmem>>) attributes {dimension_semantics = [#tpu.dimension_semantics<parallel>], iteration_bounds = array<i64: 2>, scalar_prefetch = 0 : i64, scratch_operands = 3 : i64, tpu.core_type = #tpu.core_type<tc>, window_params = [{transform_indices = @transform_0, window_bounds = array<i64: 1, 256, 8>}, {pipeline_mode = #tpu.pipeline_mode<synchronous>, transform_indices = @transform_1, window_bounds = array<i64: 8, 16>}, {pipeline_mode = #tpu.pipeline_mode<synchronous>, transform_indices = @transform_2, window_bounds = array<i64: 1, 16>}, {pipeline_mode = #tpu.pipeline_mode<synchronous>, transform_indices = @transform_3, window_bounds = array<i64: 9, 16, 16>}, {pipeline_mode = #tpu.pipeline_mode<synchronous>, transform_indices = @transform_4, window_bounds = array<i64: 1, 16>}, {pipeline_mode = #tpu.pipeline_mode<synchronous>, transform_indices = @transform_5, window_bounds = array<i64: 256, 2>}, {transform_indices = @transform_6, window_bounds = array<i64: 1, 64, 16>}, {pipeline_mode = #tpu.pipeline_mode<synchronous>, transform_indices = @transform_7, window_bounds = array<i64: 16, 16>}, {pipeline_mode = #tpu.pipeline_mode<synchronous>, transform_indices = @transform_8, window_bounds = array<i64: 1, 16>}, {pipeline_mode = #tpu.pipeline_mode<synchronous>, transform_indices = @transform_9, window_bounds = array<i64: 9, 16, 16>}, {pipeline_mode = #tpu.pipeline_mode<synchronous>, transform_indices = @transform_10, window_bounds = array<i64: 1, 16>}, {pipeline_mode = #tpu.pipeline_mode<synchronous>, transform_indices = @transform_11, window_bounds = array<i64: 64, 2>}, {transform_indices = @transform_12, window_bounds = array<i64: 1, 16, 32>}, {pipeline_mode = #tpu.pipeline_mode<synchronous>, transform_indices = @transform_13, window_bounds = array<i64: 32, 16>}, {pipeline_mode = #tpu.pipeline_mode<synchronous>, transform_indices = @transform_14, window_bounds = array<i64: 1, 16>}, {pipeline_mode = #tpu.pipeline_mode<synchronous>, transform_indices = @transform_15, window_bounds = array<i64: 9, 16, 16>}, {pipeline_mode = #tpu.pipeline_mode<synchronous>, transform_indices = @transform_16, window_bounds = array<i64: 1, 16>}, {pipeline_mode = #tpu.pipeline_mode<synchronous>, transform_indices = @transform_17, window_bounds = array<i64: 16, 2>}, {pipeline_mode = #tpu.pipeline_mode<synchronous>, transform_indices = @transform_18, window_bounds = array<i64: 256, 64>}, {pipeline_mode = #tpu.pipeline_mode<synchronous>, transform_indices = @transform_19, window_bounds = array<i64: 64, 16>}, {transform_indices = @transform_20, window_bounds = array<i64: 1, 256, 16>}, {transform_indices = @transform_21, window_bounds = array<i64: 1, 64, 16>}, {transform_indices = @transform_22, window_bounds = array<i64: 1, 16, 16>}]} {
    %c0 = arith.constant 0 : index
    %c0_0 = arith.constant 0 : index
    %c0_1 = arith.constant 0 : index
    %0 = vector.load %arg13[%c0, %c0_0, %c0_1] : memref<1x16x32xf32, #tpu.memory_space<vmem>>, vector<1x16x32xf32>
    %1 = vector.shape_cast %0 : vector<1x16x32xf32> to vector<16x32xf32>
    %c0_2 = arith.constant 0 : index
    %c0_3 = arith.constant 0 : index
    %2 = vector.load %arg14[%c0_2, %c0_3] : memref<32x16xf32, #tpu.memory_space<vmem>>, vector<32x16xf32>
    %cst = arith.constant dense<0.000000e+00> : vector<16x16xf32>
    %3 = tpu.matmul %1, %2, %cst {dimension_numbers = #tpu.dot_dimension_numbers<[1], [0], [0], [1], [0, 0, 1, 1], [], []>} : vector<16x32xf32>, vector<32x16xf32>, vector<16x16xf32> -> vector<16x16xf32>
    %c0_4 = arith.constant 0 : index
    %c0_5 = arith.constant 0 : index
    %4 = vector.load %arg15[%c0_4, %c0_5] : memref<1x16xf32, #tpu.memory_space<vmem>>, vector<1x16xf32>
    %5 = vector.broadcast %4 : vector<1x16xf32> to vector<16x16xf32>
    %6 = arith.addf %3, %5 : vector<16x16xf32>
    %cst_6 = arith.constant 0.000000e+00 : f32
    %7 = vector.broadcast %cst_6 : f32 to vector<32x16xf32>
    %c0_7 = arith.constant 0 : index
    %c0_8 = arith.constant 0 : index
    %8 = vector.load %arg26[%c0_7, %c0_8] : memref<32x16xf32, #tpu.memory_space<vmem>>, vector<32x16xf32>
    tpu.vector_store %arg26[%c0_7, %c0_8], %7 {strides = array<i32>} : memref<32x16xf32, #tpu.memory_space<vmem>>, vector<32x16xf32>,
    %c8 = arith.constant 8 : index
    %c0_9 = arith.constant 0 : index
    %9 = vector.load %arg26[%c8, %c0_9] : memref<32x16xf32, #tpu.memory_space<vmem>>, vector<16x16xf32>
    tpu.vector_store %arg26[%c8, %c0_9], %6 {strides = array<i32>} : memref<32x16xf32, #tpu.memory_space<vmem>>, vector<16x16xf32>,
    %c0_10 = arith.constant 0 : index
    %c0_11 = arith.constant 0 : index
    %10 = vector.load %arg18[%c0_10, %c0_11] : memref<16x2xf32, #tpu.memory_space<vmem>>, vector<16x2xf32>
    %11 = vector.extract_strided_slice %10 {offsets = [0, 0], sizes = [16, 1], strides = [1, 1]} : vector<16x2xf32> to vector<16x1xf32>
    %12 = vector.extract_strided_slice %10 {offsets = [0, 1], sizes = [16, 1], strides = [1, 1]} : vector<16x2xf32> to vector<16x1xf32>
    %cst_12 = arith.constant 0.000000e+00 : f32
    %13 = vector.broadcast %cst_12 : f32 to vector<16x16xf32>
    %c3 = arith.constant 3 : index
    %c0_13 = arith.constant 0 : index
    %14 = vector.load %arg26[%c3, %c0_13] : memref<32x16xf32, #tpu.memory_space<vmem>>, vector<16x16xf32>
    %15 = vector.broadcast %11 : vector<16x1xf32> to vector<16x16xf32>
    %16 = arith.mulf %14, %15 : vector<16x16xf32>
    %c0_14 = arith.constant 0 : index
    %c0_15 = arith.constant 0 : index
    %c0_16 = arith.constant 0 : index
    %17 = vector.load %arg16[%c0_14, %c0_15, %c0_16] : memref<9x16x16xf32, #tpu.memory_space<vmem>>, vector<1x16x16xf32>
    %18 = vector.shape_cast %17 : vector<1x16x16xf32> to vector<16x16xf32>
    %cst_17 = arith.constant dense<0.000000e+00> : vector<16x16xf32>
    %19 = tpu.matmul %16, %18, %cst_17 {dimension_numbers = #tpu.dot_dimension_numbers<[1], [0], [0], [1], [0, 0, 1, 1], [], []>} : vector<16x16xf32>, vector<16x16xf32>, vector<16x16xf32> -> vector<16x16xf32>
    %20 = arith.addf %13, %19 : vector<16x16xf32>
    %c4 = arith.constant 4 : index
    %c0_18 = arith.constant 0 : index
    %21 = vector.load %arg26[%c4, %c0_18] : memref<32x16xf32, #tpu.memory_space<vmem>>, vector<16x16xf32>
    %c1 = arith.constant 1 : index
    %c0_19 = arith.constant 0 : index
    %c0_20 = arith.constant 0 : index
    %22 = vector.load %arg16[%c1, %c0_19, %c0_20] : memref<9x16x16xf32, #tpu.memory_space<vmem>>, vector<1x16x16xf32>
    %23 = vector.shape_cast %22 : vector<1x16x16xf32> to vector<16x16xf32>
    %cst_21 = arith.constant dense<0.000000e+00> : vector<16x16xf32>
    %24 = tpu.matmul %21, %23, %cst_21 {dimension_numbers = #tpu.dot_dimension_numbers<[1], [0], [0], [1], [0, 0, 1, 1], [], []>} : vector<16x16xf32>, vector<16x16xf32>, vector<16x16xf32> -> vector<16x16xf32>
    %25 = arith.addf %20, %24 : vector<16x16xf32>
    %c5 = arith.constant 5 : index
    %c0_22 = arith.constant 0 : index
    %26 = vector.load %arg26[%c5, %c0_22] : memref<32x16xf32, #tpu.memory_space<vmem>>, vector<16x16xf32>
    %27 = vector.broadcast %12 : vector<16x1xf32> to vector<16x16xf32>
    %28 = arith.mulf %26, %27 : vector<16x16xf32>
    %c2 = arith.constant 2 : index
    %c0_23 = arith.constant 0 : index
    %c0_24 = arith.constant 0 : index
    %29 = vector.load %arg16[%c2, %c0_23, %c0_24] : memref<9x16x16xf32, #tpu.memory_space<vmem>>, vector<1x16x16xf32>
    %30 = vector.shape_cast %29 : vector<1x16x16xf32> to vector<16x16xf32>
    %cst_25 = arith.constant dense<0.000000e+00> : vector<16x16xf32>
    %31 = tpu.matmul %28, %30, %cst_25 {dimension_numbers = #tpu.dot_dimension_numbers<[1], [0], [0], [1], [0, 0, 1, 1], [], []>} : vector<16x16xf32>, vector<16x16xf32>, vector<16x16xf32> -> vector<16x16xf32>
    %32 = arith.addf %25, %31 : vector<16x16xf32>
    %c7 = arith.constant 7 : index
    %c0_26 = arith.constant 0 : index
    %33 = vector.load %arg26[%c7, %c0_26] : memref<32x16xf32, #tpu.memory_space<vmem>>, vector<16x16xf32>
    %34 = vector.broadcast %11 : vector<16x1xf32> to vector<16x16xf32>
    %35 = arith.mulf %33, %34 : vector<16x16xf32>
    %c3_27 = arith.constant 3 : index
    %c0_28 = arith.constant 0 : index
    %c0_29 = arith.constant 0 : index
    %36 = vector.load %arg16[%c3_27, %c0_28, %c0_29] : memref<9x16x16xf32, #tpu.memory_space<vmem>>, vector<1x16x16xf32>
    %37 = vector.shape_cast %36 : vector<1x16x16xf32> to vector<16x16xf32>
    %cst_30 = arith.constant dense<0.000000e+00> : vector<16x16xf32>
    %38 = tpu.matmul %35, %37, %cst_30 {dimension_numbers = #tpu.dot_dimension_numbers<[1], [0], [0], [1], [0, 0, 1, 1], [], []>} : vector<16x16xf32>, vector<16x16xf32>, vector<16x16xf32> -> vector<16x16xf32>
    %39 = arith.addf %32, %38 : vector<16x16xf32>
    %c8_31 = arith.constant 8 : index
    %c0_32 = arith.constant 0 : index
    %40 = vector.load %arg26[%c8_31, %c0_32] : memref<32x16xf32, #tpu.memory_space<vmem>>, vector<16x16xf32>
    %c4_33 = arith.constant 4 : index
    %c0_34 = arith.constant 0 : index
    %c0_35 = arith.constant 0 : index
    %41 = vector.load %arg16[%c4_33, %c0_34, %c0_35] : memref<9x16x16xf32, #tpu.memory_space<vmem>>, vector<1x16x16xf32>
    %42 = vector.shape_cast %41 : vector<1x16x16xf32> to vector<16x16xf32>
    %cst_36 = arith.constant dense<0.000000e+00> : vector<16x16xf32>
    %43 = tpu.matmul %40, %42, %cst_36 {dimension_numbers = #tpu.dot_dimension_numbers<[1], [0], [0], [1], [0, 0, 1, 1], [], []>} : vector<16x16xf32>, vector<16x16xf32>, vector<16x16xf32> -> vector<16x16xf32>
    %44 = arith.addf %39, %43 : vector<16x16xf32>
    %c9 = arith.constant 9 : index
    %c0_37 = arith.constant 0 : index
    %45 = vector.load %arg26[%c9, %c0_37] : memref<32x16xf32, #tpu.memory_space<vmem>>, vector<16x16xf32>
    %46 = vector.broadcast %12 : vector<16x1xf32> to vector<16x16xf32>
    %47 = arith.mulf %45, %46 : vector<16x16xf32>
    %c5_38 = arith.constant 5 : index
    %c0_39 = arith.constant 0 : index
    %c0_40 = arith.constant 0 : index
    %48 = vector.load %arg16[%c5_38, %c0_39, %c0_40] : memref<9x16x16xf32, #tpu.memory_space<vmem>>, vector<1x16x16xf32>
    %49 = vector.shape_cast %48 : vector<1x16x16xf32> to vector<16x16xf32>
    %cst_41 = arith.constant dense<0.000000e+00> : vector<16x16xf32>
    %50 = tpu.matmul %47, %49, %cst_41 {dimension_numbers = #tpu.dot_dimension_numbers<[1], [0], [0], [1], [0, 0, 1, 1], [], []>} : vector<16x16xf32>, vector<16x16xf32>, vector<16x16xf32> -> vector<16x16xf32>
    %51 = arith.addf %44, %50 : vector<16x16xf32>
    %c11 = arith.constant 11 : index
    %c0_42 = arith.constant 0 : index
    %52 = vector.load %arg26[%c11, %c0_42] : memref<32x16xf32, #tpu.memory_space<vmem>>, vector<16x16xf32>
    %53 = vector.broadcast %11 : vector<16x1xf32> to vector<16x16xf32>
    %54 = arith.mulf %52, %53 : vector<16x16xf32>
    %c6 = arith.constant 6 : index
    %c0_43 = arith.constant 0 : index
    %c0_44 = arith.constant 0 : index
    %55 = vector.load %arg16[%c6, %c0_43, %c0_44] : memref<9x16x16xf32, #tpu.memory_space<vmem>>, vector<1x16x16xf32>
    %56 = vector.shape_cast %55 : vector<1x16x16xf32> to vector<16x16xf32>
    %cst_45 = arith.constant dense<0.000000e+00> : vector<16x16xf32>
    %57 = tpu.matmul %54, %56, %cst_45 {dimension_numbers = #tpu.dot_dimension_numbers<[1], [0], [0], [1], [0, 0, 1, 1], [], []>} : vector<16x16xf32>, vector<16x16xf32>, vector<16x16xf32> -> vector<16x16xf32>
    %58 = arith.addf %51, %57 : vector<16x16xf32>
    %c12 = arith.constant 12 : index
    %c0_46 = arith.constant 0 : index
    %59 = vector.load %arg26[%c12, %c0_46] : memref<32x16xf32, #tpu.memory_space<vmem>>, vector<16x16xf32>
    %c7_47 = arith.constant 7 : index
    %c0_48 = arith.constant 0 : index
    %c0_49 = arith.constant 0 : index
    %60 = vector.load %arg16[%c7_47, %c0_48, %c0_49] : memref<9x16x16xf32, #tpu.memory_space<vmem>>, vector<1x16x16xf32>
    %61 = vector.shape_cast %60 : vector<1x16x16xf32> to vector<16x16xf32>
    %cst_50 = arith.constant dense<0.000000e+00> : vector<16x16xf32>
    %62 = tpu.matmul %59, %61, %cst_50 {dimension_numbers = #tpu.dot_dimension_numbers<[1], [0], [0], [1], [0, 0, 1, 1], [], []>} : vector<16x16xf32>, vector<16x16xf32>, vector<16x16xf32> -> vector<16x16xf32>
    %63 = arith.addf %58, %62 : vector<16x16xf32>
    %c13 = arith.constant 13 : index
    %c0_51 = arith.constant 0 : index
    %64 = vector.load %arg26[%c13, %c0_51] : memref<32x16xf32, #tpu.memory_space<vmem>>, vector<16x16xf32>
    %65 = vector.broadcast %12 : vector<16x1xf32> to vector<16x16xf32>
    %66 = arith.mulf %64, %65 : vector<16x16xf32>
    %c8_52 = arith.constant 8 : index
    %c0_53 = arith.constant 0 : index
    %c0_54 = arith.constant 0 : index
    %67 = vector.load %arg16[%c8_52, %c0_53, %c0_54] : memref<9x16x16xf32, #tpu.memory_space<vmem>>, vector<1x16x16xf32>
    %68 = vector.shape_cast %67 : vector<1x16x16xf32> to vector<16x16xf32>
    %cst_55 = arith.constant dense<0.000000e+00> : vector<16x16xf32>
    %69 = tpu.matmul %66, %68, %cst_55 {dimension_numbers = #tpu.dot_dimension_numbers<[1], [0], [0], [1], [0, 0, 1, 1], [], []>} : vector<16x16xf32>, vector<16x16xf32>, vector<16x16xf32> -> vector<16x16xf32>
    %70 = arith.addf %63, %69 : vector<16x16xf32>
    %c0_56 = arith.constant 0 : index
    %c0_57 = arith.constant 0 : index
    %71 = vector.load %arg17[%c0_56, %c0_57] : memref<1x16xf32, #tpu.memory_space<vmem>>, vector<1x16xf32>
    %72 = vector.broadcast %71 : vector<1x16xf32> to vector<16x16xf32>
    %73 = arith.addf %70, %72 : vector<16x16xf32>
    %c0_58 = arith.constant 0 : index
    %c0_59 = arith.constant 0 : index
    %c0_60 = arith.constant 0 : index
    %74 = vector.load %arg23[%c0_58, %c0_59, %c0_60] : memref<1x16x16xf32, #tpu.memory_space<vmem>>, vector<1x16x16xf32>
    %75 = vector.shape_cast %74 : vector<1x16x16xf32> to vector<16x16xf32>
    %76 = vector.shape_cast %73 : vector<16x16xf32> to vector<1x16x16xf32>
    tpu.vector_store %arg23[%c0_58, %c0_59, %c0_60], %76 {strides = array<i32>} : memref<1x16x16xf32, #tpu.memory_space<vmem>>, vector<1x16x16xf32>,
    %c0_61 = arith.constant 0 : index
    %c0_62 = arith.constant 0 : index
    %c0_63 = arith.constant 0 : index
    %77 = vector.load %arg7[%c0_61, %c0_62, %c0_63] : memref<1x64x16xf32, #tpu.memory_space<vmem>>, vector<1x64x16xf32>
    %78 = vector.shape_cast %77 : vector<1x64x16xf32> to vector<64x16xf32>
    %c0_64 = arith.constant 0 : index
    %c0_65 = arith.constant 0 : index
    %79 = vector.load %arg8[%c0_64, %c0_65] : memref<16x16xf32, #tpu.memory_space<vmem>>, vector<16x16xf32>
    %cst_66 = arith.constant dense<0.000000e+00> : vector<64x16xf32>
    %80 = tpu.matmul %78, %79, %cst_66 {dimension_numbers = #tpu.dot_dimension_numbers<[1], [0], [0], [1], [0, 0, 1, 1], [], []>} : vector<64x16xf32>, vector<16x16xf32>, vector<64x16xf32> -> vector<64x16xf32>
    %c0_67 = arith.constant 0 : index
    %c0_68 = arith.constant 0 : index
    %81 = vector.load %arg9[%c0_67, %c0_68] : memref<1x16xf32, #tpu.memory_space<vmem>>, vector<1x16xf32>
    %82 = vector.broadcast %81 : vector<1x16xf32> to vector<64x16xf32>
    %83 = arith.addf %80, %82 : vector<64x16xf32>
    %c0_69 = arith.constant 0 : index
    %c0_70 = arith.constant 0 : index
    %84 = vector.load %arg20[%c0_69, %c0_70] : memref<64x16xf32, #tpu.memory_space<vmem>>, vector<64x16xf32>
    %cst_71 = arith.constant dense<0.000000e+00> : vector<64x16xf32>
    %85 = tpu.matmul %84, %6, %cst_71 {dimension_numbers = #tpu.dot_dimension_numbers<[1], [0], [0], [1], [0, 0, 1, 1], [], []>} : vector<64x16xf32>, vector<16x16xf32>, vector<64x16xf32> -> vector<64x16xf32>
    %86 = arith.addf %83, %85 : vector<64x16xf32>
    %cst_72 = arith.constant 0.000000e+00 : f32
    %87 = vector.broadcast %cst_72 : f32 to vector<96x16xf32>
    %c0_73 = arith.constant 0 : index
    %c0_74 = arith.constant 0 : index
    %88 = vector.load %arg25[%c0_73, %c0_74] : memref<96x16xf32, #tpu.memory_space<vmem>>, vector<96x16xf32>
    tpu.vector_store %arg25[%c0_73, %c0_74], %87 {strides = array<i32>} : memref<96x16xf32, #tpu.memory_space<vmem>>, vector<96x16xf32>,
    %c16 = arith.constant 16 : index
    %c0_75 = arith.constant 0 : index
    %89 = vector.load %arg25[%c16, %c0_75] : memref<96x16xf32, #tpu.memory_space<vmem>>, vector<64x16xf32>
    tpu.vector_store %arg25[%c16, %c0_75], %86 {strides = array<i32>} : memref<96x16xf32, #tpu.memory_space<vmem>>, vector<64x16xf32>,
    %c0_76 = arith.constant 0 : index
    %c0_77 = arith.constant 0 : index
    %90 = vector.load %arg12[%c0_76, %c0_77] : memref<64x2xf32, #tpu.memory_space<vmem>>, vector<64x2xf32>
    %91 = vector.extract_strided_slice %90 {offsets = [0, 0], sizes = [64, 1], strides = [1, 1]} : vector<64x2xf32> to vector<64x1xf32>
    %92 = vector.extract_strided_slice %90 {offsets = [0, 1], sizes = [64, 1], strides = [1, 1]} : vector<64x2xf32> to vector<64x1xf32>
    %cst_78 = arith.constant 0.000000e+00 : f32
    %93 = vector.broadcast %cst_78 : f32 to vector<64x16xf32>
    %c7_79 = arith.constant 7 : index
    %c0_80 = arith.constant 0 : index
    %94 = vector.load %arg25[%c7_79, %c0_80] : memref<96x16xf32, #tpu.memory_space<vmem>>, vector<64x16xf32>
    %95 = vector.broadcast %91 : vector<64x1xf32> to vector<64x16xf32>
    %96 = arith.mulf %94, %95 : vector<64x16xf32>
    %c0_81 = arith.constant 0 : index
    %c0_82 = arith.constant 0 : index
    %c0_83 = arith.constant 0 : index
    %97 = vector.load %arg10[%c0_81, %c0_82, %c0_83] : memref<9x16x16xf32, #tpu.memory_space<vmem>>, vector<1x16x16xf32>
    %98 = vector.shape_cast %97 : vector<1x16x16xf32> to vector<16x16xf32>
    %cst_84 = arith.constant dense<0.000000e+00> : vector<64x16xf32>
    %99 = tpu.matmul %96, %98, %cst_84 {dimension_numbers = #tpu.dot_dimension_numbers<[1], [0], [0], [1], [0, 0, 1, 1], [], []>} : vector<64x16xf32>, vector<16x16xf32>, vector<64x16xf32> -> vector<64x16xf32>
    %100 = arith.addf %93, %99 : vector<64x16xf32>
    %c8_85 = arith.constant 8 : index
    %c0_86 = arith.constant 0 : index
    %101 = vector.load %arg25[%c8_85, %c0_86] : memref<96x16xf32, #tpu.memory_space<vmem>>, vector<64x16xf32>
    %c1_87 = arith.constant 1 : index
    %c0_88 = arith.constant 0 : index
    %c0_89 = arith.constant 0 : index
    %102 = vector.load %arg10[%c1_87, %c0_88, %c0_89] : memref<9x16x16xf32, #tpu.memory_space<vmem>>, vector<1x16x16xf32>
    %103 = vector.shape_cast %102 : vector<1x16x16xf32> to vector<16x16xf32>
    %cst_90 = arith.constant dense<0.000000e+00> : vector<64x16xf32>
    %104 = tpu.matmul %101, %103, %cst_90 {dimension_numbers = #tpu.dot_dimension_numbers<[1], [0], [0], [1], [0, 0, 1, 1], [], []>} : vector<64x16xf32>, vector<16x16xf32>, vector<64x16xf32> -> vector<64x16xf32>
    %105 = arith.addf %100, %104 : vector<64x16xf32>
    %c9_91 = arith.constant 9 : index
    %c0_92 = arith.constant 0 : index
    %106 = vector.load %arg25[%c9_91, %c0_92] : memref<96x16xf32, #tpu.memory_space<vmem>>, vector<64x16xf32>
    %107 = vector.broadcast %92 : vector<64x1xf32> to vector<64x16xf32>
    %108 = arith.mulf %106, %107 : vector<64x16xf32>
    %c2_93 = arith.constant 2 : index
    %c0_94 = arith.constant 0 : index
    %c0_95 = arith.constant 0 : index
    %109 = vector.load %arg10[%c2_93, %c0_94, %c0_95] : memref<9x16x16xf32, #tpu.memory_space<vmem>>, vector<1x16x16xf32>
    %110 = vector.shape_cast %109 : vector<1x16x16xf32> to vector<16x16xf32>
    %cst_96 = arith.constant dense<0.000000e+00> : vector<64x16xf32>
    %111 = tpu.matmul %108, %110, %cst_96 {dimension_numbers = #tpu.dot_dimension_numbers<[1], [0], [0], [1], [0, 0, 1, 1], [], []>} : vector<64x16xf32>, vector<16x16xf32>, vector<64x16xf32> -> vector<64x16xf32>
    %112 = arith.addf %105, %111 : vector<64x16xf32>
    %c15 = arith.constant 15 : index
    %c0_97 = arith.constant 0 : index
    %113 = vector.load %arg25[%c15, %c0_97] : memref<96x16xf32, #tpu.memory_space<vmem>>, vector<64x16xf32>
    %114 = vector.broadcast %91 : vector<64x1xf32> to vector<64x16xf32>
    %115 = arith.mulf %113, %114 : vector<64x16xf32>
    %c3_98 = arith.constant 3 : index
    %c0_99 = arith.constant 0 : index
    %c0_100 = arith.constant 0 : index
    %116 = vector.load %arg10[%c3_98, %c0_99, %c0_100] : memref<9x16x16xf32, #tpu.memory_space<vmem>>, vector<1x16x16xf32>
    %117 = vector.shape_cast %116 : vector<1x16x16xf32> to vector<16x16xf32>
    %cst_101 = arith.constant dense<0.000000e+00> : vector<64x16xf32>
    %118 = tpu.matmul %115, %117, %cst_101 {dimension_numbers = #tpu.dot_dimension_numbers<[1], [0], [0], [1], [0, 0, 1, 1], [], []>} : vector<64x16xf32>, vector<16x16xf32>, vector<64x16xf32> -> vector<64x16xf32>
    %119 = arith.addf %112, %118 : vector<64x16xf32>
    %c16_102 = arith.constant 16 : index
    %c0_103 = arith.constant 0 : index
    %120 = vector.load %arg25[%c16_102, %c0_103] : memref<96x16xf32, #tpu.memory_space<vmem>>, vector<64x16xf32>
    %c4_104 = arith.constant 4 : index
    %c0_105 = arith.constant 0 : index
    %c0_106 = arith.constant 0 : index
    %121 = vector.load %arg10[%c4_104, %c0_105, %c0_106] : memref<9x16x16xf32, #tpu.memory_space<vmem>>, vector<1x16x16xf32>
    %122 = vector.shape_cast %121 : vector<1x16x16xf32> to vector<16x16xf32>
    %cst_107 = arith.constant dense<0.000000e+00> : vector<64x16xf32>
    %123 = tpu.matmul %120, %122, %cst_107 {dimension_numbers = #tpu.dot_dimension_numbers<[1], [0], [0], [1], [0, 0, 1, 1], [], []>} : vector<64x16xf32>, vector<16x16xf32>, vector<64x16xf32> -> vector<64x16xf32>
    %124 = arith.addf %119, %123 : vector<64x16xf32>
    %c17 = arith.constant 17 : index
    %c0_108 = arith.constant 0 : index
    %125 = vector.load %arg25[%c17, %c0_108] : memref<96x16xf32, #tpu.memory_space<vmem>>, vector<64x16xf32>
    %126 = vector.broadcast %92 : vector<64x1xf32> to vector<64x16xf32>
    %127 = arith.mulf %125, %126 : vector<64x16xf32>
    %c5_109 = arith.constant 5 : index
    %c0_110 = arith.constant 0 : index
    %c0_111 = arith.constant 0 : index
    %128 = vector.load %arg10[%c5_109, %c0_110, %c0_111] : memref<9x16x16xf32, #tpu.memory_space<vmem>>, vector<1x16x16xf32>
    %129 = vector.shape_cast %128 : vector<1x16x16xf32> to vector<16x16xf32>
    %cst_112 = arith.constant dense<0.000000e+00> : vector<64x16xf32>
    %130 = tpu.matmul %127, %129, %cst_112 {dimension_numbers = #tpu.dot_dimension_numbers<[1], [0], [0], [1], [0, 0, 1, 1], [], []>} : vector<64x16xf32>, vector<16x16xf32>, vector<64x16xf32> -> vector<64x16xf32>
    %131 = arith.addf %124, %130 : vector<64x16xf32>
    %c23 = arith.constant 23 : index
    %c0_113 = arith.constant 0 : index
    %132 = vector.load %arg25[%c23, %c0_113] : memref<96x16xf32, #tpu.memory_space<vmem>>, vector<64x16xf32>
    %133 = vector.broadcast %91 : vector<64x1xf32> to vector<64x16xf32>
    %134 = arith.mulf %132, %133 : vector<64x16xf32>
    %c6_114 = arith.constant 6 : index
    %c0_115 = arith.constant 0 : index
    %c0_116 = arith.constant 0 : index
    %135 = vector.load %arg10[%c6_114, %c0_115, %c0_116] : memref<9x16x16xf32, #tpu.memory_space<vmem>>, vector<1x16x16xf32>
    %136 = vector.shape_cast %135 : vector<1x16x16xf32> to vector<16x16xf32>
    %cst_117 = arith.constant dense<0.000000e+00> : vector<64x16xf32>
    %137 = tpu.matmul %134, %136, %cst_117 {dimension_numbers = #tpu.dot_dimension_numbers<[1], [0], [0], [1], [0, 0, 1, 1], [], []>} : vector<64x16xf32>, vector<16x16xf32>, vector<64x16xf32> -> vector<64x16xf32>
    %138 = arith.addf %131, %137 : vector<64x16xf32>
    %c24 = arith.constant 24 : index
    %c0_118 = arith.constant 0 : index
    %139 = vector.load %arg25[%c24, %c0_118] : memref<96x16xf32, #tpu.memory_space<vmem>>, vector<64x16xf32>
    %c7_119 = arith.constant 7 : index
    %c0_120 = arith.constant 0 : index
    %c0_121 = arith.constant 0 : index
    %140 = vector.load %arg10[%c7_119, %c0_120, %c0_121] : memref<9x16x16xf32, #tpu.memory_space<vmem>>, vector<1x16x16xf32>
    %141 = vector.shape_cast %140 : vector<1x16x16xf32> to vector<16x16xf32>
    %cst_122 = arith.constant dense<0.000000e+00> : vector<64x16xf32>
    %142 = tpu.matmul %139, %141, %cst_122 {dimension_numbers = #tpu.dot_dimension_numbers<[1], [0], [0], [1], [0, 0, 1, 1], [], []>} : vector<64x16xf32>, vector<16x16xf32>, vector<64x16xf32> -> vector<64x16xf32>
    %143 = arith.addf %138, %142 : vector<64x16xf32>
    %c25 = arith.constant 25 : index
    %c0_123 = arith.constant 0 : index
    %144 = vector.load %arg25[%c25, %c0_123] : memref<96x16xf32, #tpu.memory_space<vmem>>, vector<64x16xf32>
    %145 = vector.broadcast %92 : vector<64x1xf32> to vector<64x16xf32>
    %146 = arith.mulf %144, %145 : vector<64x16xf32>
    %c8_124 = arith.constant 8 : index
    %c0_125 = arith.constant 0 : index
    %c0_126 = arith.constant 0 : index
    %147 = vector.load %arg10[%c8_124, %c0_125, %c0_126] : memref<9x16x16xf32, #tpu.memory_space<vmem>>, vector<1x16x16xf32>
    %148 = vector.shape_cast %147 : vector<1x16x16xf32> to vector<16x16xf32>
    %cst_127 = arith.constant dense<0.000000e+00> : vector<64x16xf32>
    %149 = tpu.matmul %146, %148, %cst_127 {dimension_numbers = #tpu.dot_dimension_numbers<[1], [0], [0], [1], [0, 0, 1, 1], [], []>} : vector<64x16xf32>, vector<16x16xf32>, vector<64x16xf32> -> vector<64x16xf32>
    %150 = arith.addf %143, %149 : vector<64x16xf32>
    %c0_128 = arith.constant 0 : index
    %c0_129 = arith.constant 0 : index
    %151 = vector.load %arg11[%c0_128, %c0_129] : memref<1x16xf32, #tpu.memory_space<vmem>>, vector<1x16xf32>
    %152 = vector.broadcast %151 : vector<1x16xf32> to vector<64x16xf32>
    %153 = arith.addf %150, %152 : vector<64x16xf32>
    %c0_130 = arith.constant 0 : index
    %c0_131 = arith.constant 0 : index
    %c0_132 = arith.constant 0 : index
    %154 = vector.load %arg22[%c0_130, %c0_131, %c0_132] : memref<1x64x16xf32, #tpu.memory_space<vmem>>, vector<1x64x16xf32>
    %155 = vector.shape_cast %154 : vector<1x64x16xf32> to vector<64x16xf32>
    %156 = vector.shape_cast %153 : vector<64x16xf32> to vector<1x64x16xf32>
    tpu.vector_store %arg22[%c0_130, %c0_131, %c0_132], %156 {strides = array<i32>} : memref<1x64x16xf32, #tpu.memory_space<vmem>>, vector<1x64x16xf32>,
    %c0_133 = arith.constant 0 : index
    %c0_134 = arith.constant 0 : index
    %c0_135 = arith.constant 0 : index
    %157 = vector.load %arg1[%c0_133, %c0_134, %c0_135] : memref<1x256x8xf32, #tpu.memory_space<vmem>>, vector<1x256x8xf32>
    %158 = vector.shape_cast %157 : vector<1x256x8xf32> to vector<256x8xf32>
    %c0_136 = arith.constant 0 : index
    %c0_137 = arith.constant 0 : index
    %159 = vector.load %arg2[%c0_136, %c0_137] : memref<8x16xf32, #tpu.memory_space<vmem>>, vector<8x16xf32>
    %cst_138 = arith.constant dense<0.000000e+00> : vector<256x16xf32>
    %160 = tpu.matmul %158, %159, %cst_138 {dimension_numbers = #tpu.dot_dimension_numbers<[1], [0], [0], [1], [0, 0, 1, 1], [], []>} : vector<256x8xf32>, vector<8x16xf32>, vector<256x16xf32> -> vector<256x16xf32>
    %c0_139 = arith.constant 0 : index
    %c0_140 = arith.constant 0 : index
    %161 = vector.load %arg3[%c0_139, %c0_140] : memref<1x16xf32, #tpu.memory_space<vmem>>, vector<1x16xf32>
    %162 = vector.broadcast %161 : vector<1x16xf32> to vector<256x16xf32>
    %163 = arith.addf %160, %162 : vector<256x16xf32>
    %c0_141 = arith.constant 0 : index
    %c0_142 = arith.constant 0 : index
    %164 = vector.load %arg19[%c0_141, %c0_142] : memref<256x64xf32, #tpu.memory_space<vmem>>, vector<256x64xf32>
    %cst_143 = arith.constant dense<0.000000e+00> : vector<256x16xf32>
    %165 = tpu.matmul %164, %86, %cst_143 {dimension_numbers = #tpu.dot_dimension_numbers<[1], [0], [0], [1], [0, 0, 1, 1], [], []>} : vector<256x64xf32>, vector<64x16xf32>, vector<256x16xf32> -> vector<256x16xf32>
    %166 = arith.addf %163, %165 : vector<256x16xf32>
    %cst_144 = arith.constant 0.000000e+00 : f32
    %167 = vector.broadcast %cst_144 : f32 to vector<304x16xf32>
    %c0_145 = arith.constant 0 : index
    %c0_146 = arith.constant 0 : index
    %168 = vector.load %arg24[%c0_145, %c0_146] : memref<304x16xf32, #tpu.memory_space<vmem>>, vector<304x16xf32>
    tpu.vector_store %arg24[%c0_145, %c0_146], %167 {strides = array<i32>} : memref<304x16xf32, #tpu.memory_space<vmem>>, vector<304x16xf32>,
    %c24_147 = arith.constant 24 : index
    %c0_148 = arith.constant 0 : index
    %169 = vector.load %arg24[%c24_147, %c0_148] : memref<304x16xf32, #tpu.memory_space<vmem>>, vector<256x16xf32>
    tpu.vector_store %arg24[%c24_147, %c0_148], %166 {strides = array<i32>} : memref<304x16xf32, #tpu.memory_space<vmem>>, vector<256x16xf32>,
    %c0_149 = arith.constant 0 : index
    %c0_150 = arith.constant 0 : index
    %170 = vector.load %arg6[%c0_149, %c0_150] : memref<256x2xf32, #tpu.memory_space<vmem>>, vector<256x2xf32>
    %171 = vector.extract_strided_slice %170 {offsets = [0, 0], sizes = [256, 1], strides = [1, 1]} : vector<256x2xf32> to vector<256x1xf32>
    %172 = vector.extract_strided_slice %170 {offsets = [0, 1], sizes = [256, 1], strides = [1, 1]} : vector<256x2xf32> to vector<256x1xf32>
    %cst_151 = arith.constant 0.000000e+00 : f32
    %173 = vector.broadcast %cst_151 : f32 to vector<256x16xf32>
    %c7_152 = arith.constant 7 : index
    %c0_153 = arith.constant 0 : index
    %174 = vector.load %arg24[%c7_152, %c0_153] : memref<304x16xf32, #tpu.memory_space<vmem>>, vector<256x16xf32>
    %175 = vector.broadcast %171 : vector<256x1xf32> to vector<256x16xf32>
    %176 = arith.mulf %174, %175 : vector<256x16xf32>
    %c0_154 = arith.constant 0 : index
    %c0_155 = arith.constant 0 : index
    %c0_156 = arith.constant 0 : index
    %177 = vector.load %arg4[%c0_154, %c0_155, %c0_156] : memref<9x16x16xf32, #tpu.memory_space<vmem>>, vector<1x16x16xf32>
    %178 = vector.shape_cast %177 : vector<1x16x16xf32> to vector<16x16xf32>
    %cst_157 = arith.constant dense<0.000000e+00> : vector<256x16xf32>
    %179 = tpu.matmul %176, %178, %cst_157 {dimension_numbers = #tpu.dot_dimension_numbers<[1], [0], [0], [1], [0, 0, 1, 1], [], []>} : vector<256x16xf32>, vector<16x16xf32>, vector<256x16xf32> -> vector<256x16xf32>
    %180 = arith.addf %173, %179 : vector<256x16xf32>
    %c8_158 = arith.constant 8 : index
    %c0_159 = arith.constant 0 : index
    %181 = vector.load %arg24[%c8_158, %c0_159] : memref<304x16xf32, #tpu.memory_space<vmem>>, vector<256x16xf32>
    %c1_160 = arith.constant 1 : index
    %c0_161 = arith.constant 0 : index
    %c0_162 = arith.constant 0 : index
    %182 = vector.load %arg4[%c1_160, %c0_161, %c0_162] : memref<9x16x16xf32, #tpu.memory_space<vmem>>, vector<1x16x16xf32>
    %183 = vector.shape_cast %182 : vector<1x16x16xf32> to vector<16x16xf32>
    %cst_163 = arith.constant dense<0.000000e+00> : vector<256x16xf32>
    %184 = tpu.matmul %181, %183, %cst_163 {dimension_numbers = #tpu.dot_dimension_numbers<[1], [0], [0], [1], [0, 0, 1, 1], [], []>} : vector<256x16xf32>, vector<16x16xf32>, vector<256x16xf32> -> vector<256x16xf32>
    %185 = arith.addf %180, %184 : vector<256x16xf32>
    %c9_164 = arith.constant 9 : index
    %c0_165 = arith.constant 0 : index
    %186 = vector.load %arg24[%c9_164, %c0_165] : memref<304x16xf32, #tpu.memory_space<vmem>>, vector<256x16xf32>
    %187 = vector.broadcast %172 : vector<256x1xf32> to vector<256x16xf32>
    %188 = arith.mulf %186, %187 : vector<256x16xf32>
    %c2_166 = arith.constant 2 : index
    %c0_167 = arith.constant 0 : index
    %c0_168 = arith.constant 0 : index
    %189 = vector.load %arg4[%c2_166, %c0_167, %c0_168] : memref<9x16x16xf32, #tpu.memory_space<vmem>>, vector<1x16x16xf32>
    %190 = vector.shape_cast %189 : vector<1x16x16xf32> to vector<16x16xf32>
    %cst_169 = arith.constant dense<0.000000e+00> : vector<256x16xf32>
    %191 = tpu.matmul %188, %190, %cst_169 {dimension_numbers = #tpu.dot_dimension_numbers<[1], [0], [0], [1], [0, 0, 1, 1], [], []>} : vector<256x16xf32>, vector<16x16xf32>, vector<256x16xf32> -> vector<256x16xf32>
    %192 = arith.addf %185, %191 : vector<256x16xf32>
    %c23_170 = arith.constant 23 : index
    %c0_171 = arith.constant 0 : index
    %193 = vector.load %arg24[%c23_170, %c0_171] : memref<304x16xf32, #tpu.memory_space<vmem>>, vector<256x16xf32>
    %194 = vector.broadcast %171 : vector<256x1xf32> to vector<256x16xf32>
    %195 = arith.mulf %193, %194 : vector<256x16xf32>
    %c3_172 = arith.constant 3 : index
    %c0_173 = arith.constant 0 : index
    %c0_174 = arith.constant 0 : index
    %196 = vector.load %arg4[%c3_172, %c0_173, %c0_174] : memref<9x16x16xf32, #tpu.memory_space<vmem>>, vector<1x16x16xf32>
    %197 = vector.shape_cast %196 : vector<1x16x16xf32> to vector<16x16xf32>
    %cst_175 = arith.constant dense<0.000000e+00> : vector<256x16xf32>
    %198 = tpu.matmul %195, %197, %cst_175 {dimension_numbers = #tpu.dot_dimension_numbers<[1], [0], [0], [1], [0, 0, 1, 1], [], []>} : vector<256x16xf32>, vector<16x16xf32>, vector<256x16xf32> -> vector<256x16xf32>
    %199 = arith.addf %192, %198 : vector<256x16xf32>
    %c24_176 = arith.constant 24 : index
    %c0_177 = arith.constant 0 : index
    %200 = vector.load %arg24[%c24_176, %c0_177] : memref<304x16xf32, #tpu.memory_space<vmem>>, vector<256x16xf32>
    %c4_178 = arith.constant 4 : index
    %c0_179 = arith.constant 0 : index
    %c0_180 = arith.constant 0 : index
    %201 = vector.load %arg4[%c4_178, %c0_179, %c0_180] : memref<9x16x16xf32, #tpu.memory_space<vmem>>, vector<1x16x16xf32>
    %202 = vector.shape_cast %201 : vector<1x16x16xf32> to vector<16x16xf32>
    %cst_181 = arith.constant dense<0.000000e+00> : vector<256x16xf32>
    %203 = tpu.matmul %200, %202, %cst_181 {dimension_numbers = #tpu.dot_dimension_numbers<[1], [0], [0], [1], [0, 0, 1, 1], [], []>} : vector<256x16xf32>, vector<16x16xf32>, vector<256x16xf32> -> vector<256x16xf32>
    %204 = arith.addf %199, %203 : vector<256x16xf32>
    %c25_182 = arith.constant 25 : index
    %c0_183 = arith.constant 0 : index
    %205 = vector.load %arg24[%c25_182, %c0_183] : memref<304x16xf32, #tpu.memory_space<vmem>>, vector<256x16xf32>
    %206 = vector.broadcast %172 : vector<256x1xf32> to vector<256x16xf32>
    %207 = arith.mulf %205, %206 : vector<256x16xf32>
    %c5_184 = arith.constant 5 : index
    %c0_185 = arith.constant 0 : index
    %c0_186 = arith.constant 0 : index
    %208 = vector.load %arg4[%c5_184, %c0_185, %c0_186] : memref<9x16x16xf32, #tpu.memory_space<vmem>>, vector<1x16x16xf32>
    %209 = vector.shape_cast %208 : vector<1x16x16xf32> to vector<16x16xf32>
    %cst_187 = arith.constant dense<0.000000e+00> : vector<256x16xf32>
    %210 = tpu.matmul %207, %209, %cst_187 {dimension_numbers = #tpu.dot_dimension_numbers<[1], [0], [0], [1], [0, 0, 1, 1], [], []>} : vector<256x16xf32>, vector<16x16xf32>, vector<256x16xf32> -> vector<256x16xf32>
    %211 = arith.addf %204, %210 : vector<256x16xf32>
    %c39 = arith.constant 39 : index
    %c0_188 = arith.constant 0 : index
    %212 = vector.load %arg24[%c39, %c0_188] : memref<304x16xf32, #tpu.memory_space<vmem>>, vector<256x16xf32>
    %213 = vector.broadcast %171 : vector<256x1xf32> to vector<256x16xf32>
    %214 = arith.mulf %212, %213 : vector<256x16xf32>
    %c6_189 = arith.constant 6 : index
    %c0_190 = arith.constant 0 : index
    %c0_191 = arith.constant 0 : index
    %215 = vector.load %arg4[%c6_189, %c0_190, %c0_191] : memref<9x16x16xf32, #tpu.memory_space<vmem>>, vector<1x16x16xf32>
    %216 = vector.shape_cast %215 : vector<1x16x16xf32> to vector<16x16xf32>
    %cst_192 = arith.constant dense<0.000000e+00> : vector<256x16xf32>
    %217 = tpu.matmul %214, %216, %cst_192 {dimension_numbers = #tpu.dot_dimension_numbers<[1], [0], [0], [1], [0, 0, 1, 1], [], []>} : vector<256x16xf32>, vector<16x16xf32>, vector<256x16xf32> -> vector<256x16xf32>
    %218 = arith.addf %211, %217 : vector<256x16xf32>
    %c40 = arith.constant 40 : index
    %c0_193 = arith.constant 0 : index
    %219 = vector.load %arg24[%c40, %c0_193] : memref<304x16xf32, #tpu.memory_space<vmem>>, vector<256x16xf32>
    %c7_194 = arith.constant 7 : index
    %c0_195 = arith.constant 0 : index
    %c0_196 = arith.constant 0 : index
    %220 = vector.load %arg4[%c7_194, %c0_195, %c0_196] : memref<9x16x16xf32, #tpu.memory_space<vmem>>, vector<1x16x16xf32>
    %221 = vector.shape_cast %220 : vector<1x16x16xf32> to vector<16x16xf32>
    %cst_197 = arith.constant dense<0.000000e+00> : vector<256x16xf32>
    %222 = tpu.matmul %219, %221, %cst_197 {dimension_numbers = #tpu.dot_dimension_numbers<[1], [0], [0], [1], [0, 0, 1, 1], [], []>} : vector<256x16xf32>, vector<16x16xf32>, vector<256x16xf32> -> vector<256x16xf32>
    %223 = arith.addf %218, %222 : vector<256x16xf32>
    %c41 = arith.constant 41 : index
    %c0_198 = arith.constant 0 : index
    %224 = vector.load %arg24[%c41, %c0_198] : memref<304x16xf32, #tpu.memory_space<vmem>>, vector<256x16xf32>
    %225 = vector.broadcast %172 : vector<256x1xf32> to vector<256x16xf32>
    %226 = arith.mulf %224, %225 : vector<256x16xf32>
    %c8_199 = arith.constant 8 : index
    %c0_200 = arith.constant 0 : index
    %c0_201 = arith.constant 0 : index
    %227 = vector.load %arg4[%c8_199, %c0_200, %c0_201] : memref<9x16x16xf32, #tpu.memory_space<vmem>>, vector<1x16x16xf32>
    %228 = vector.shape_cast %227 : vector<1x16x16xf32> to vector<16x16xf32>
    %cst_202 = arith.constant dense<0.000000e+00> : vector<256x16xf32>
    %229 = tpu.matmul %226, %228, %cst_202 {dimension_numbers = #tpu.dot_dimension_numbers<[1], [0], [0], [1], [0, 0, 1, 1], [], []>} : vector<256x16xf32>, vector<16x16xf32>, vector<256x16xf32> -> vector<256x16xf32>
    %230 = arith.addf %223, %229 : vector<256x16xf32>
    %c0_203 = arith.constant 0 : index
    %c0_204 = arith.constant 0 : index
    %231 = vector.load %arg5[%c0_203, %c0_204] : memref<1x16xf32, #tpu.memory_space<vmem>>, vector<1x16xf32>
    %232 = vector.broadcast %231 : vector<1x16xf32> to vector<256x16xf32>
    %233 = arith.addf %230, %232 : vector<256x16xf32>
    %c0_205 = arith.constant 0 : index
    %c0_206 = arith.constant 0 : index
    %c0_207 = arith.constant 0 : index
    %234 = vector.load %arg21[%c0_205, %c0_206, %c0_207] : memref<1x256x16xf32, #tpu.memory_space<vmem>>, vector<1x256x16xf32>
    %235 = vector.shape_cast %234 : vector<1x256x16xf32> to vector<256x16xf32>
    %236 = vector.shape_cast %233 : vector<256x16xf32> to vector<1x256x16xf32>
    tpu.vector_store %arg21[%c0_205, %c0_206, %c0_207], %236 {strides = array<i32>} : memref<1x256x16xf32, #tpu.memory_space<vmem>>, vector<1x256x16xf32>,
    return
  }
  func.func @transform_0(%arg0: i32) -> (i32, i32, i32) {
    %c0_i32 = arith.constant 0 : i32
    %c0_i32_0 = arith.constant 0 : i32
    %c0_i32_1 = arith.constant 0 : i32
    return %arg0, %c0_i32, %c0_i32_0 : i32, i32, i32
  }
  func.func @transform_1(%arg0: i32) -> (i32, i32) {
    %c0_i32 = arith.constant 0 : i32
    %c0_i32_0 = arith.constant 0 : i32
    %c0_i32_1 = arith.constant 0 : i32
    return %c0_i32, %c0_i32_0 : i32, i32
  }
  func.func @transform_2(%arg0: i32) -> (i32, i32) {
    %c0_i32 = arith.constant 0 : i32
    %c0_i32_0 = arith.constant 0 : i32
    %c0_i32_1 = arith.constant 0 : i32
    return %c0_i32, %c0_i32_0 : i32, i32
  }
  func.func @transform_3(%arg0: i32) -> (i32, i32, i32) {
    %c0_i32 = arith.constant 0 : i32
    %c0_i32_0 = arith.constant 0 : i32
    %c0_i32_1 = arith.constant 0 : i32
    %c0_i32_2 = arith.constant 0 : i32
    return %c0_i32, %c0_i32_0, %c0_i32_1 : i32, i32, i32
  }
  func.func @transform_4(%arg0: i32) -> (i32, i32) {
    %c0_i32 = arith.constant 0 : i32
    %c0_i32_0 = arith.constant 0 : i32
    %c0_i32_1 = arith.constant 0 : i32
    return %c0_i32, %c0_i32_0 : i32, i32
  }
  func.func @transform_5(%arg0: i32) -> (i32, i32) {
    %c0_i32 = arith.constant 0 : i32
    %c0_i32_0 = arith.constant 0 : i32
    %c0_i32_1 = arith.constant 0 : i32
    return %c0_i32, %c0_i32_0 : i32, i32
  }
  func.func @transform_6(%arg0: i32) -> (i32, i32, i32) {
    %c0_i32 = arith.constant 0 : i32
    %c0_i32_0 = arith.constant 0 : i32
    %c0_i32_1 = arith.constant 0 : i32
    return %arg0, %c0_i32, %c0_i32_0 : i32, i32, i32
  }
  func.func @transform_7(%arg0: i32) -> (i32, i32) {
    %c0_i32 = arith.constant 0 : i32
    %c0_i32_0 = arith.constant 0 : i32
    %c0_i32_1 = arith.constant 0 : i32
    return %c0_i32, %c0_i32_0 : i32, i32
  }
  func.func @transform_8(%arg0: i32) -> (i32, i32) {
    %c0_i32 = arith.constant 0 : i32
    %c0_i32_0 = arith.constant 0 : i32
    %c0_i32_1 = arith.constant 0 : i32
    return %c0_i32, %c0_i32_0 : i32, i32
  }
  func.func @transform_9(%arg0: i32) -> (i32, i32, i32) {
    %c0_i32 = arith.constant 0 : i32
    %c0_i32_0 = arith.constant 0 : i32
    %c0_i32_1 = arith.constant 0 : i32
    %c0_i32_2 = arith.constant 0 : i32
    return %c0_i32, %c0_i32_0, %c0_i32_1 : i32, i32, i32
  }
  func.func @transform_10(%arg0: i32) -> (i32, i32) {
    %c0_i32 = arith.constant 0 : i32
    %c0_i32_0 = arith.constant 0 : i32
    %c0_i32_1 = arith.constant 0 : i32
    return %c0_i32, %c0_i32_0 : i32, i32
  }
  func.func @transform_11(%arg0: i32) -> (i32, i32) {
    %c0_i32 = arith.constant 0 : i32
    %c0_i32_0 = arith.constant 0 : i32
    %c0_i32_1 = arith.constant 0 : i32
    return %c0_i32, %c0_i32_0 : i32, i32
  }
  func.func @transform_12(%arg0: i32) -> (i32, i32, i32) {
    %c0_i32 = arith.constant 0 : i32
    %c0_i32_0 = arith.constant 0 : i32
    %c0_i32_1 = arith.constant 0 : i32
    return %arg0, %c0_i32, %c0_i32_0 : i32, i32, i32
  }
  func.func @transform_13(%arg0: i32) -> (i32, i32) {
    %c0_i32 = arith.constant 0 : i32
    %c0_i32_0 = arith.constant 0 : i32
    %c0_i32_1 = arith.constant 0 : i32
    return %c0_i32, %c0_i32_0 : i32, i32
  }
  func.func @transform_14(%arg0: i32) -> (i32, i32) {
    %c0_i32 = arith.constant 0 : i32
    %c0_i32_0 = arith.constant 0 : i32
    %c0_i32_1 = arith.constant 0 : i32
    return %c0_i32, %c0_i32_0 : i32, i32
  }
  func.func @transform_15(%arg0: i32) -> (i32, i32, i32) {
    %c0_i32 = arith.constant 0 : i32
    %c0_i32_0 = arith.constant 0 : i32
    %c0_i32_1 = arith.constant 0 : i32
    %c0_i32_2 = arith.constant 0 : i32
    return %c0_i32, %c0_i32_0, %c0_i32_1 : i32, i32, i32
  }
  func.func @transform_16(%arg0: i32) -> (i32, i32) {
    %c0_i32 = arith.constant 0 : i32
    %c0_i32_0 = arith.constant 0 : i32
    %c0_i32_1 = arith.constant 0 : i32
    return %c0_i32, %c0_i32_0 : i32, i32
  }
  func.func @transform_17(%arg0: i32) -> (i32, i32) {
    %c0_i32 = arith.constant 0 : i32
    %c0_i32_0 = arith.constant 0 : i32
    %c0_i32_1 = arith.constant 0 : i32
    return %c0_i32, %c0_i32_0 : i32, i32
  }
  func.func @transform_18(%arg0: i32) -> (i32, i32) {
    %c0_i32 = arith.constant 0 : i32
    %c0_i32_0 = arith.constant 0 : i32
    %c0_i32_1 = arith.constant 0 : i32
    return %c0_i32, %c0_i32_0 : i32, i32
  }
  func.func @transform_19(%arg0: i32) -> (i32, i32) {
    %c0_i32 = arith.constant 0 : i32
    %c0_i32_0 = arith.constant 0 : i32
    %c0_i32_1 = arith.constant 0 : i32
    return %c0_i32, %c0_i32_0 : i32, i32
  }
  func.func @transform_20(%arg0: i32) -> (i32, i32, i32) {
    %c0_i32 = arith.constant 0 : i32
    %c0_i32_0 = arith.constant 0 : i32
    %c0_i32_1 = arith.constant 0 : i32
    return %arg0, %c0_i32, %c0_i32_0 : i32, i32, i32
  }
  func.func @transform_21(%arg0: i32) -> (i32, i32, i32) {
    %c0_i32 = arith.constant 0 : i32
    %c0_i32_0 = arith.constant 0 : i32
    %c0_i32_1 = arith.constant 0 : i32
    return %arg0, %c0_i32, %c0_i32_0 : i32, i32, i32
  }
  func.func @transform_22(%arg0: i32) -> (i32, i32, i32) {
    %c0_i32 = arith.constant 0 : i32
    %c0_i32_0 = arith.constant 0 : i32
    %c0_i32_1 = arith.constant 0 : i32
    return %arg0, %c0_i32, %c0_i32_0 : i32, i32, i32
  }
}

</mosaic_0001>

<bundles_post_ra>
// kernel: tpu_custom_call.1
= control target key start
LH: loop header
LB: loop body
LE: loop exit
PB: predicated region body
PF: predicated region fallthrough
CT: control target
= control target key end

     0   :  { %s13722_s0 = inlined_call_operand.vmem [shape: f32[2,256,8], index: 0, kind: input, shape index: {}]   ;;  %s13723_s1 = inlined_call_operand.vmem [shape: f32[8,16], index: 1, kind: input, shape index: {}]   ;;  %s13724_s2 = inlined_call_operand.vmem [shape: f32[1,16], index: 2, kind: input, shape index: {}]   ;;  %s13725_s3 = inlined_call_operand.vmem [shape: f32[9,16,16], index: 3, kind: input, shape index: {}]   ;;  %s13726_s4 = inlined_call_operand.vmem [shape: f32[1,16], index: 4, kind: input, shape index: {}]   ;;  %s13727_s5 = inlined_call_operand.vmem [shape: f32[256,2], index: 5, kind: input, shape index: {}]   ;;  %s13728_s6 = inlined_call_operand.vmem [shape: f32[2,64,16], index: 6, kind: input, shape index: {}]   ;;  %s13729_s7 = inlined_call_operand.vmem [shape: f32[16,16], index: 7, kind: input, shape index: {}]   ;;  %s13730_s8 = inlined_call_operand.vmem [shape: f32[1,16], index: 8, kind: input, shape index: {}]   ;;  %s13731_s9 = inlined_call_operand.vmem [shape: f32[9,16,16], index: 9, kind: input, shape index: {}]   ;;  %s13732_s10 = inlined_call_operand.vmem [shape: f32[1,16], index: 10, kind: input, shape index: {}]   ;;  %s13733_s11 = inlined_call_operand.vmem [shape: f32[64,2], index: 11, kind: input, shape index: {}]   ;;  %s13734_s12 = inlined_call_operand.vmem [shape: f32[2,16,32], index: 12, kind: input, shape index: {}]   ;;  %s13735_s13 = inlined_call_operand.vmem [shape: f32[32,16], index: 13, kind: input, shape index: {}]   ;;  %s13736_s14 = inlined_call_operand.vmem [shape: f32[1,16], index: 14, kind: input, shape index: {}]   ;;  %s13737_s15 = inlined_call_operand.vmem [shape: f32[9,16,16], index: 15, kind: input, shape index: {}]   ;;  %s13738_s16 = inlined_call_operand.vmem [shape: f32[1,16], index: 16, kind: input, shape index: {}]   ;;  %s13739_s17 = inlined_call_operand.vmem [shape: f32[16,2], index: 17, kind: input, shape index: {}]   ;;  %s13740_s18 = inlined_call_operand.vmem [shape: f32[256,64], index: 18, kind: input, shape index: {}]   ;;  %s13741_s19 = inlined_call_operand.vmem [shape: f32[64,16], index: 19, kind: input, shape index: {}]   ;;  %s13742_s20 = inlined_call_operand.vmem [shape: f32[2,256,16], index: 20, kind: output, shape index: {0}]   ;;  %s13743_s21 = inlined_call_operand.vmem [shape: f32[2,64,16], index: 21, kind: output, shape index: {1}]   ;;  %s13744_s22 = inlined_call_operand.hbm [shape: f32[2,16,16], index: 22, kind: output, shape index: {2}]  }
   0x1   :  { %13870 = sst [smem:[#allocation105_spill]] %s13722_s0 }
   0x2   :  { %13871 = sst [smem:[#allocation106_spill]] %s13723_s1 }
   0x3   :  { %13872 = sst [smem:[#allocation107_spill]] %s13724_s2 }
   0x4   :  { %13873 = sst [smem:[#allocation108_spill]] %s13725_s3 }
   0x5   :  { %13874 = sst [smem:[#allocation109_spill]] %s13726_s4 }
   0x6   :  { %13875 = sst [smem:[#allocation110_spill]] %s13727_s5 }
   0x7   :  { %13876 = sst [smem:[#allocation111_spill]] %s13728_s6 }
   0x8   :  { %13877 = sst [smem:[#allocation112_spill]] %s13729_s7 }
   0x9   :  { %13878 = sst [smem:[#allocation113_spill]] %s13730_s8 }
   0xa   :  { %13879 = sst [smem:[#allocation114_spill]] %s13733_s11 }
   0xb   :  { %13880 = sst [smem:[#allocation115_spill]] %s13734_s12 }
   0xc   :  { %13881 = sst [smem:[#allocation116_spill]] %s13739_s17 }
   0xd   :  { %28 = vsyncpa [#allocation6], 0 }
   0xe   :  { %30 = vsyncpa [#allocation6 + $0x1], 0  ;;  %s10624_s3 = smov 0   ;;  %s10626_s28 = smov 0  }
   0xf   :  { %s10628_s29 = smov 0   ;;  %s10630_s30 = smov 0  }
  0x10 LB: > { %13882 = sst [smem:[#allocation8_spill]] %s10497_s29  ;;  %s10645_s4 = sadd.s32 4294967295, %s10501_s30   ;;  %s10501_s30 = sphi %s10630_s30, %s14251_s30   ;;  %s10497_s29 = sphi %s10628_s29, %s14248_s29   ;;  %s10493_s28 = sphi %s10626_s28, %s14250_s28   ;;  %s10489_s3 = sphi %s10624_s3, %s14249_s3  }
  0x11   : > { %s8450_s0 = sadd.s32 4294967294, %s10501_s30   ;;  %s10649_s23 = sadd.s32 1, %s10501_s30  }
  0x12   : > { %s530_s1 = sadd.s32 1, %s10497_s29  ;;  %s527_s5 = ssub.s32 %s10501_s30, %s10649_s23 }
  0x13   : > { %p540_p0 = scmp.ne.s32.totalorder %s10497_s29, %s10493_s28  ;;  %p528_p1 = scmp.eq.s32.totalorder %s527_s5, 0 }
  0x14   : > { %p541_p2 = scmp.eq.s32.totalorder %s10645_s4, 1  ;;  %p546_p3 = scmp.ne.s32.totalorder %s10493_s28, %s10489_s3 }
  0x15   : > { %p547_p4 = scmp.eq.s32.totalorder %s8450_s0, 1  ;;  %p8453_p7 = scmp.ge.s32.totalorder %s10501_s30, 1 }
  0x16   : > { %s10660_s24 = scalar_select %p528_p1, %s10497_s29, %s530_s1  }
  0x17   : > { %p10662_p5 = por %p541_p2, %p540_p0  ;;  %p10666_p6 = por %p547_p4, %p546_p3 }
  0x18   : > { %13883 = sst [smem:[#allocation9_spill]] %s10660_s24  ;;  %p640_p8 = scmp.lt.s32.totalorder %s10501_s30, 3 }
  0x1a   : > { %p641_p9 = pnand %p8453_p7, %p640_p8 }
  0x1c   : > { %644 = sbr.rel (%p641_p9) target bundleno = 1318 (0x526), region = 100 }
  0x21   : > { %v752_v0 = vld [vmem:[%s13735_s13 + $0x18] sm:$0xff]  ;;  %v751_v1 = vld [vmem:[%s13735_s13 + $0x10] sm:$0xff]  ;;  %p722_p10 = scmp.lt.s32.totalorder %s10645_s4, 1  ;;  %v10503_v2 = vmov 1   ;;  %s13886_s17 = sld [smem:[#allocation116_spill]]  ;;  %v750_v4 = vld [vmem:[%s13735_s13 + $0x8] sm:$0xff] }
  0x22   : > { %9521 = vmatprep.subr.mxu0 %v752_v0  ;;  %10400 = vset.pattern.permute.xlu1 %v10503_v2  ;;  %v10504_v6 = vmov 0   ;;  %v749_v7 = vld [vmem:[%s13735_s13] sm:$0xff]  ;;  %vm760_vm0 = vcmask 261120   ;;  %s13887_s12 = sld [smem:[#allocation115_spill]]  ;;  %vm842_vm1 = vcmask 130048   ;;  %v10505_v14 = vmov 0.0  }
  0x23   : > { %9522 = vmatpush3.msra.mxu0 %v752_v0  ;;  %s10687_s26 = scalar_select %p722_p10, %s10645_s4, 1  ;;  %10399 = vset.pattern.permute.xlu0 %v10504_v6  ;;  %845 = vst.msk [vmem:[#allocation4 + $0x10] sm:$0xff] %vm842_vm1, %v10505_v14  ;;  %843 = vst.msk [vmem:[#allocation4] sm:$0xff] %vm842_vm1, %v10505_v14  ;;  %v8469_v15 = vld [vmem:[%s13737_s15 + $0x18] sm:$0xff]  ;;  %v8475_v16 = vld [vmem:[%s13737_s15 + $0x28] sm:$0xff]  ;;  %vm3496_vm2 = vcmask 64512  }
  0x24   : > { %9523 = vmatprep.subr.mxu0 %v751_v1  ;;  %s13888_s11 = sld [smem:[#allocation114_spill]]  ;;  %844 = vst.msk [vmem:[#allocation4 + $0x8] sm:$0xff] %vm842_vm1, %v10505_v14  ;;  %846 = vst.msk [vmem:[#allocation4 + $0x18] sm:$0xff] %vm842_vm1, %v10505_v14  ;;  %9532 = vmatprep.subr.mxu1 %v8469_v15  ;;  %v8468_v17 = vld [vmem:[%s13737_s15 + $0x10] sm:$0xff]  ;;  %v8474_v18 = vld [vmem:[%s13737_s15 + $0x20] sm:$0xff]  ;;  %s13748_s1 = sand.u32 1, %s10493_s28  }
  0x25   : > { %9524 = vmatpush3.msra.mxu0 %v751_v1  ;;  %s8986_s29 = sshll.u32 %s10687_s26, 4  ;;  %1970 = vst.msk [vmem:[#allocation3] sm:$0xff] %vm842_vm1, %v10505_v14  ;;  %1971 = vst.msk [vmem:[#allocation3 + $0x8] sm:$0xff] %vm842_vm1, %v10505_v14  ;;  %9533 = vmatpush3.msra.mxu1 %v8469_v15  ;;  %v866_v19 = vld [vmem:[%s13737_s15 + $0x8] sm:$0xff]  ;;  %s13889_s24 = sld [smem:[#allocation110_spill]]  ;;  %v865_v38 = vld [vmem:[%s13737_s15] sm:$0xff] }
  0x26   : > { %9525 = vmatprep.subr.mxu0 %v750_v4  ;;  %1972 = vst.msk [vmem:[#allocation3 + $0x10] sm:$0xff] %vm842_vm1, %v10505_v14  ;;  %1973 = vst.msk [vmem:[#allocation3 + $0x18] sm:$0xff] %vm842_vm1, %v10505_v14  ;;  %9534 = vmatprep.subr.mxu1 %v8468_v17  ;;  %v8483_v20 = vld [vmem:[%s13737_s15 + $0x48] sm:$0xff]  ;;  %v8465_v26 = vld [vmem:[%s13736_s14] ss:$0 sm:$0xff]  ;;  %s13749_s0 = sshll.u32 %s10687_s26, 6 }
  0x27   : > { %v849_v3 = vld [vmem:[%s13886_s17] sm:$0xff]  ;;  %v850_v5 = vld [vmem:[%s13886_s17 + $0x8] sm:$0xff]  ;;  %9526 = vmatpush3.msra.mxu0 %v750_v4  ;;  %1974 = vst.msk [vmem:[#allocation3 + $0x20] sm:$0xff] %vm842_vm1, %v10505_v14  ;;  %1975 = vst.msk [vmem:[#allocation3 + $0x28] sm:$0xff] %vm842_vm1, %v10505_v14  ;;  %9535 = vmatpush3.msra.mxu1 %v8468_v17  ;;  %s13891_s7 = sld [smem:[#allocation112_spill]]  ;;  %s8454_s17 = sshll.u32 %s13748_s1, 4 }
  0x28   : > { %1037 = vperm.xlu1 %10400, %v849_v3   ;;  %855 = vperm.xlu0 %10399, %v849_v3   ;;  %s736_s2 = scalar_lea.vmem %s13887_s12, %s8986_s29  ;;  %1976 = vst.msk [vmem:[#allocation3 + $0x30] sm:$0xff] %vm842_vm1, %v10505_v14  ;;  %1977 = vst.msk [vmem:[#allocation3 + $0x38] sm:$0xff] %vm842_vm1, %v10505_v14  ;;  %v8479_v44 = vld [vmem:[%s13737_s15 + $0x38] sm:$0xff]  ;;  %v8482_v46 = vld [vmem:[%s13737_s15 + $0x40] sm:$0xff]  ;;  %s13892_s8 = sld [smem:[#allocation113_spill]]  ;;  %vm3850_vm3 = vcmask 523264  }
  0x29   : > { %9527 = vmatprep.subr.mxu0 %v749_v7  ;;  %v747_v9 = vld [vmem:[%s736_s2] sm:$0xff]  ;;  %v748_v10 = vld [vmem:[%s736_s2 + $0x8] sm:$0xff]  ;;  %1978 = vst.msk [vmem:[#allocation3 + $0x40] sm:$0xff] %vm842_vm1, %v10505_v14  ;;  %1979 = vst.msk [vmem:[#allocation3 + $0x48] sm:$0xff] %vm842_vm1, %v10505_v14  ;;  %9539 = vmatprep.subr.mxu1 %v866_v19  ;;  %s13890_s2 = sld [smem:[#allocation111_spill]] }
  0x2a   : > { %v10703_v8 = vld [vmem:[%s13888_s11 + $0x8] sm:$0xff]  ;;  %9528 = vmatpush3.msra.mxu0 %v749_v7  ;;  %9529 = vmatprep.mubr.msk.f32.mxu0 %vm760_vm0, %v747_v9  ;;  %v10709_v11 = vld [vmem:[%s13888_s11 + $0x10] sm:$0xff]  ;;  %v10716_v12 = vld [vmem:[%s13888_s11 + $0x20] sm:$0xff]  ;;  %1980 = vst.msk [vmem:[#allocation3 + $0x50] sm:$0xff] %vm842_vm1, %v10505_v14  ;;  %s13893_s29 = sld [smem:[#allocation106_spill]] }
  0x2b   : > { %9530 = vmatmul.mubr.msk.f32.vlgmr.msra.gmra.mxu0 %vm760_vm0, %v748_v10  ;;  %v10722_v13 = vld [vmem:[%s13888_s11 + $0x30] sm:$0xff]  ;;  %1981 = vst.msk [vmem:[#allocation3 + $0x58] sm:$0xff] %vm842_vm1, %v10505_v14  ;;  %4204 = vst.msk [vmem:[#allocation2] sm:$0xff] %vm842_vm1, %v10505_v14  ;;  %9546 = vmatprep.subr.mxu0 %v8475_v16  ;;  %v1990_v21 = vld [vmem:[%s13888_s11] sm:$0xff]  ;;  %s13895_s1 = sld [smem:[#allocation105_spill]] }
  0x2c   : > { %1041 = vperm.xlu1 %10400, %v850_v5   ;;  %860 = vperm.xlu0 %10399, %v850_v5   ;;  %4205 = vst.msk [vmem:[#allocation2 + $0x8] sm:$0xff] %vm842_vm1, %v10505_v14  ;;  %4206 = vst.msk [vmem:[#allocation2 + $0x10] sm:$0xff] %vm842_vm1, %v10505_v14  ;;  %v1993_v22 = vld [vmem:[%s13888_s11 + $0x18] sm:$0xff]  ;;  %v1995_v23 = vld [vmem:[%s13888_s11 + $0x28] sm:$0xff] }
  0x2d   : > { %4207 = vst.msk [vmem:[#allocation2 + $0x18] sm:$0xff] %vm842_vm1, %v10505_v14  ;;  %4208 = vst.msk [vmem:[#allocation2 + $0x20] sm:$0xff] %vm842_vm1, %v10505_v14  ;;  %9547 = vmatpush3.msra.mxu0 %v8475_v16  ;;  %v1997_v24 = vld [vmem:[%s13888_s11 + $0x38] sm:$0xff]  ;;  %v4275_v25 = vld [vmem:[%s13889_s24 + $0x8] sm:$0xff]  ;;  %s11078_s11 = scalar_lea.vmem [#allocation5], %s8454_s17  ;;  %s13750_s17 = sshll.u32 %s10687_s26, 8 }
  0x2e   : > { %4209 = vst.msk [vmem:[#allocation2 + $0x28] sm:$0xff] %vm842_vm1, %v10505_v14  ;;  %4210 = vst.msk [vmem:[#allocation2 + $0x30] sm:$0xff] %vm842_vm1, %v10505_v14  ;;  %9548 = vmatprep.subr.mxu0 %v8474_v18  ;;  %v8478_v51 = vld [vmem:[%s13737_s15 + $0x30] sm:$0xff]  ;;  %v8491_v52 = vld [vmem:[%s13737_s15 + $0x68] sm:$0xff]  ;;  %s8314_s5 = sshll.u32 %s11078_s11, 4  ;;  %s13351_s5 = int_to_ptr.vmem [resolvable:$true] %s8314_s5 }
  0x2f   : > { %4211 = vst.msk [vmem:[#allocation2 + $0x38] sm:$0xff] %vm842_vm1, %v10505_v14  ;;  %4212 = vst.msk [vmem:[#allocation2 + $0x40] sm:$0xff] %vm842_vm1, %v10505_v14  ;;  %9549 = vmatpush3.msra.mxu0 %v8474_v18  ;;  %v8487_v54 = vld [vmem:[%s13737_s15 + $0x58] sm:$0xff]  ;;  %v8490_v56 = vld [vmem:[%s13737_s15 + $0x60] sm:$0xff]  ;;  %s10901_s27 = scalar_lea.vmem %s13890_s2, %s13749_s0  ;;  %s13894_s2 = sld [smem:[#allocation108_spill]] }
  0x30   : > { %2338 = vperm.xlu1 %10400, %v10703_v8   ;;  %10401 = vset.pattern.permute.xlu0 %v10503_v2  ;;  %4213 = vst.msk [vmem:[#allocation2 + $0x48] sm:$0xff] %vm842_vm1, %v10505_v14  ;;  %4214 = vst.msk [vmem:[#allocation2 + $0x50] sm:$0xff] %vm842_vm1, %v10505_v14  ;;  %v8486_v61 = vld [vmem:[%s13737_s15 + $0x50] sm:$0xff]  ;;  %v8499_v63 = vld [vmem:[%s13737_s15 + $0x88] sm:$0xff] }
  0x31   : > { %4215 = vst.msk [vmem:[#allocation2 + $0x58] sm:$0xff] %vm842_vm1, %v10505_v14  ;;  %4216 = vst.msk [vmem:[#allocation2 + $0x60] sm:$0xff] %vm842_vm1, %v10505_v14  ;;  %9560 = vmatprep.subr.mxu0 %v8483_v20  ;;  %2334 = vperm.xlu0 %10401, %v1990_v21   ;;  %v8495_v1 = vld [vmem:[%s13737_s15 + $0x78] sm:$0xff]  ;;  %v8498_v4 = vld [vmem:[%s13737_s15 + $0x80] sm:$0xff]  ;;  %s11425_s0 = scalar_lea.vmem %s13895_s1, %s13750_s17  ;;  %s8989_s1 = sshll.u32 %s10645_s4, 8 }
  0x32   : > { %4217 = vst.msk [vmem:[#allocation2 + $0x68] sm:$0xff] %vm842_vm1, %v10505_v14  ;;  %4218 = vst.msk [vmem:[#allocation2 + $0x70] sm:$0xff] %vm842_vm1, %v10505_v14  ;;  %v8494_v9 = vld [vmem:[%s13737_s15 + $0x70] sm:$0xff]  ;;  %v1825_v15 = vld [vmem:[%s13741_s19] sm:$0xff]  ;;  %s14171_s4 = sand.u32 1, %s10493_s28   ;;  %s10441_s17 = scalar_lea.vmem %s13351_s5, 256 }
  0x33   : > { %4219 = vst.msk [vmem:[#allocation2 + $0x78] sm:$0xff] %vm842_vm1, %v10505_v14  ;;  %4220 = vst.msk [vmem:[#allocation2 + $0x80] sm:$0xff] %vm842_vm1, %v10505_v14  ;;  %v1680_v16 = vld [vmem:[%s10901_s27 + $0x8] sm:$0xff]  ;;  %v1681_v18 = vld [vmem:[%s10901_s27 + $0x10] sm:$0xff]  ;;  %p10442_p11 = scmp.ne.s32.totalorder %s13351_s5, %s10441_s17 }
  0x34   : > { %2342 = vperm.xlu1 %10400, %v10709_v11   ;;  %4221 = vst.msk [vmem:[#allocation2 + $0x88] sm:$0xff] %vm842_vm1, %v10505_v14  ;;  %4222 = vst.msk [vmem:[#allocation2 + $0x90] sm:$0xff] %vm842_vm1, %v10505_v14  ;;  %v1826_v17 = vld [vmem:[%s13741_s19 + $0x8] sm:$0xff] }
  0x35   : > { %4223 = vst.msk [vmem:[#allocation2 + $0x98] sm:$0xff] %vm842_vm1, %v10505_v14  ;;  %4224 = vst.msk [vmem:[#allocation2 + $0xa0] sm:$0xff] %vm842_vm1, %v10505_v14  ;;  %2346 = vperm.xlu0 %10401, %v1993_v22   ;;  %p10443_p12 = pnand %p10442_p11, %p10662_p5 }
  0x36   : > { %4225 = vst.msk [vmem:[#allocation2 + $0xa8] sm:$0xff] %vm842_vm1, %v10505_v14  ;;  %4226 = vst.msk [vmem:[#allocation2 + $0xb0] sm:$0xff] %vm842_vm1, %v10505_v14 }
  0x37   : > { %4227 = vst.msk [vmem:[#allocation2 + $0xb8] sm:$0xff] %vm842_vm1, %v10505_v14  ;;  %4228 = vst.msk [vmem:[#allocation2 + $0xc0] sm:$0xff] %vm842_vm1, %v10505_v14  ;;  %p10444_p13 = pneg %p10443_p12 }
  0x38   : > { %2350 = vperm.xlu1 %10400, %v10716_v12   ;;  %4229 = vst.msk [vmem:[#allocation2 + $0xc8] sm:$0xff] %vm842_vm1, %v10505_v14  ;;  %4230 = vst.msk [vmem:[#allocation2 + $0xd0] sm:$0xff] %vm842_vm1, %v10505_v14 }
  0x39   : > { %4231 = vst.msk [vmem:[#allocation2 + $0xd8] sm:$0xff] %vm842_vm1, %v10505_v14  ;;  %4232 = vst.msk [vmem:[#allocation2 + $0xe0] sm:$0xff] %vm842_vm1, %v10505_v14  ;;  %2354 = vperm.xlu0 %10401, %v1995_v23  }
  0x3a   : > { %4233 = vst.msk [vmem:[#allocation2 + $0xe8] sm:$0xff] %vm842_vm1, %v10505_v14  ;;  %4234 = vst.msk [vmem:[#allocation2 + $0xf0] sm:$0xff] %vm842_vm1, %v10505_v14 }
  0x3b   : > { %4235 = vst.msk [vmem:[#allocation2 + $0xf8] sm:$0xff] %vm842_vm1, %v10505_v14  ;;  %4236 = vst.msk [vmem:[#allocation2 + $0x100] sm:$0xff] %vm842_vm1, %v10505_v14 }
  0x3c   : > { %2358 = vperm.xlu1 %10400, %v10722_v13   ;;  %4237 = vst.msk [vmem:[#allocation2 + $0x108] sm:$0xff] %vm842_vm1, %v10505_v14  ;;  %4238 = vst.msk [vmem:[#allocation2 + $0x110] sm:$0xff] %vm842_vm1, %v10505_v14 }
  0x3d   : > { %4239 = vst.msk [vmem:[#allocation2 + $0x118] sm:$0xff] %vm842_vm1, %v10505_v14  ;;  %4240 = vst.msk [vmem:[#allocation2 + $0x120] sm:$0xff] %vm842_vm1, %v10505_v14  ;;  %2362 = vperm.xlu0 %10401, %v1997_v24  }
  0x3e   : > { %4241 = vst.msk [vmem:[#allocation2 + $0x128] sm:$0xff] %vm842_vm1, %v10505_v14  ;;  %v1679_v14 = vld [vmem:[%s10901_s27] sm:$0xff] }
  0x40   : > { %10402 = vset.pattern.permute.xlu1 %v10504_v6 }
  0x41   : > { %2008 = vperm.xlu1 %10402, %v1990_v21   ;;  %10403 = vset.pattern.permute.xlu0 %v10504_v6  ;;  %v1828_v21 = vld [vmem:[%s13741_s19 + $0x18] sm:$0xff] }
  0x42   : > { %2013 = vperm.xlu0 %10403, %v10703_v8  }
  0x45   : > { %2018 = vperm.xlu1 %10402, %v10709_v11   ;;  %v1688_v11 = vld [vmem:[%s13891_s7 + $0x8] sm:$0xff] }
  0x46   : > { %2028 = vperm.xlu0 %10403, %v10716_v12  }
  0x49   : > { %2023 = vperm.xlu1 %10402, %v1993_v22   ;;  %v1683_v22 = vld [vmem:[%s10901_s27 + $0x20] sm:$0xff] }
  0x4a   : > { %2038 = vperm.xlu0 %10403, %v10722_v13   ;;  %v1687_v13 = vld [vmem:[%s13891_s7] sm:$0xff]  ;;  %s13935_s7 = sld [smem:[#allocation107_spill]] }
  0x4d   : > { %2033 = vperm.xlu1 %10402, %v1995_v23   ;;  %v1829_v23 = vld [vmem:[%s13741_s19 + $0x20] sm:$0xff] }
  0x4e   : > { %10404 = vset.pattern.permute.xlu0 %v10503_v2 }
  0x51   : > { %2043 = vperm.xlu1 %10402, %v1997_v24   ;;  %v1684_v24 = vld [vmem:[%s10901_s27 + $0x28] sm:$0xff] }
  0x55   : > { %4345 = vperm.xlu1 %10402, %v4275_v25  }
  0x59   : > { %10405 = vset.pattern.permute.xlu1 %v10503_v2 }
  0x5a   : > { %5246 = vperm.xlu1 %10405, %v4275_v25   ;;  %v1830_v25 = vld [vmem:[%s13741_s19 + $0x28] sm:$0xff] }
  0x5e   : > { %10406 = vset.pattern.permute.xlu1 %v10504_v6 }
  0xa3   : > { %v10832_v31 = vpop.permute.xlu1 %1037  ;;  %v856_v32 = vpop.permute.xlu0 %855 }
  0xa7   : > { %v10836_v37 = vpop.permute.xlu1 %1041  ;;  %v861_v47 = vpop.permute.xlu0 %860 }
  0xeb   : > { %v9531_v27 = vpop.f32.mrf.mxu0 }
  0xec   : > { %v10824_v28 = vadd.f32 %v9531_v27, %v8465_v26  ;;  %v1831_v27 = vld [vmem:[%s13741_s19 + $0x30] sm:$0xff] }
  0xed   : > { %v833_v29 = vpop.f32.mrf.mxu0 }
  0xee   : > { %848 = vst.msk [vmem:[#allocation4 + $0x10] sm:$0xff] %vm842_vm1, %v10824_v28  ;;  %v10828_v30 = vadd.f32 %v8465_v26, %v833_v29  ;;  %v1685_v26 = vld [vmem:[%s10901_s27 + $0x30] sm:$0xff]  ;;  %v1832_v29 = vld [vmem:[%s13741_s19 + $0x38] sm:$0xff] }
  0xf0   : > { %847 = vst.msk [vmem:[#allocation4 + $0x8] sm:$0xff] %vm842_vm1, %v10828_v30 }
  0xf5   : > { %v1223_v55 = vld [vmem:[#allocation4 + $0x10] sm:$0xff] }
  0xf6   : > { %v1401_v60 = vld [vmem:[#allocation4 + $0x13] sm:$0xff] }
  0xf7   : > { %v851_v33 = vld [vmem:[#allocation4 + $0x3] sm:$0xff]  ;;  %v10834_v36 = vld [vmem:[#allocation4 + $0xc] sm:$0xff]  ;;  %v1403_v0 = vmul.f32 %v1401_v60, %v861_v47  ;;  %v1579_v8 = vld [vmem:[#allocation4 + $0x15] sm:$0xff] }
  0xf8   : > { %v863_v34 = vmul.f32 %v856_v32, %v851_v33  ;;  %v867_v35 = vld [vmem:[#allocation4 + $0x4] sm:$0xff]  ;;  %v1035_v40 = vld [vmem:[#allocation4 + $0xd] sm:$0xff]  ;;  %v1581_v10 = vmul.f32 %v1579_v8, %v10836_v37 }
  0xf9   : > { %9536 = vmatprep.mubr.msk.f32.mxu1 %vm842_vm1, %v867_v35  ;;  %v1034_v39 = vld [vmem:[#allocation4 + $0x5] sm:$0xff]  ;;  %v1045_v42 = vmul.f32 %v10836_v37, %v1035_v40  ;;  %v1133_v53 = vld [vmem:[#allocation4 + $0xf] sm:$0xff]  ;;  %v1580_v5 = vmul.f32 %v10832_v31, %v1035_v40 }
  0xfa   : > { %9537 = vmatmul.mubr.msk.f32.vlgmr.msra.gmra.mxu1 %vm842_vm1, %v10834_v36  ;;  %v1044_v41 = vmul.f32 %v10832_v31, %v1034_v39  ;;  %v1400_v43 = vld [vmem:[#allocation4 + $0xb] sm:$0xff]  ;;  %v1135_v59 = vmul.f32 %v1133_v53, %v861_v47  ;;  %v1491_v12 = vld [vmem:[#allocation4 + $0x14] sm:$0xff]  ;;  %v8520_v35 = vld [vmem:[%s13731_s9 + $0x10] sm:$0xff] }
  0xfb   : > { %9540 = vmatpush3.msra.mxu1 %v866_v19  ;;  %9543 = vmatprep.mubr.msk.f32.mxu1 %vm842_vm1, %v863_v34  ;;  %v1132_v45 = vld [vmem:[#allocation4 + $0x7] sm:$0xff]  ;;  %v864_v48 = vmul.f32 %v1400_v43, %v861_v47  ;;  %v1402_v58 = vmul.f32 %v1400_v43, %v856_v32  ;;  %v1311_v3 = vld [vmem:[#allocation4 + $0x11] sm:$0xff] }
  0xfc   : > { %9541 = vmatprep.subr.mxu1 %v865_v38  ;;  %9550 = vmatprep.mubr.msk.f32.mxu0 %vm842_vm1, %v1044_v41  ;;  %v1222_v49 = vld [vmem:[#allocation4 + $0x8] sm:$0xff]  ;;  %v1134_v50 = vmul.f32 %v1132_v45, %v856_v32  ;;  %v1313_v7 = vmul.f32 %v1311_v3, %v10836_v37  ;;  %v1827_v19 = vld [vmem:[%s13741_s19 + $0x10] sm:$0xff]  ;;  %v2055_v39 = vld [vmem:[%s13731_s9 + $0x8] sm:$0xff] }
  0xfd   : > { %9542 = vmatpush3.msra.mxu1 %v865_v38  ;;  %9551 = vmatmul.mubr.msk.f32.vlgmr.msra.gmra.mxu0 %vm842_vm1, %v1045_v42  ;;  %v1310_v57 = vld [vmem:[#allocation4 + $0x9] sm:$0xff]  ;;  %v10994_v42 = vld [vmem:[%s13731_s9 + $0x28] sm:$0xff] }
  0xfe   : > { %9561 = vmatpush3.msra.mxu0 %v8483_v20  ;;  %9553 = vmatprep.subr.mxu1 %v8479_v44  ;;  %v1312_v62 = vmul.f32 %v1310_v57, %v10832_v31  ;;  %v1682_v20 = vld [vmem:[%s10901_s27 + $0x18] sm:$0xff]  ;;  %v2054_v41 = vld [vmem:[%s13731_s9] sm:$0xff]  ;;  %v4280_v57 = vld [vmem:[%s13889_s24 + $0x30] sm:$0xff] }
  0xff   : > { %9562 = vmatprep.subr.mxu0 %v8482_v46  ;;  %9564 = vmatprep.mubr.msk.f32.mxu0 %vm842_vm1, %v1222_v49  ;;  %v8521_v33 = vld [vmem:[%s13731_s9 + $0x18] sm:$0xff]  ;;  %v4278_v45 = vld [vmem:[%s13889_s24 + $0x20] sm:$0xff] }
 0x100   : > { %9544 = vmatmul.mubr.msk.f32.vlgmr.msra.gmra.mxu1 %vm842_vm1, %v864_v48  ;;  %9563 = vmatpush3.msra.mxu0 %v8482_v46  ;;  %v1998_v37 = vld [vmem:[#allocation3 + $0x7] sm:$0xff]  ;;  %v4282_v46 = vld [vmem:[%s13889_s24 + $0x40] sm:$0xff] }
 0x101   : > { %9554 = vmatpush3.msra.mxu1 %v8479_v44  ;;  %9557 = vmatprep.mubr.msk.f32.mxu1 %vm842_vm1, %v1134_v50  ;;  %v2056_v40 = vld [vmem:[#allocation3 + $0x8] sm:$0xff]  ;;  %v4274_v44 = vld [vmem:[%s13889_s24] sm:$0xff]  ;;  %v4276_v50 = vld [vmem:[%s13889_s24 + $0x10] sm:$0xff] }
 0x102   : > { %9555 = vmatprep.subr.mxu1 %v8478_v51  ;;  %9574 = vmatprep.subr.mxu0 %v8491_v52  ;;  %v11000_v43 = vld [vmem:[%s13731_s9 + $0x38] sm:$0xff]  ;;  %v11015_v47 = vld [vmem:[%s13889_s24 + $0x60] sm:$0xff] }
 0x103   : > { %9556 = vmatpush3.msra.mxu1 %v8478_v51  ;;  %9565 = vmatmul.mubr.msk.f32.vlgmr.msra.gmra.mxu0 %vm842_vm1, %v1223_v55  ;;  %v11021_v48 = vld [vmem:[%s13889_s24 + $0x80] sm:$0xff]  ;;  %v4277_v51 = vld [vmem:[%s13889_s24 + $0x18] sm:$0xff] }
 0x104   : > { %9575 = vmatpush3.msra.mxu0 %v8491_v52  ;;  %9567 = vmatprep.subr.mxu1 %v8487_v54  ;;  %v11027_v49 = vld [vmem:[%s13889_s24 + $0xa0] sm:$0xff]  ;;  %v4279_v52 = vld [vmem:[%s13889_s24 + $0x28] sm:$0xff]  ;;  %v4281_v3 = vld [vmem:[%s13889_s24 + $0x38] sm:$0xff] }
 0x105   : > { %9576 = vmatprep.subr.mxu0 %v8490_v56  ;;  %9578 = vmatprep.mubr.msk.f32.mxu0 %vm842_vm1, %v1402_v58 }
 0x106   : > { %9558 = vmatmul.mubr.msk.f32.vlgmr.msra.gmra.mxu1 %vm842_vm1, %v1135_v59  ;;  %9577 = vmatpush3.msra.mxu0 %v8490_v56 }
 0x107   : > { %9568 = vmatpush3.msra.mxu1 %v8487_v54  ;;  %9571 = vmatprep.mubr.msk.f32.mxu1 %vm842_vm1, %v1312_v62 }
 0x108   : > { %9569 = vmatprep.subr.mxu1 %v8486_v61  ;;  %9588 = vmatprep.subr.mxu0 %v8499_v63 }
 0x109   : > { %9570 = vmatpush3.msra.mxu1 %v8486_v61  ;;  %9579 = vmatmul.mubr.msk.f32.vlgmr.msra.gmra.mxu0 %vm842_vm1, %v1403_v0 }
 0x10a   : > { %9589 = vmatpush3.msra.mxu0 %v8499_v63  ;;  %9581 = vmatprep.subr.mxu1 %v8495_v1 }
 0x10b   : > { %9590 = vmatprep.subr.mxu0 %v8498_v4  ;;  %9592 = vmatprep.mubr.msk.f32.mxu0 %vm842_vm1, %v1580_v5  ;;  %v11051_v5 = vpop.permute.xlu0 %2334 }
 0x10c   : > { %9572 = vmatmul.mubr.msk.f32.vlgmr.msra.gmra.mxu1 %vm842_vm1, %v1313_v7  ;;  %9591 = vmatpush3.msra.mxu0 %v8498_v4 }
 0x10d   : > { %9582 = vmatpush3.msra.mxu1 %v8495_v1  ;;  %9585 = vmatprep.mubr.msk.f32.mxu1 %vm842_vm1, %v10834_v36 }
 0x10e   : > { %9583 = vmatprep.subr.mxu1 %v8494_v9  ;;  %9611 = vmatprep.subr.mxu0 %v10824_v28 }
 0x10f   : > { %9584 = vmatpush3.msra.mxu1 %v8494_v9  ;;  %9593 = vmatmul.mubr.msk.f32.vlgmr.msra.gmra.mxu0 %vm842_vm1, %v1581_v10 }
 0x110   : > { %9612 = vmatpush3.msra.mxu0 %v10824_v28  ;;  %9595 = vmatprep.subr.mxu1 %v1688_v11  ;;  %v1686_v28 = vld [vmem:[%s10901_s27 + $0x38] sm:$0xff]  ;;  %s13923_s27 = sshll.u32 %s10687_s26, 6 }
 0x111   : > { %9613 = vmatprep.subr.mxu0 %v10828_v30  ;;  %9586 = vmatmul.mubr.msk.f32.vlgmr.msra.gmra.mxu1 %vm842_vm1, %v1491_v12 }
 0x112   : > { %9596 = vmatpush3.msra.mxu1 %v1688_v11  ;;  %9614 = vmatpush3.msra.mxu0 %v10828_v30  ;;  %v10966_v30 = vpop.permute.xlu1 %2338 }
 0x113   : > { %9597 = vmatprep.subr.mxu1 %v1687_v13  ;;  %9599 = vmatprep.mubr.msk.f32.mxu1 %vm842_vm1, %v1679_v14  ;;  %v4283_v14 = vld [vmem:[%s13889_s24 + $0x48] sm:$0xff] }
 0x114   : > { %9598 = vmatpush3.msra.mxu1 %v1687_v13  ;;  %9615 = vmatprep.mubr.msk.f32.mxu0 %vm842_vm1, %v1825_v15 }
 0x115   : > { %9600 = vmatmul.mubr.msk.f32.vlgmr.msra.gmra.mxu1 %vm842_vm1, %v1680_v16  ;;  %9616 = vmatmul.mubr.msk.f32.vlgmr.msra.gmra.mxu0 %vm842_vm1, %v1826_v17  ;;  %v11056_v16 = vpop.permute.xlu0 %2346 }
 0x116   : > { %9602 = vmatprep.mubr.msk.f32.mxu1 %vm842_vm1, %v1681_v18  ;;  %9618 = vmatprep.mubr.msk.f32.mxu0 %vm842_vm1, %v1827_v19  ;;  %v10968_v31 = vpop.permute.xlu1 %2342 }
 0x117   : > { %9627 = vmatprep.subr.mxu1 %v8521_v33  ;;  %9643 = vmatprep.subr.mxu0 %v2055_v39 }
 0x118   : > { %9628 = vmatpush3.msra.mxu1 %v8521_v33  ;;  %9644 = vmatpush3.msra.mxu0 %v2055_v39  ;;  %v4284_v39 = vld [vmem:[%s13889_s24 + $0x50] sm:$0xff] }
 0x119   : > { %9603 = vmatmul.mubr.msk.f32.gmra.mxu1 %vm842_vm1, %v1682_v20  ;;  %9619 = vmatmul.mubr.msk.f32.gmra.mxu0 %vm842_vm1, %v1828_v21 }
 0x11a   : > { %9605 = vmatprep.mubr.msk.f32.mxu1 %vm842_vm1, %v1683_v22  ;;  %9621 = vmatprep.mubr.msk.f32.mxu0 %vm842_vm1, %v1829_v23  ;;  %v10970_v32 = vpop.permute.xlu1 %2350 }
 0x11b   : > { %9629 = vmatprep.subr.mxu1 %v8520_v35  ;;  %9645 = vmatprep.subr.mxu0 %v2054_v41 }
 0x11c   : > { %9630 = vmatpush3.msra.mxu1 %v8520_v35  ;;  %9646 = vmatpush3.msra.mxu0 %v2054_v41 }
 0x11d   : > { %9606 = vmatmul.mubr.msk.f32.gmra.mxu1 %vm842_vm1, %v1684_v24  ;;  %9622 = vmatmul.mubr.msk.f32.gmra.mxu0 %vm842_vm1, %v1830_v25  ;;  %v11062_v25 = vpop.permute.xlu0 %2354 }
 0x11e   : > { %9608 = vmatprep.mubr.msk.f32.mxu1 %vm842_vm1, %v1685_v26  ;;  %9624 = vmatprep.mubr.msk.f32.mxu0 %vm842_vm1, %v1831_v27  ;;  %v10975_v34 = vpop.permute.xlu1 %2358  ;;  %v8502_v26 = vld [vmem:[%s13738_s16] ss:$0 sm:$0xff] }
 0x11f   : > { %9659 = vmatprep.subr.mxu1 %v10994_v42  ;;  %9675 = vmatprep.subr.mxu0 %v11000_v43 }
 0x120   : > { %5242 = vperm.xlu0 %10404, %v4274_v44   ;;  %4350 = vperm.xlu1 %10406, %v4276_v50  }
 0x121   : > { %9609 = vmatmul.mubr.msk.f32.gmra.mxu1 %vm842_vm1, %v1686_v28  ;;  %9625 = vmatmul.mubr.msk.f32.gmra.mxu0 %vm842_vm1, %v1832_v29  ;;  %v11071_v29 = vld [vmem:[%s13892_s8] ss:$0 sm:$0xff] }
 0x122   : > { %v10980_v36 = vpop.permute.xlu1 %2008  ;;  %9631 = vmatprep.mubr.msk.f32.mxu1 %vm842_vm1, %v2056_v40 }
 0x123   : > { %v2046_v38 = vmul.f32 %v10980_v36, %v1998_v37 }
 0x124   : > { %5258 = vperm.xlu0 %10404, %v4278_v45   ;;  %10407 = vset.pattern.permute.xlu1 %v10503_v2 }
 0x125   : > { %9647 = vmatprep.mubr.msk.f32.mxu0 %vm842_vm1, %v2046_v38  ;;  %5250 = vperm.xlu1 %10407, %v4276_v50  }
 0x128   : > { %5274 = vperm.xlu0 %10404, %v4282_v46  }
 0x129   : > { %5254 = vperm.xlu1 %10407, %v4277_v51  }
 0x12c   : > { %5290 = vperm.xlu0 %10404, %v11015_v47  }
 0x12d   : > { %10408 = vset.pattern.permute.xlu1 %v10504_v6 }
 0x12e   : > { %4365 = vperm.xlu1 %10408, %v4279_v52  }
 0x130   : > { %5306 = vperm.xlu0 %10404, %v11021_v48  }
 0x132   : > { %10409 = vset.pattern.permute.xlu1 %v10503_v2 }
 0x133   : > { %5262 = vperm.xlu1 %10409, %v4279_v52  }
 0x134   : > { %5322 = vperm.xlu0 %10404, %v11027_v49  }
 0x137   : > { %10410 = vset.pattern.permute.xlu1 %v10504_v6 }
 0x138   : > { %10425 = vset.pattern.permute.xlu0 %v10504_v6  ;;  %4370 = vperm.xlu1 %10410, %v4280_v57  }
 0x139   : > { %4340 = vperm.xlu0 %10425, %v4274_v44  }
 0x13c   : > { %10411 = vset.pattern.permute.xlu1 %v10503_v2 }
 0x13d   : > { %4355 = vperm.xlu0 %10425, %v4277_v51   ;;  %5266 = vperm.xlu1 %10411, %v4280_v57  }
 0x141   : > { %4360 = vperm.xlu0 %10425, %v4278_v45   ;;  %5270 = vperm.xlu1 %10411, %v4281_v3  }
 0x145   : > { %4375 = vperm.xlu0 %10425, %v4281_v3   ;;  %10412 = vset.pattern.permute.xlu1 %v10504_v6 }
 0x146   : > { %4385 = vperm.xlu1 %10412, %v4283_v14  }
 0x149   : > { %4380 = vperm.xlu0 %10425, %v4282_v46  }
 0x14a   : > { %10413 = vset.pattern.permute.xlu1 %v10503_v2 }
 0x14b   : > { %5278 = vperm.xlu1 %10413, %v4283_v14  }
 0x14f   : > { %10414 = vset.pattern.permute.xlu1 %v10504_v6 }
 0x150   : > { %4390 = vperm.xlu1 %10414, %v4284_v39  }
 0x154   : > { %10415 = vset.pattern.permute.xlu1 %v10503_v2 }
 0x155   : > { %5282 = vperm.xlu1 %10415, %v4284_v39  }
 0x1ba   : > { %v9538_v53 = vpop.f32.mrf.mxu1 }
 0x1bc   : > { %v944_v54 = vpop.f32.mrf.mxu1 }
 0x1bd   : > { %v9552_v55 = vpop.f32.mrf.mxu0 }
 0x1bf   : > { %v1121_v56 = vpop.f32.mrf.mxu0 }
 0x1c0   : > { %v9545_v58 = vpop.f32.mrf.mxu1 }
 0x1c1   : > { %v1031_v59 = vadd.f32 %v9545_v58, %v9538_v53  ;;  %v11085_v53 = vpop.permute.xlu0 %2362 }
 0x1c2   : > { %v1025_v60 = vpop.f32.mrf.mxu1 }
 0x1c3   : > { %v1026_v61 = vadd.f32 %v1025_v60, %v944_v54  ;;  %v9566_v62 = vpop.f32.mrf.mxu0  ;;  %v1131_v63 = vadd.f32 %v9552_v55, %v1031_v59 }
 0x1c5   : > { %v1299_v0 = vpop.f32.mrf.mxu0  ;;  %v1130_v1 = vadd.f32 %v1121_v56, %v1026_v61 }
 0x1c6   : > { %v9559_v4 = vpop.f32.mrf.mxu1 }
 0x1c7   : > { %v1221_v7 = vadd.f32 %v9559_v4, %v1131_v63  ;;  %v11108_v4 = vpop.permute.xlu1 %2018 }
 0x1c8   : > { %v1211_v8 = vpop.f32.mrf.mxu1 }
 0x1c9   : > { %v1220_v9 = vadd.f32 %v1211_v8, %v1130_v1  ;;  %v9580_v10 = vpop.f32.mrf.mxu0  ;;  %v1309_v11 = vadd.f32 %v9566_v62, %v1221_v7  ;;  %v11110_v7 = vpop.permute.xlu0 %2013 }
 0x1cb   : > { %v1479_v12 = vpop.f32.mrf.mxu0  ;;  %v1308_v13 = vadd.f32 %v1299_v0, %v1220_v9  ;;  %v4285_v0 = vld [vmem:[%s13889_s24 + $0x58] sm:$0xff] }
 0x1cc   : > { %v9573_v15 = vpop.f32.mrf.mxu1  ;;  %4395 = vperm.xlu0 %10425, %v4285_v0   ;;  %5286 = vperm.xlu1 %10415, %v4285_v0  }
 0x1cd   : > { %v1399_v17 = vadd.f32 %v9573_v15, %v1309_v11 }
 0x1ce   : > { %v1389_v18 = vpop.f32.mrf.mxu1 }
 0x1cf   : > { %v1398_v19 = vadd.f32 %v1389_v18, %v1308_v13  ;;  %v9594_v20 = vpop.f32.mrf.mxu0  ;;  %v1489_v21 = vadd.f32 %v9580_v10, %v1399_v17  ;;  %v8538_v17 = vld [vmem:[%s13731_s9 + $0x20] sm:$0xff] }
 0x1d0   : > { %4400 = vperm.xlu0 %10425, %v11015_v47   ;;  %10416 = vset.pattern.permute.xlu1 %v10504_v6 }
 0x1d1   : > { %v9587_v22 = vpop.f32.mrf.mxu1  ;;  %v1488_v23 = vadd.f32 %v1479_v12, %v1398_v19  ;;  %v1657_v27 = vpop.f32.mrf.mxu0 }
 0x1d2   : > { %v1577_v24 = vadd.f32 %v9587_v22, %v1489_v21 }
 0x1d3   : > { %v1567_v28 = vpop.f32.mrf.mxu1 }
 0x1d4   : > { %v1667_v33 = vadd.f32 %v9594_v20, %v1577_v24  ;;  %v1576_v35 = vadd.f32 %v1567_v28, %v1488_v23  ;;  %v11140_v24 = vpop.permute.xlu1 %2023 }
 0x1d5   : > { %v9601_v37 = vpop.f32.mrf.mxu1  ;;  %v9617_v38 = vpop.f32.mrf.mxu0 }
 0x1d6   : > { %v1676_v40 = vadd.f32 %v8502_v26, %v1667_v33  ;;  %v1666_v41 = vadd.f32 %v1657_v27, %v1576_v35  ;;  %v1792_v44 = vadd.f32 %v9601_v37, %v11071_v29  ;;  %v8559_v35 = vld [vmem:[%s13731_s9 + $0x48] sm:$0xff] }
 0x1d7   : > { %v1786_v45 = vpop.f32.mrf.mxu1  ;;  %v1923_v46 = vpop.f32.mrf.mxu0 }
 0x1d8   : > { %1678 = vst.msk [vmem:[%s11078_s11 + $0x8] sm:$0xff] %vm842_vm1, %v1676_v40  ;;  %v1675_v50 = vadd.f32 %v8502_v26, %v1666_v41  ;;  %v11082_v51 = vadd.f32 %v9617_v38, %v1792_v44  ;;  %v1787_v52 = vadd.f32 %v11071_v29, %v1786_v45  ;;  %v11144_v26 = vpop.permute.xlu0 %2028  ;;  %v8548_v40 = vld [vmem:[%s13731_s9 + $0x30] sm:$0xff]  ;;  %v11182_v45 = vpop.permute.xlu1 %2033 }
 0x1d9   : > { %v9604_v54 = vpop.f32.mrf.mxu1  ;;  %v9620_v55 = vpop.f32.mrf.mxu0 }
 0x1da   : > { %1677 = vst.msk [vmem:[%s11078_s11] sm:$0xff] %vm842_vm1, %v1675_v50  ;;  %1983 = vst.msk [vmem:[#allocation3 + $0x18] sm:$0xff] %vm842_vm1, %v11082_v51  ;;  %v11091_v56 = vadd.f32 %v1923_v46, %v1787_v52  ;;  %v1802_v57 = vadd.f32 %v9604_v54, %v11071_v29  ;;  %v8569_v50 = vld [vmem:[%s13731_s9 + $0x58] sm:$0xff] }
 0x1db   : > { %v1796_v58 = vpop.f32.mrf.mxu1  ;;  %v1933_v59 = vpop.f32.mrf.mxu0 }
 0x1dc   : > { %1982 = vst.msk [vmem:[#allocation3 + $0x10] sm:$0xff] %vm842_vm1, %v11091_v56  ;;  %v11096_v60 = vadd.f32 %v9620_v55, %v1802_v57  ;;  %v1797_v61 = vadd.f32 %v11071_v29, %v1796_v58  ;;  %v11186_v46 = vpop.permute.xlu0 %2038 }
 0x1dd   : > { %v9607_v62 = vpop.f32.mrf.mxu1  ;;  %v9623_v63 = vpop.f32.mrf.mxu0 }
 0x1de   : > { %1985 = vst.msk [vmem:[#allocation3 + $0x28] sm:$0xff] %vm842_vm1, %v11096_v60  ;;  %v11105_v1 = vadd.f32 %v1933_v59, %v1797_v61  ;;  %v1812_v3 = vadd.f32 %v9607_v62, %v11071_v29  ;;  %v4287_v61 = vld [vmem:[%s13889_s24 + $0x68] sm:$0xff] }
 0x1df   : > { %v1806_v8 = vpop.f32.mrf.mxu1  ;;  %v1943_v9 = vpop.f32.mrf.mxu0  ;;  %4405 = vperm.xlu1 %10416, %v4287_v61  }
 0x1e0   : > { %1984 = vst.msk [vmem:[#allocation3 + $0x20] sm:$0xff] %vm842_vm1, %v11105_v1  ;;  %v11114_v10 = vadd.f32 %v9623_v63, %v1812_v3  ;;  %v1807_v11 = vadd.f32 %v11071_v29, %v1806_v8  ;;  %v11215_v63 = vpop.permute.xlu1 %2043 }
 0x1e1   : > { %v9610_v12 = vpop.f32.mrf.mxu1  ;;  %v9626_v15 = vpop.f32.mrf.mxu0  ;;  %v11142_v47 = vld [vmem:[#allocation3 + $0x18] sm:$0xff] }
 0x1e2   : > { %1987 = vst.msk [vmem:[#allocation3 + $0x38] sm:$0xff] %vm842_vm1, %v11114_v10  ;;  %v11119_v13 = vadd.f32 %v1943_v9, %v1807_v11  ;;  %v1822_v14 = vadd.f32 %v9610_v12, %v11071_v29 }
 0x1e3   : > { %v11126_v18 = vld [vmem:[#allocation3 + $0xf] sm:$0xff]  ;;  %v11128_v19 = vld [vmem:[#allocation3 + $0x17] sm:$0xff]  ;;  %v1816_v20 = vpop.f32.mrf.mxu1  ;;  %v1953_v33 = vpop.f32.mrf.mxu0  ;;  %10417 = vset.pattern.permute.xlu1 %v10503_v2 }
 0x1e4   : > { %v11130_v21 = vld [vmem:[#allocation3 + $0x10] sm:$0xff]  ;;  %1986 = vst.msk [vmem:[#allocation3 + $0x30] sm:$0xff] %vm842_vm1, %v11119_v13  ;;  %v2048_v22 = vmul.f32 %v11128_v19, %v11108_v4  ;;  %v11136_v23 = vadd.f32 %v9626_v15, %v1822_v14  ;;  %v2047_v27 = vmul.f32 %v11126_v18, %v11110_v7  ;;  %v1817_v28 = vadd.f32 %v11071_v29, %v1816_v20 }
 0x1e5   : > { %9632 = vmatmul.mubr.msk.f32.vlgmr.msra.gmra.mxu1 %vm842_vm1, %v11130_v21  ;;  %v11179_v44 = vld [vmem:[#allocation3 + $0x28] sm:$0xff]  ;;  %v2326_v8 = vld [vmem:[#allocation3 + $0x11] sm:$0xff]  ;;  %v2521_v12 = vmul.f32 %v11126_v18, %v10980_v36  ;;  %v2522_v18 = vmul.f32 %v11128_v19, %v11110_v7  ;;  %5294 = vperm.xlu1 %10417, %v4287_v61  }
 0x1e6   : > { %9660 = vmatpush3.msra.mxu1 %v10994_v42  ;;  %9634 = vmatprep.mubr.msk.f32.mxu1 %vm842_vm1, %v11142_v47  ;;  %1989 = vst.msk [vmem:[#allocation3 + $0x48] sm:$0xff] %vm842_vm1, %v11136_v23  ;;  %v11162_v29 = vadd.f32 %v1953_v33, %v1817_v28  ;;  %v2325_v59 = vld [vmem:[#allocation3 + $0x9] sm:$0xff]  ;;  %v2366_v14 = vmul.f32 %v10966_v30, %v2326_v8  ;;  %v8579_v33 = vld [vmem:[%s13731_s9 + $0x68] sm:$0xff] }
 0x1e7   : > { %9661 = vmatprep.subr.mxu1 %v8538_v17  ;;  %v11158_v37 = vld [vmem:[#allocation3 + $0x1f] sm:$0xff]  ;;  %v11160_v38 = vld [vmem:[#allocation3 + $0x27] sm:$0xff]  ;;  %9648 = vmatmul.mubr.msk.f32.vlgmr.msra.gmra.mxu0 %vm842_vm1, %v2047_v27  ;;  %v2365_v3 = vmul.f32 %v11051_v5, %v2325_v59  ;;  %v8558_v20 = vld [vmem:[%s13731_s9 + $0x40] sm:$0xff] }
 0x1e8   : > { %v11165_v42 = vld [vmem:[#allocation3 + $0x20] sm:$0xff]  ;;  %9662 = vmatpush3.msra.mxu1 %v8538_v17  ;;  %v2049_v39 = vmul.f32 %v11158_v37, %v11140_v24  ;;  %9650 = vmatprep.mubr.msk.f32.mxu0 %vm842_vm1, %v2048_v22  ;;  %1988 = vst.msk [vmem:[#allocation3 + $0x40] sm:$0xff] %vm842_vm1, %v11162_v29  ;;  %v2050_v41 = vmul.f32 %v11160_v38, %v11144_v26  ;;  %v8589_v59 = vld [vmem:[%s13731_s9 + $0x78] sm:$0xff] }
 0x1e9   : > { %9635 = vmatmul.mubr.msk.f32.gmra.mxu1 %vm842_vm1, %v11165_v42  ;;  %9676 = vmatpush3.msra.mxu0 %v11000_v43  ;;  %v11205_v58 = vld [vmem:[#allocation3 + $0x38] sm:$0xff]  ;;  %v11235_v17 = vld [vmem:[#allocation3 + $0x21] sm:$0xff]  ;;  %v2523_v27 = vmul.f32 %v11158_v37, %v11108_v4 }
 0x1ea   : > { %9637 = vmatprep.mubr.msk.f32.mxu1 %vm842_vm1, %v11179_v44  ;;  %9691 = vmatprep.subr.mxu1 %v8559_v35  ;;  %v11225_v11 = vld [vmem:[#allocation3 + $0x19] sm:$0xff]  ;;  %v2368_v28 = vmul.f32 %v11056_v16, %v11235_v17 }
 0x1eb   : > { %v11191_v52 = vld [vmem:[#allocation3 + $0x2f] sm:$0xff]  ;;  %v11193_v54 = vld [vmem:[#allocation3 + $0x37] sm:$0xff]  ;;  %9651 = vmatmul.mubr.msk.f32.gmra.mxu0 %vm842_vm1, %v2049_v39  ;;  %9677 = vmatprep.subr.mxu0 %v8548_v40  ;;  %v2367_v15 = vmul.f32 %v10968_v31, %v11225_v11 }
 0x1ec   : > { %v11196_v55 = vld [vmem:[#allocation3 + $0x30] sm:$0xff]  ;;  %v2051_v43 = vmul.f32 %v11191_v52, %v11182_v45  ;;  %9653 = vmatprep.mubr.msk.f32.mxu0 %vm842_vm1, %v2050_v41  ;;  %v2052_v57 = vmul.f32 %v11193_v54, %v11186_v46  ;;  %9678 = vmatpush3.msra.mxu0 %v8548_v40  ;;  %v2524_v41 = vmul.f32 %v11160_v38, %v11140_v24 }
 0x1ed   : > { %9638 = vmatmul.mubr.msk.f32.gmra.mxu1 %vm842_vm1, %v11196_v55  ;;  %9707 = vmatprep.subr.mxu0 %v8569_v50  ;;  %v11244_v22 = vld [vmem:[#allocation3 + $0x29] sm:$0xff]  ;;  %v11258_v40 = vld [vmem:[#allocation3 + $0x31] sm:$0xff] }
 0x1ee   : > { %9640 = vmatprep.mubr.msk.f32.mxu1 %vm842_vm1, %v11205_v58  ;;  %v2369_v39 = vmul.f32 %v10970_v32, %v11244_v22  ;;  %v2370_v61 = vmul.f32 %v11062_v25, %v11258_v40  ;;  %10418 = vset.pattern.permute.xlu1 %v10504_v6 }
 0x1ef   : > { %9654 = vmatmul.mubr.msk.f32.gmra.mxu0 %vm842_vm1, %v2051_v43  ;;  %v11213_v62 = vld [vmem:[#allocation3 + $0x3f] sm:$0xff] }
 0x1f0   : > { %9656 = vmatprep.mubr.msk.f32.mxu0 %vm842_vm1, %v2052_v57  ;;  %v11218_v0 = vld [vmem:[#allocation3 + $0x40] sm:$0xff]  ;;  %v2053_v9 = vmul.f32 %v11213_v62, %v11215_v63  ;;  %v2525_v57 = vmul.f32 %v11191_v52, %v11144_v26 }
 0x1f1   : > { %9641 = vmatmul.mubr.msk.f32.gmra.mxu1 %vm842_vm1, %v11218_v0  ;;  %v11266_v43 = vld [vmem:[#allocation3 + $0x39] sm:$0xff] }
 0x1f2   : > { %9663 = vmatprep.mubr.msk.f32.mxu1 %vm842_vm1, %v2365_v3  ;;  %v11280_v3 = vld [vmem:[#allocation3 + $0x41] sm:$0xff] }
 0x1f3   : > { %9657 = vmatmul.mubr.msk.f32.gmra.mxu0 %vm842_vm1, %v2053_v9  ;;  %v4288_v9 = vld [vmem:[%s13889_s24 + $0x70] sm:$0xff] }
 0x1f4   : > { %9679 = vmatprep.mubr.msk.f32.mxu0 %vm842_vm1, %v2521_v12  ;;  %v2526_v12 = vmul.f32 %v11193_v54, %v11182_v45  ;;  %4410 = vperm.xlu1 %10418, %v4288_v9  }
 0x1f5   : > { %9664 = vmatmul.mubr.msk.f32.vlgmr.msra.gmra.mxu1 %vm842_vm1, %v2366_v14  ;;  %v2527_v14 = vmul.f32 %v11213_v62, %v11186_v46 }
 0x1f6   : > { %9692 = vmatpush3.msra.mxu1 %v8559_v35  ;;  %9666 = vmatprep.mubr.msk.f32.mxu1 %vm842_vm1, %v2367_v15  ;;  %v8568_v35 = vld [vmem:[%s13731_s9 + $0x50] sm:$0xff] }
 0x1f7   : > { %9680 = vmatmul.mubr.msk.f32.vlgmr.msra.gmra.mxu0 %vm842_vm1, %v2522_v18  ;;  %9693 = vmatprep.subr.mxu1 %v8558_v20  ;;  %v11290_v15 = vld [vmem:[#allocation3 + $0x47] sm:$0xff] }
 0x1f8   : > { %9682 = vmatprep.mubr.msk.f32.mxu0 %vm842_vm1, %v2523_v27  ;;  %9694 = vmatpush3.msra.mxu1 %v8558_v20  ;;  %v2372_v20 = vmul.f32 %v11085_v53, %v11280_v3  ;;  %v4289_v18 = vld [vmem:[%s13889_s24 + $0x78] sm:$0xff]  ;;  %v2528_v27 = vmul.f32 %v11290_v15, %v11215_v63 }
 0x1f9   : > { %9667 = vmatmul.mubr.msk.f32.gmra.mxu1 %vm842_vm1, %v2368_v28  ;;  %9708 = vmatpush3.msra.mxu0 %v8569_v50  ;;  %v2371_v50 = vmul.f32 %v10975_v34, %v11266_v43  ;;  %v2825_v28 = vmul.f32 %v11051_v5, %v2326_v8  ;;  %v8599_v8 = vld [vmem:[%s13731_s9 + $0x88] sm:$0xff] }
 0x1fa   : > { %9669 = vmatprep.mubr.msk.f32.mxu1 %vm842_vm1, %v2369_v39  ;;  %9723 = vmatprep.subr.mxu1 %v8579_v33  ;;  %v8578_v39 = vld [vmem:[%s13731_s9 + $0x60] sm:$0xff] }
 0x1fb   : > { %9683 = vmatmul.mubr.msk.f32.gmra.mxu0 %vm842_vm1, %v2524_v41  ;;  %9709 = vmatprep.subr.mxu0 %v8568_v35  ;;  %v2829_v41 = vmul.f32 %v10970_v32, %v11258_v40 }
 0x1fc   : > { %9685 = vmatprep.mubr.msk.f32.mxu0 %vm842_vm1, %v2525_v57  ;;  %9710 = vmatpush3.msra.mxu0 %v8568_v35  ;;  %v2826_v35 = vmul.f32 %v10966_v30, %v11225_v11  ;;  %v11343_v57 = vld [vmem:[%s13893_s29] sm:$0xff]  ;;  %s13348_s29 = scalar_lea.hbm %s13744_s22, %s8989_s1 }
 0x1fd   : > { %9670 = vmatmul.mubr.msk.f32.gmra.mxu1 %vm842_vm1, %v2370_v61  ;;  %9739 = vmatprep.subr.mxu0 %v8589_v59  ;;  %v2831_v61 = vmul.f32 %v10975_v34, %v11280_v3 }
 0x1fe   : > { %9672 = vmatprep.mubr.msk.f32.mxu1 %vm842_vm1, %v2371_v50  ;;  %4415 = vperm.xlu0 %10425, %v4289_v18   ;;  %v11354_v50 = vld [vmem:[#allocation3 + $0x49] sm:$0xff] }
 0x1ff   : > { %9686 = vmatmul.mubr.msk.f32.gmra.mxu0 %vm842_vm1, %v2526_v12  ;;  %10419 = vset.pattern.permute.xlu1 %v10503_v2  ;;  %v2981_v12 = vmul.f32 %v11128_v19, %v10980_v36  ;;  %v2983_v36 = vmul.f32 %v11160_v38, %v11108_v4  ;;  %v8598_v19 = vld [vmem:[%s13731_s9 + $0x80] sm:$0xff]  ;;  %v2985_v4 = vmul.f32 %v11193_v54, %v11144_v26  ;;  %v3458_v54 = vld [vmem:[%s11425_s0 + $0x10] sm:$0xff] }
 0x200   : > { %9688 = vmatprep.mubr.msk.f32.mxu0 %vm842_vm1, %v2527_v14  ;;  %5298 = vperm.xlu1 %10419, %v4288_v9   ;;  %v11359_v9 = vld [vmem:[%s13889_s24 + $0x98] sm:$0xff] }
 0x201   : > { %9673 = vmatmul.mubr.msk.f32.gmra.mxu1 %vm842_vm1, %v2372_v20  ;;  %v2676_v14 = vld [vmem:[#allocation3 + $0x48] sm:$0xff]  ;;  %v4291_v20 = vld [vmem:[%s13889_s24 + $0x88] sm:$0xff] }
 0x202   : > { %9695 = vmatprep.mubr.msk.f32.mxu1 %vm842_vm1, %v11130_v21  ;;  %4420 = vperm.xlu0 %10425, %v11021_v48   ;;  %v2827_v21 = vmul.f32 %v10968_v31, %v11235_v17  ;;  %v8588_v48 = vld [vmem:[%s13731_s9 + $0x70] sm:$0xff]  ;;  %v2980_v26 = vld [vmem:[#allocation3 + $0x4f] sm:$0xff] }
 0x203   : > { %9689 = vmatmul.mubr.msk.f32.gmra.mxu0 %vm842_vm1, %v2528_v27  ;;  %v2982_v27 = vmul.f32 %v11158_v37, %v11110_v7  ;;  %v2984_v7 = vmul.f32 %v11191_v52, %v11140_v24  ;;  %v2986_v24 = vmul.f32 %v11213_v62, %v11182_v45  ;;  %v4292_v37 = vld [vmem:[%s13889_s24 + $0x90] sm:$0xff]  ;;  %v2988_v38 = vmul.f32 %v2980_v26, %v11215_v63  ;;  %v3456_v45 = vld [vmem:[%s11425_s0] sm:$0xff] }
 0x204   : > { %9711 = vmatprep.mubr.msk.f32.mxu0 %vm842_vm1, %v2825_v28  ;;  %5302 = vperm.xlu1 %10419, %v4289_v18   ;;  %v2832_v18 = vmul.f32 %v11354_v50, %v11085_v53  ;;  %v3287_v52 = vmul.f32 %v10968_v31, %v11244_v22  ;;  %v3288_v31 = vmul.f32 %v11056_v16, %v11258_v40  ;;  %v3460_v62 = vld [vmem:[%s11425_s0 + $0x20] sm:$0xff]  ;;  %v11485_v40 = vld [vmem:[%s13889_s24 + $0xa8] sm:$0xff]  ;;  %v3466_v28 = vld [vmem:[%s11425_s0 + $0x50] sm:$0xff] }
 0x205   : > { %9696 = vmatmul.mubr.msk.f32.vlgmr.msra.gmra.mxu1 %vm842_vm1, %v11142_v47  ;;  %v3284_v63 = vld [vmem:[#allocation3 + $0x51] sm:$0xff]  ;;  %v3824_v26 = vld [vmem:[%s13740_s18 + $0x30] sm:$0xff] }
 0x206   : > { %9724 = vmatpush3.msra.mxu1 %v8579_v33  ;;  %9698 = vmatprep.mubr.msk.f32.mxu1 %vm842_vm1, %v11165_v42  ;;  %v2828_v33 = vmul.f32 %v11056_v16, %v11244_v22  ;;  %v11463_v16 = vld [vmem:[%s13889_s24 + $0xb8] sm:$0xff]  ;;  %v3476_v22 = vld [vmem:[%s11425_s0 + $0xa0] sm:$0xff] }
 0x207   : > { %9712 = vmatmul.mubr.msk.f32.vlgmr.msra.gmra.mxu0 %vm842_vm1, %v2826_v35  ;;  %9725 = vmatprep.subr.mxu1 %v8578_v39  ;;  %v3480_v35 = vld [vmem:[%s11425_s0 + $0xc0] sm:$0xff] }
 0x208   : > { %9714 = vmatprep.mubr.msk.f32.mxu0 %vm842_vm1, %v2827_v21  ;;  %9726 = vmatpush3.msra.mxu1 %v8578_v39  ;;  %v3479_v39 = vld [vmem:[%s11425_s0 + $0xb8] sm:$0xff] }
 0x209   : > { %9699 = vmatmul.mubr.msk.f32.gmra.mxu1 %vm842_vm1, %v11179_v44  ;;  %9740 = vmatpush3.msra.mxu0 %v8589_v59  ;;  %v2830_v59 = vmul.f32 %v11062_v25, %v11266_v43  ;;  %v3467_v21 = vld [vmem:[%s11425_s0 + $0x58] sm:$0xff] }
 0x20a   : > { %9701 = vmatprep.mubr.msk.f32.mxu1 %vm842_vm1, %v11196_v55  ;;  %9755 = vmatprep.subr.mxu1 %v8599_v8 }
 0x20b   : > { %9715 = vmatmul.mubr.msk.f32.gmra.mxu0 %vm842_vm1, %v2828_v33  ;;  %9741 = vmatprep.subr.mxu0 %v8588_v48  ;;  %v3483_v33 = vld [vmem:[%s11425_s0 + $0xd8] sm:$0xff] }
 0x20c   : > { %9717 = vmatprep.mubr.msk.f32.mxu0 %vm842_vm1, %v2829_v41  ;;  %9742 = vmatpush3.msra.mxu0 %v8588_v48  ;;  %v3482_v48 = vld [vmem:[%s11425_s0 + $0xd0] sm:$0xff]  ;;  %v3484_v41 = vld [vmem:[%s11425_s0 + $0xe0] sm:$0xff] }
 0x20d   : > { %9702 = vmatmul.mubr.msk.f32.gmra.mxu1 %vm842_vm1, %v11205_v58  ;;  %9771 = vmatprep.subr.mxu0 %v11343_v57 }
 0x20e   : > { %9704 = vmatprep.mubr.msk.f32.mxu1 %vm842_vm1, %v11218_v0  ;;  %4435 = vperm.xlu0 %10425, %v11359_v9  }
 0x20f   : > { %9718 = vmatmul.mubr.msk.f32.gmra.mxu0 %vm842_vm1, %v2830_v59  ;;  %10420 = vset.pattern.permute.xlu1 %v10504_v6  ;;  %v4531_v59 = vld [vmem:[%s13894_s2 + $0x8] sm:$0xff] }
 0x210   : > { %9720 = vmatprep.mubr.msk.f32.mxu0 %vm842_vm1, %v2831_v61  ;;  %4425 = vperm.xlu1 %10420, %v4291_v20   ;;  %v3473_v61 = vld [vmem:[%s11425_s0 + $0x88] sm:$0xff] }
 0x211   : > { %9705 = vmatmul.mubr.msk.f32.gmra.mxu1 %vm842_vm1, %v2676_v14 }
 0x212   : > { %9727 = vmatprep.mubr.msk.f32.mxu1 %vm842_vm1, %v2981_v12  ;;  %4440 = vperm.xlu0 %10425, %v11027_v49   ;;  %v8675_v49 = vld [vmem:[%s13894_s2 + $0x18] sm:$0xff] }
 0x213   : > { %9721 = vmatmul.mubr.msk.f32.gmra.mxu0 %vm842_vm1, %v2832_v18  ;;  %v3475_v12 = vld [vmem:[%s11425_s0 + $0x98] sm:$0xff]  ;;  %v3819_v18 = vld [vmem:[%s13740_s18 + $0x8] sm:$0xff] }
 0x214   : > { %9743 = vmatprep.mubr.msk.f32.mxu0 %vm842_vm1, %v11142_v47  ;;  %10421 = vset.pattern.permute.xlu1 %v10503_v2  ;;  %v2987_v47 = vmul.f32 %v11290_v15, %v11186_v46  ;;  %v3286_v46 = vmul.f32 %v10966_v30, %v11235_v17  ;;  %v8674_v30 = vld [vmem:[%s13894_s2 + $0x10] sm:$0xff]  ;;  %v3465_v15 = vld [vmem:[%s11425_s0 + $0x48] sm:$0xff] }
 0x215   : > { %9728 = vmatmul.mubr.msk.f32.vlgmr.msra.gmra.mxu1 %vm842_vm1, %v2982_v27  ;;  %5310 = vperm.xlu1 %10421, %v4291_v20   ;;  %v3462_v17 = vld [vmem:[%s11425_s0 + $0x30] sm:$0xff]  ;;  %v11573_v27 = vld [vmem:[%s13889_s24 + $0xd8] sm:$0xff] }
 0x216   : > { %9756 = vmatpush3.msra.mxu1 %v8599_v8  ;;  %9730 = vmatprep.mubr.msk.f32.mxu1 %vm842_vm1, %v2983_v36  ;;  %v3481_v8 = vld [vmem:[%s11425_s0 + $0xc8] sm:$0xff]  ;;  %v4296_v20 = vld [vmem:[%s13889_s24 + $0xb0] sm:$0xff] }
 0x217   : > { %9744 = vmatmul.mubr.msk.f32.vlgmr.msra.gmra.mxu0 %vm842_vm1, %v11165_v42  ;;  %9757 = vmatprep.subr.mxu1 %v8598_v19  ;;  %v3285_v42 = vmul.f32 %v11051_v5, %v11225_v11  ;;  %v3457_v5 = vld [vmem:[%s11425_s0 + $0x8] sm:$0xff]  ;;  %v3820_v36 = vld [vmem:[%s13740_s18 + $0x10] sm:$0xff] }
 0x218   : > { %9746 = vmatprep.mubr.msk.f32.mxu0 %vm842_vm1, %v11179_v44  ;;  %9758 = vmatpush3.msra.mxu1 %v8598_v19  ;;  %v3136_v44 = vld [vmem:[#allocation3 + $0x50] sm:$0xff]  ;;  %v3461_v11 = vld [vmem:[%s11425_s0 + $0x28] sm:$0xff] }
 0x219   : > { %9731 = vmatmul.mubr.msk.f32.gmra.mxu1 %vm842_vm1, %v2984_v7  ;;  %10353 = vmatprep.subr.mxu1 %v11343_v57  ;;  %v4530_v19 = vld [vmem:[%s13894_s2] sm:$0xff]  ;;  %v4533_v7 = vld [vmem:[#allocation2 + $0x10] sm:$0xff] }
 0x21a   : > { %9733 = vmatprep.mubr.msk.f32.mxu1 %vm842_vm1, %v2985_v4  ;;  %9772 = vmatpush3.msra.mxu0 %v11343_v57  ;;  %v3821_v4 = vld [vmem:[%s13740_s18 + $0x18] sm:$0xff] }
 0x21b   : > { %9747 = vmatmul.mubr.msk.f32.gmra.mxu0 %vm842_vm1, %v11196_v55  ;;  %9885 = vmatprep.subr.mxu0 %v8675_v49  ;;  %v3289_v55 = vmul.f32 %v10970_v32, %v11266_v43  ;;  %v3290_v32 = vmul.f32 %v11062_v25, %v11280_v3  ;;  %v3292_v25 = vmul.f32 %v3284_v63, %v11085_v53  ;;  %v3464_v43 = vld [vmem:[%s11425_s0 + $0x40] sm:$0xff]  ;;  %v3477_v53 = vld [vmem:[%s11425_s0 + $0xa8] sm:$0xff]  ;;  %v3478_v3 = vld [vmem:[%s11425_s0 + $0xb0] sm:$0xff] }
 0x21c   : > { %9749 = vmatprep.mubr.msk.f32.mxu0 %vm842_vm1, %v11205_v58  ;;  %10422 = vset.pattern.permute.xlu1 %v10504_v6  ;;  %v3459_v58 = vld [vmem:[%s11425_s0 + $0x18] sm:$0xff]  ;;  %v3836_v63 = vld [vmem:[%s13740_s18 + $0x90] sm:$0xff] }
 0x21d   : > { %9734 = vmatmul.mubr.msk.f32.gmra.mxu1 %vm842_vm1, %v2986_v24  ;;  %4430 = vperm.xlu1 %10422, %v4292_v37   ;;  %v4302_v24 = vld [vmem:[%s13889_s24 + $0xe0] sm:$0xff] }
 0x21e   : > { %9736 = vmatprep.mubr.msk.f32.mxu1 %vm842_vm1, %v2987_v47  ;;  %4455 = vperm.xlu0 %10425, %v11463_v16   ;;  %v3823_v47 = vld [vmem:[%s13740_s18 + $0x28] sm:$0xff] }
 0x21f   : > { %9750 = vmatmul.mubr.msk.f32.gmra.mxu0 %vm842_vm1, %v11218_v0  ;;  %v3291_v0 = vmul.f32 %v11354_v50, %v10975_v34  ;;  %v3463_v34 = vld [vmem:[%s11425_s0 + $0x38] sm:$0xff]  ;;  %v4298_v50 = vld [vmem:[%s13889_s24 + $0xc0] sm:$0xff] }
 0x220   : > { %9752 = vmatprep.mubr.msk.f32.mxu0 %vm842_vm1, %v2676_v14  ;;  %v4532_v14 = vld [vmem:[#allocation2 + $0x8] sm:$0xff] }
 0x221   : > { %9737 = vmatmul.mubr.msk.f32.gmra.mxu1 %vm842_vm1, %v2988_v38  ;;  %10423 = vset.pattern.permute.xlu1 %v10503_v2  ;;  %v3826_v38 = vld [vmem:[%s13740_s18 + $0x40] sm:$0xff] }
 0x222   : > { %9759 = vmatprep.mubr.msk.f32.mxu1 %vm842_vm1, %v3285_v42  ;;  %5314 = vperm.xlu1 %10423, %v4292_v37   ;;  %v3825_v37 = vld [vmem:[%s13740_s18 + $0x38] sm:$0xff]  ;;  %v4299_v42 = vld [vmem:[%s13889_s24 + $0xc8] sm:$0xff] }
 0x223   : > { %9753 = vmatmul.mubr.msk.f32.gmra.mxu0 %vm842_vm1, %v3136_v44  ;;  %4460 = vperm.xlu0 %10425, %v4298_v50   ;;  %v3827_v44 = vld [vmem:[%s13740_s18 + $0x48] sm:$0xff] }
 0x224   : > { %9773 = vmatprep.mubr.msk.f32.mxu0 %vm3496_vm2, %v3456_v45  ;;  %v3828_v45 = vld [vmem:[%s13740_s18 + $0x50] sm:$0xff] }
 0x225   : > { %9760 = vmatmul.mubr.msk.f32.vlgmr.msra.gmra.mxu1 %vm842_vm1, %v3286_v46  ;;  %v11632_v46 = vld [vmem:[%s13889_s24 + $0xf8] sm:$0xff] }
 0x226   : > { %10354 = vmatpush3.msra.mxu1 %v11343_v57  ;;  %9762 = vmatprep.mubr.msk.f32.mxu1 %vm842_vm1, %v3287_v52  ;;  %v3485_v57 = vld [vmem:[%s11425_s0 + $0xe8] sm:$0xff]  ;;  %v3829_v52 = vld [vmem:[%s13740_s18 + $0x58] sm:$0xff] }
 0x227   : > { %9821 = vmatprep.subr.mxu1 %v11136_v23  ;;  %9774 = vmatmul.mubr.msk.f32.vlgmr.msra.gmra.mxu0 %vm3496_vm2, %v3457_v5  ;;  %v3830_v5 = vld [vmem:[%s13740_s18 + $0x60] sm:$0xff] }
 0x228   : > { %9776 = vmatprep.mubr.msk.f32.mxu0 %vm3496_vm2, %v3458_v54  ;;  %9886 = vmatpush3.msra.mxu0 %v8675_v49  ;;  %v3822_v49 = vld [vmem:[%s13740_s18 + $0x20] sm:$0xff]  ;;  %v11642_v54 = vpop.permute.xlu0 %5242 }
 0x229   : > { %9763 = vmatmul.mubr.msk.f32.gmra.mxu1 %vm842_vm1, %v3288_v31  ;;  %9887 = vmatprep.subr.mxu0 %v8674_v30  ;;  %13896 = vst [vmem:[#allocation10_spill] sm:$0xff] %v11642_v54  ;;  %v3831_v31 = vld [vmem:[%s13740_s18 + $0x68] sm:$0xff]  ;;  %v8775_v54 = vld [vmem:[%s13894_s2 + $0x38] sm:$0xff] }
 0x22a   : > { %9765 = vmatprep.mubr.msk.f32.mxu1 %vm842_vm1, %v3289_v55  ;;  %9888 = vmatpush3.msra.mxu0 %v8674_v30  ;;  %v4300_v30 = vld [vmem:[%s13889_s24 + $0xd0] sm:$0xff] }
 0x22b   : > { %9777 = vmatmul.mubr.msk.f32.gmra.mxu0 %vm3496_vm2, %v3459_v58  ;;  %5318 = vperm.xlu1 %10423, %v11359_v9   ;;  %v3487_v9 = vld [vmem:[%s11425_s0 + $0xf8] sm:$0xff]  ;;  %v3832_v55 = vld [vmem:[%s13740_s18 + $0x70] sm:$0xff] }
 0x22c   : > { %9779 = vmatprep.mubr.msk.f32.mxu0 %vm3496_vm2, %v3460_v62  ;;  %4475 = vperm.xlu0 %10425, %v11573_v27   ;;  %v11660_v58 = vpop.permute.xlu0 %5258  ;;  %v3833_v62 = vld [vmem:[%s13740_s18 + $0x78] sm:$0xff] }
 0x22d   : > { %9766 = vmatmul.mubr.msk.f32.gmra.mxu1 %vm842_vm1, %v3290_v32  ;;  %13897 = vst [vmem:[#allocation11_spill] sm:$0xff] %v11660_v58  ;;  %v3835_v32 = vld [vmem:[%s13740_s18 + $0x88] sm:$0xff] }
 0x22e   : > { %9768 = vmatprep.mubr.msk.f32.mxu1 %vm842_vm1, %v3291_v0 }
 0x22f   : > { %9780 = vmatmul.mubr.msk.f32.gmra.mxu0 %vm3496_vm2, %v3461_v11  ;;  %10424 = vset.pattern.permute.xlu1 %v10504_v6  ;;  %v3837_v11 = vld [vmem:[%s13740_s18 + $0x98] sm:$0xff] }
 0x230   : > { %9782 = vmatprep.mubr.msk.f32.mxu0 %vm3496_vm2, %v3462_v17  ;;  %4445 = vperm.xlu1 %10424, %v11485_v40   ;;  %v11678_v0 = vpop.permute.xlu0 %5274  ;;  %v3838_v17 = vld [vmem:[%s13740_s18 + $0xa0] sm:$0xff] }
 0x231   : > { %9769 = vmatmul.mubr.msk.f32.gmra.mxu1 %vm842_vm1, %v3292_v25  ;;  %4480 = vperm.xlu0 %10425, %v4302_v24   ;;  %13898 = vst [vmem:[#allocation12_spill] sm:$0xff] %v11678_v0  ;;  %v4303_v25 = vld [vmem:[%s13889_s24 + $0xe8] sm:$0xff] }
 0x232   : > { %9803 = vmatprep.mubr.msk.f32.mxu1 %vm3496_vm2, %v3476_v22 }
 0x233   : > { %9783 = vmatmul.mubr.msk.f32.gmra.mxu0 %vm3496_vm2, %v3463_v34  ;;  %v3839_v34 = vld [vmem:[%s13740_s18 + $0xa8] sm:$0xff] }
 0x234   : > { %9785 = vmatprep.mubr.msk.f32.mxu0 %vm3496_vm2, %v3464_v43  ;;  %10426 = vset.pattern.permute.xlu1 %v10503_v2  ;;  %v11693_v22 = vpop.permute.xlu0 %5290  ;;  %v11703_v43 = vpop.permute.xlu1 %4345 }
 0x235   : > { %9804 = vmatmul.mubr.msk.f32.vlgmr.msra.gmra.mxu1 %vm3496_vm2, %v3477_v53  ;;  %5326 = vperm.xlu1 %10426, %v11485_v40   ;;  %13899 = vst [vmem:[#allocation13_spill] sm:$0xff] %v11693_v22  ;;  %v3840_v40 = vld [vmem:[%s13740_s18 + $0xb0] sm:$0xff]  ;;  %13900 = vst [vmem:[#allocation14_spill] sm:$0xff] %v11703_v43  ;;  %v3841_v53 = vld [vmem:[%s13740_s18 + $0xb8] sm:$0xff] }
 0x236   : > { %9822 = vmatpush3.msra.mxu1 %v11136_v23  ;;  %9806 = vmatprep.mubr.msk.f32.mxu1 %vm3496_vm2, %v3478_v3  ;;  %v3468_v23 = vld [vmem:[%s11425_s0 + $0x60] sm:$0xff] }
 0x237   : > { %9823 = vmatprep.subr.mxu1 %v11162_v29  ;;  %9786 = vmatmul.mubr.msk.f32.gmra.mxu0 %vm3496_vm2, %v3465_v15  ;;  %v3842_v3 = vld [vmem:[%s13740_s18 + $0xc0] sm:$0xff] }
 0x238   : > { %9824 = vmatpush3.msra.mxu1 %v11162_v29  ;;  %9788 = vmatprep.mubr.msk.f32.mxu0 %vm3496_vm2, %v3466_v28  ;;  %v3469_v29 = vld [vmem:[%s11425_s0 + $0x68] sm:$0xff]  ;;  %v11714_v15 = vpop.permute.xlu0 %5306  ;;  %v11716_v28 = vpop.permute.xlu1 %5246 }
 0x239   : > { %9825 = vmatprep.subr.mxu1 %v11114_v10  ;;  %9807 = vmatmul.mubr.msk.f32.gmra.mxu1 %vm3496_vm2, %v3479_v39  ;;  %13901 = vst [vmem:[#allocation15_spill] sm:$0xff] %v11714_v15  ;;  %13902 = vst [vmem:[#allocation16_spill] sm:$0xff] %v11716_v28  ;;  %v4304_v39 = vld [vmem:[%s13889_s24 + $0xf0] sm:$0xff] }
 0x23a   : > { %9826 = vmatpush3.msra.mxu1 %v11114_v10  ;;  %9809 = vmatprep.mubr.msk.f32.mxu1 %vm3496_vm2, %v3480_v35  ;;  %v3470_v10 = vld [vmem:[%s11425_s0 + $0x70] sm:$0xff]  ;;  %v3843_v35 = vld [vmem:[%s13740_s18 + $0xc8] sm:$0xff] }
 0x23b   : > { %9827 = vmatprep.subr.mxu1 %v11119_v13  ;;  %9789 = vmatmul.mubr.msk.f32.gmra.mxu0 %vm3496_vm2, %v3467_v21  ;;  %v3844_v21 = vld [vmem:[%s13740_s18 + $0xd0] sm:$0xff] }
 0x23c   : > { %9828 = vmatpush3.msra.mxu1 %v11119_v13  ;;  %9791 = vmatprep.mubr.msk.f32.mxu0 %vm3496_vm2, %v3468_v23  ;;  %v3471_v13 = vld [vmem:[%s11425_s0 + $0x78] sm:$0xff]  ;;  %v11731_v23 = vpop.permute.xlu0 %5322 }
 0x23d   : > { %9829 = vmatprep.subr.mxu1 %v11096_v60  ;;  %9810 = vmatmul.mubr.msk.f32.gmra.mxu1 %vm3496_vm2, %v3481_v8  ;;  %13903 = vst [vmem:[#allocation17_spill] sm:$0xff] %v11731_v23  ;;  %v3845_v8 = vld [vmem:[%s13740_s18 + $0xd8] sm:$0xff] }
 0x23e   : > { %9830 = vmatpush3.msra.mxu1 %v11096_v60  ;;  %9812 = vmatprep.mubr.msk.f32.mxu1 %vm3496_vm2, %v3482_v48  ;;  %v3472_v60 = vld [vmem:[%s11425_s0 + $0x80] sm:$0xff]  ;;  %v11737_v48 = vpop.permute.xlu1 %4350 }
 0x23f   : > { %9831 = vmatprep.subr.mxu1 %v11105_v1  ;;  %9792 = vmatmul.mubr.msk.f32.gmra.mxu0 %vm3496_vm2, %v3469_v29  ;;  %13904 = vst [vmem:[#allocation18_spill] sm:$0xff] %v11737_v48  ;;  %v3846_v29 = vld [vmem:[%s13740_s18 + $0xe0] sm:$0xff] }
 0x240   : > { %9832 = vmatpush3.msra.mxu1 %v11105_v1  ;;  %9794 = vmatprep.mubr.msk.f32.mxu0 %vm3496_vm2, %v3470_v10  ;;  %v3486_v1 = vld [vmem:[%s11425_s0 + $0xf0] sm:$0xff] }
 0x241   : > { %9833 = vmatprep.subr.mxu1 %v11082_v51  ;;  %9813 = vmatmul.mubr.msk.f32.gmra.mxu1 %vm3496_vm2, %v3483_v33  ;;  %v3848_v10 = vld [vmem:[%s13740_s18 + $0xf0] sm:$0xff]  ;;  %v11751_v33 = vpop.permute.xlu0 %4340 }
 0x242   : > { %9834 = vmatpush3.msra.mxu1 %v11082_v51  ;;  %9815 = vmatprep.mubr.msk.f32.mxu1 %vm3496_vm2, %v3484_v41  ;;  %v3474_v51 = vld [vmem:[%s11425_s0 + $0x90] sm:$0xff]  ;;  %13905 = vst [vmem:[#allocation19_spill] sm:$0xff] %v11751_v33  ;;  %v4306_v41 = vld [vmem:[#allocation2 + $0x7] sm:$0xff]  ;;  %s11898_s0 = scalar_lea.vmem %s13743_s21, %s13923_s27  ;;  %s10506_s27 = smov [#allocation5]  }
 0x243   : > { %9835 = vmatprep.subr.mxu1 %v11091_v56  ;;  %9795 = vmatmul.mubr.msk.f32.gmra.mxu0 %vm3496_vm2, %v3471_v13  ;;  %v11753_v13 = vpop.permute.xlu1 %5250  ;;  %s10445_s1 = sshll.u32 %s10506_s27, 4  ;;  %s10446_s1 = int_to_ptr.vmem [resolvable:$false] %s10445_s1 }
 0x244   : > { %9836 = vmatpush3.msra.mxu1 %v11091_v56  ;;  %9797 = vmatprep.mubr.msk.f32.mxu0 %vm3496_vm2, %v3472_v60  ;;  %v3818_v56 = vld [vmem:[%s13740_s18] sm:$0xff]  ;;  %13906 = vst [vmem:[#allocation20_spill] sm:$0xff] %v11753_v13  ;;  %v3849_v60 = vld [vmem:[%s13740_s18 + $0xf8] sm:$0xff]  ;;  %s10447_s11 = scalar_lea.vmem %s10446_s1, 512  ;;  %p10448_p0 = scmp.lt.s32.totalorder %s13351_s5, %s10446_s1 }
 0x245   : > { %9816 = vmatmul.mubr.msk.f32.gmra.mxu1 %vm3496_vm2, %v3485_v57  ;;  %9937 = vmatprep.subr.mxu1 %v4531_v59  ;;  %v4307_v57 = vld [vmem:[#allocation2 + $0xf] sm:$0xff]  ;;  %p10449_p1 = scmp.lt.s32.totalorder %s10447_s11, %s10441_s17 }
 0x246   : > { %9818 = vmatprep.mubr.msk.f32.mxu1 %vm3496_vm2, %v3486_v1  ;;  %10427 = vset.pattern.permute.xlu1 %v10504_v6  ;;  %v4499_v1 = vmul.f32 %v11703_v43, %v4307_v57 }
 0x247   : > { %9798 = vmatmul.mubr.msk.f32.gmra.mxu0 %vm3496_vm2, %v3473_v61  ;;  %4450 = vperm.xlu1 %10427, %v4296_v20   ;;  %p10450_p2 = por %p10449_p1, %p10448_p0 }
 0x248   : > { %9800 = vmatprep.mubr.msk.f32.mxu0 %vm3496_vm2, %v3474_v51  ;;  %10433 = vset.pattern.permute.xlu0 %v10503_v2 }
 0x249   : > { %9819 = vmatmul.mubr.msk.f32.gmra.mxu1 %vm3496_vm2, %v3487_v9  ;;  %5338 = vperm.xlu0 %10433, %v4298_v50   ;;  %v8741_v50 = vld [vmem:[%s13894_s2 + $0x28] sm:$0xff]  ;;  %p10451_p3 = pnand %p10450_p2, %p10444_p13 }
 0x24a   : > { %9837 = vmatprep.mubr.msk.f32.mxu1 %vm3850_vm3, %v3818_v56  ;;  %9989 = vmatprep.subr.mxu0 %v8741_v50 }
 0x24b   : > { %9801 = vmatmul.mubr.msk.f32.gmra.mxu0 %vm3496_vm2, %v3475_v12  ;;  %10428 = vset.pattern.permute.xlu1 %v10503_v2 }
 0x24c   : > { %9889 = vmatprep.mubr.msk.f32.mxu0 %vm842_vm1, %v4532_v14  ;;  %5330 = vperm.xlu1 %10428, %v4296_v20  }
 0x24d   : > { %9838 = vmatmul.mubr.msk.f32.vlgmr.msra.gmra.mxu1 %vm3850_vm3, %v3819_v18  ;;  %5354 = vperm.xlu0 %10433, %v4302_v24  }
 0x24e   : > { %9840 = vmatprep.mubr.msk.f32.mxu1 %vm3850_vm3, %v3820_v36  ;;  %9938 = vmatpush3.msra.mxu1 %v4531_v59  ;;  %v11764_v59 = vpop.permute.xlu1 %5254 }
 0x24f   : > { %9939 = vmatprep.subr.mxu1 %v4530_v19  ;;  %9890 = vmatmul.mubr.msk.f32.vlgmr.msra.gmra.mxu0 %vm842_vm1, %v4533_v7  ;;  %13907 = vst [vmem:[#allocation21_spill] sm:$0xff] %v11764_v59 }
 0x250   : > { %9940 = vmatpush3.msra.mxu1 %v4530_v19  ;;  %5334 = vperm.xlu1 %10428, %v11463_v16   ;;  %v3834_v16 = vld [vmem:[%s13740_s18 + $0x80] sm:$0xff] }
 0x251   : > { %9841 = vmatmul.mubr.msk.f32.gmra.mxu1 %vm3850_vm3, %v3821_v4  ;;  %10437 = vset.pattern.permute.xlu0 %v10504_v6 }
 0x252   : > { %9843 = vmatprep.mubr.msk.f32.mxu1 %vm3850_vm3, %v3822_v49  ;;  %4495 = vperm.xlu0 %10437, %v11632_v46   ;;  %v11768_v61 = vpop.permute.xlu1 %4365 }
 0x253   : > { %13908 = vst [vmem:[#allocation22_spill] sm:$0xff] %v11768_v61  ;;  %9990 = vmatpush3.msra.mxu0 %v8741_v50  ;;  %10041 = vmatprep.subr.mxu1 %v8775_v54 }
 0x254   : > { %10429 = vset.pattern.permute.xlu1 %v10504_v6 }
 0x255   : > { %9844 = vmatmul.mubr.msk.f32.gmra.mxu1 %vm3850_vm3, %v3823_v47  ;;  %4465 = vperm.xlu1 %10429, %v4299_v42  }
 0x256   : > { %9846 = vmatprep.mubr.msk.f32.mxu1 %vm3850_vm3, %v3824_v26  ;;  %10439 = vset.pattern.permute.xlu0 %v10503_v2  ;;  %v11770_v51 = vpop.permute.xlu1 %5262 }
 0x257   : > { %13909 = vst [vmem:[#allocation23_spill] sm:$0xff] %v11770_v51 }
 0x259   : > { %9847 = vmatmul.mubr.msk.f32.gmra.mxu1 %vm3850_vm3, %v3825_v37  ;;  %10430 = vset.pattern.permute.xlu1 %v10503_v2 }
 0x25a   : > { %9849 = vmatprep.mubr.msk.f32.mxu1 %vm3850_vm3, %v3826_v38  ;;  %5342 = vperm.xlu1 %10430, %v4299_v42   ;;  %v11775_v9 = vpop.permute.xlu1 %4370 }
 0x25b   : > { %13910 = vst [vmem:[#allocation24_spill] sm:$0xff] %v11775_v9 }
 0x25d   : > { %9850 = vmatmul.mubr.msk.f32.gmra.mxu1 %vm3850_vm3, %v3827_v44 }
 0x25e   : > { %9852 = vmatprep.mubr.msk.f32.mxu1 %vm3850_vm3, %v3828_v45  ;;  %10431 = vset.pattern.permute.xlu1 %v10504_v6  ;;  %v11777_v56 = vpop.permute.xlu1 %5266 }
 0x25f   : > { %4470 = vperm.xlu1 %10431, %v4300_v30   ;;  %13911 = vst [vmem:[#allocation25_spill] sm:$0xff] %v11777_v56 }
 0x261   : > { %9853 = vmatmul.mubr.msk.f32.gmra.mxu1 %vm3850_vm3, %v3829_v52 }
 0x262   : > { %9855 = vmatprep.mubr.msk.f32.mxu1 %vm3850_vm3, %v3830_v5  ;;  %v11779_v18 = vpop.permute.xlu1 %5270 }
 0x263   : > { %10432 = vset.pattern.permute.xlu1 %v10503_v2  ;;  %13912 = vst [vmem:[#allocation26_spill] sm:$0xff] %v11779_v18 }
 0x264   : > { %5346 = vperm.xlu1 %10432, %v4300_v30  }
 0x265   : > { %9856 = vmatmul.mubr.msk.f32.gmra.mxu1 %vm3850_vm3, %v3831_v31  ;;  %v8740_v31 = vld [vmem:[%s13894_s2 + $0x20] sm:$0xff] }
 0x266   : > { %9858 = vmatprep.mubr.msk.f32.mxu1 %vm3850_vm3, %v3832_v55  ;;  %v11785_v24 = vpop.permute.xlu1 %4385  ;;  %9991 = vmatprep.subr.mxu0 %v8740_v31 }
 0x267   : > { %13913 = vst [vmem:[#allocation27_spill] sm:$0xff] %v11785_v24  ;;  %9992 = vmatpush3.msra.mxu0 %v8740_v31 }
 0x268   : > { %5350 = vperm.xlu1 %10432, %v11573_v27  }
 0x269   : > { %9859 = vmatmul.mubr.msk.f32.gmra.mxu1 %vm3850_vm3, %v3833_v62 }
 0x26a   : > { %9861 = vmatprep.mubr.msk.f32.mxu1 %vm3850_vm3, %v3834_v16  ;;  %v11799_v45 = vpop.permute.xlu1 %5278 }
 0x26b   : > { %13914 = vst [vmem:[#allocation28_spill] sm:$0xff] %v11799_v45 }
 0x26c   : > { %10434 = vset.pattern.permute.xlu1 %v10504_v6 }
 0x26d   : > { %9862 = vmatmul.mubr.msk.f32.gmra.mxu1 %vm3850_vm3, %v3835_v32  ;;  %4485 = vperm.xlu1 %10434, %v4303_v25  }
 0x26e   : > { %9864 = vmatprep.mubr.msk.f32.mxu1 %vm3850_vm3, %v3836_v63  ;;  %v11806_v16 = vpop.permute.xlu1 %4390 }
 0x26f   : > { %13915 = vst [vmem:[#allocation29_spill] sm:$0xff] %v11806_v16 }
 0x271   : > { %9865 = vmatmul.mubr.msk.f32.gmra.mxu1 %vm3850_vm3, %v3837_v11  ;;  %10435 = vset.pattern.permute.xlu1 %v10503_v2 }
 0x272   : > { %9867 = vmatprep.mubr.msk.f32.mxu1 %vm3850_vm3, %v3838_v17  ;;  %5358 = vperm.xlu1 %10435, %v4303_v25  }
 0x275   : > { %9868 = vmatmul.mubr.msk.f32.gmra.mxu1 %vm3850_vm3, %v3839_v34 }
 0x276   : > { %9870 = vmatprep.mubr.msk.f32.mxu1 %vm3850_vm3, %v3840_v40  ;;  %10436 = vset.pattern.permute.xlu1 %v10504_v6  ;;  %v3847_v6 = vld [vmem:[%s13740_s18 + $0xe8] sm:$0xff]  ;;  %v11812_v40 = vpop.permute.xlu1 %5282 }
 0x277   : > { %4490 = vperm.xlu1 %10436, %v4304_v39   ;;  %13916 = vst [vmem:[#allocation30_spill] sm:$0xff] %v11812_v40 }
 0x279   : > { %9871 = vmatmul.mubr.msk.f32.gmra.mxu1 %vm3850_vm3, %v3841_v53 }
 0x27a   : > { %9873 = vmatprep.mubr.msk.f32.mxu1 %vm3850_vm3, %v3842_v3 }
 0x27b   : > { %10438 = vset.pattern.permute.xlu1 %v10503_v2  ;;  %v4498_v2 = vmul.f32 %v11751_v33, %v4306_v41 }
 0x27c   : > { %5362 = vperm.xlu1 %10438, %v4304_v39  }
 0x27d   : > { %9874 = vmatmul.mubr.msk.f32.gmra.mxu1 %vm3850_vm3, %v3843_v35 }
 0x27e   : > { %9876 = vmatprep.mubr.msk.f32.mxu1 %vm3850_vm3, %v3844_v21 }
 0x280   : > { %5366 = vperm.xlu1 %10438, %v11632_v46  }
 0x281   : > { %9877 = vmatmul.mubr.msk.f32.gmra.mxu1 %vm3850_vm3, %v3845_v8 }
 0x282   : > { %9879 = vmatprep.mubr.msk.f32.mxu1 %vm3850_vm3, %v3846_v29  ;;  %v11824_v29 = vpop.permute.xlu1 %5286 }
 0x283   : > { %13917 = vst [vmem:[#allocation31_spill] sm:$0xff] %v11824_v29 }
 0x285   : > { %9880 = vmatmul.mubr.msk.f32.gmra.mxu1 %vm3850_vm3, %v3847_v6 }
 0x286   : > { %9882 = vmatprep.mubr.msk.f32.mxu1 %vm3850_vm3, %v3848_v10 }
 0x289   : > { %9883 = vmatmul.mubr.msk.f32.gmra.mxu1 %vm3850_vm3, %v3849_v60 }
 0x28a   : > { %9941 = vmatprep.mubr.msk.f32.mxu1 %vm842_vm1, %v4498_v2 }
 0x28d   : > { %9942 = vmatmul.mubr.msk.f32.vlgmr.msra.gmra.mxu1 %vm842_vm1, %v4499_v1  ;;  %v11828_v1 = vpop.permute.xlu1 %4405 }
 0x28e   : > { %13918 = vst [vmem:[#allocation32_spill] sm:$0xff] %v11828_v1  ;;  %10042 = vmatpush3.msra.mxu1 %v8775_v54 }
 0x291   : > { %v11842_v45 = vpop.permute.xlu1 %5294 }
 0x292   : > { %13919 = vst [vmem:[#allocation33_spill] sm:$0xff] %v11842_v45 }
 0x2a5   : > { %v9633_v12 = vpop.f32.mrf.mxu1 }
 0x2a7   : > { %v2157_v14 = vpop.f32.mrf.mxu1  ;;  %v9649_v20 = vpop.f32.mrf.mxu0 }
 0x2a8   : > { %v2292_v40 = vadd.f32 %v9649_v20, %v9633_v12  ;;  %v11856_v12 = vld [vmem:[%s13894_s2 + $0x48] sm:$0xff] }
 0x2a9   : > { %v9636_v27 = vpop.f32.mrf.mxu1  ;;  %v2286_v36 = vpop.f32.mrf.mxu0  ;;  %13920 = vst [vmem:[#allocation34_spill] sm:$0xff] %v11856_v12  ;;  %10093 = vmatprep.subr.mxu0 %v11856_v12 }
 0x2aa   : > { %v2287_v56 = vadd.f32 %v2286_v36, %v2157_v14 }
 0x2ab   : > { %v11781_v19 = vpop.f32.mrf.mxu1  ;;  %v9652_v7 = vpop.f32.mrf.mxu0 }
 0x2ac   : > { %v2302_v43 = vadd.f32 %v9652_v7, %v9636_v27 }
 0x2ad   : > { %v11783_v4 = vpop.f32.mrf.mxu1  ;;  %v2296_v49 = vpop.f32.mrf.mxu0 }
 0x2ae   : > { %v2297_v20 = vadd.f32 %v2296_v49, %v11781_v19 }
 0x2af   : > { %v11787_v47 = vpop.f32.mrf.mxu1  ;;  %v11789_v26 = vpop.f32.mrf.mxu0 }
 0x2b1   : > { %v11791_v37 = vpop.f32.mrf.mxu1  ;;  %v11793_v38 = vpop.f32.mrf.mxu0 }
 0x2b3   : > { %v11795_v42 = vpop.f32.mrf.mxu1  ;;  %v11797_v44 = vpop.f32.mrf.mxu0 }
 0x2b5   : > { %v11801_v46 = vpop.f32.mrf.mxu0  ;;  %v9665_v52 = vpop.f32.mrf.mxu1 }
 0x2b6   : > { %v2506_v51 = vadd.f32 %v9665_v52, %v2292_v40  ;;  %v11859_v52 = vpop.permute.xlu1 %4410 }
 0x2b7   : > { %v2466_v5 = vpop.f32.mrf.mxu1  ;;  %v9681_v30 = vpop.f32.mrf.mxu0  ;;  %13921 = vst [vmem:[#allocation35_spill] sm:$0xff] %v11859_v52  ;;  %v2322_v52 = vadd.f32 %v11797_v44, %v11791_v37 }
 0x2b8   : > { %v2505_v13 = vadd.f32 %v2466_v5, %v2287_v56  ;;  %v2662_v14 = vadd.f32 %v9681_v30, %v2506_v51  ;;  %v8774_v56 = vld [vmem:[%s13894_s2 + $0x30] sm:$0xff]  ;;  %v2312_v5 = vadd.f32 %v11789_v26, %v11783_v4 }
 0x2b9   : > { %v9668_v55 = vpop.f32.mrf.mxu1  ;;  %v2622_v62 = vpop.f32.mrf.mxu0  ;;  %10043 = vmatprep.subr.mxu1 %v8774_v56 }
 0x2ba   : > { %v2508_v36 = vadd.f32 %v9668_v55, %v2302_v43  ;;  %v2661_v40 = vadd.f32 %v2622_v62, %v2505_v13  ;;  %v2307_v43 = vadd.f32 %v11793_v38, %v11787_v47  ;;  %10044 = vmatpush3.msra.mxu1 %v8774_v56  ;;  %v11872_v62 = vpop.permute.xlu1 %5298  ;;  %v2317_v47 = vadd.f32 %v11801_v46, %v11795_v42 }
 0x2bb   : > { %v2476_v32 = vpop.f32.mrf.mxu1  ;;  %v9684_v63 = vpop.f32.mrf.mxu0 }
 0x2bc   : > { %v2507_v45 = vadd.f32 %v2476_v32, %v2297_v20  ;;  %v2664_v30 = vadd.f32 %v9684_v63, %v2508_v36 }
 0x2bd   : > { %v9671_v11 = vpop.f32.mrf.mxu1  ;;  %v11808_v17 = vpop.f32.mrf.mxu0 }
 0x2be   : > { %v2510_v55 = vadd.f32 %v9671_v11, %v2312_v5  ;;  %v2663_v13 = vadd.f32 %v11808_v17, %v2507_v45 }
 0x2bf   : > { %v2486_v25 = vpop.f32.mrf.mxu1  ;;  %v11810_v34 = vpop.f32.mrf.mxu0 }
 0x2c0   : > { %v2509_v54 = vadd.f32 %v2486_v25, %v2307_v43  ;;  %v2666_v11 = vadd.f32 %v11810_v34, %v2510_v55 }
 0x2c1   : > { %v11814_v53 = vpop.f32.mrf.mxu1  ;;  %v11816_v3 = vpop.f32.mrf.mxu0 }
 0x2c2   : > { %v2512_v38 = vadd.f32 %v11814_v53, %v2322_v52  ;;  %v2665_v25 = vadd.f32 %v11816_v3, %v2509_v54 }
 0x2c3   : > { %v11818_v39 = vpop.f32.mrf.mxu1  ;;  %v11820_v35 = vpop.f32.mrf.mxu0 }
 0x2c4   : > { %v2511_v45 = vadd.f32 %v11818_v39, %v2317_v47  ;;  %v2668_v46 = vadd.f32 %v11820_v35, %v2512_v38 }
 0x2c5   : > { %v11822_v21 = vpop.f32.mrf.mxu0  ;;  %v9697_v8 = vpop.f32.mrf.mxu1 }
 0x2c6   : > { %v2810_v19 = vadd.f32 %v9697_v8, %v2662_v14  ;;  %v2667_v39 = vadd.f32 %v11822_v21, %v2511_v45 }
 0x2c7   : > { %v2770_v6 = vpop.f32.mrf.mxu1  ;;  %v9713_v10 = vpop.f32.mrf.mxu0 }
 0x2c8   : > { %v2809_v12 = vadd.f32 %v2770_v6, %v2661_v40  ;;  %v2966_v4 = vadd.f32 %v9713_v10, %v2810_v19 }
 0x2c9   : > { %v9700_v41 = vpop.f32.mrf.mxu1  ;;  %v2926_v2 = vpop.f32.mrf.mxu0 }
 0x2ca   : > { %v2812_v26 = vadd.f32 %v9700_v41, %v2664_v30  ;;  %v2965_v8 = vadd.f32 %v2926_v2, %v2809_v12  ;;  %v11885_v12 = vpop.permute.xlu1 %5302 }
 0x2cb   : > { %v2780_v60 = vpop.f32.mrf.mxu1  ;;  %v11826_v57 = vpop.f32.mrf.mxu0  ;;  %13922 = vst [vmem:[#allocation36_spill] sm:$0xff] %v11885_v12 }
 0x2cc   : > { %v2811_v37 = vadd.f32 %v2780_v60, %v2663_v13  ;;  %v2968_v10 = vadd.f32 %v11826_v57, %v2812_v26 }
 0x2cd   : > { %v11830_v50 = vpop.f32.mrf.mxu1  ;;  %v11832_v31 = vpop.f32.mrf.mxu0 }
 0x2ce   : > { %v2814_v41 = vadd.f32 %v11830_v50, %v2666_v11 }
 0x2cf   : > { %v11834_v23 = vpop.f32.mrf.mxu1  ;;  %v11836_v15 = vpop.f32.mrf.mxu0 }
 0x2d0   : > { %v2813_v53 = vadd.f32 %v11834_v23, %v2665_v25  ;;  %v2970_v23 = vadd.f32 %v11836_v15, %v2814_v41 }
 0x2d1   : > { %v11838_v22 = vpop.f32.mrf.mxu1  ;;  %v11840_v29 = vpop.f32.mrf.mxu0 }
 0x2d2   : > { %v2816_v57 = vadd.f32 %v11838_v22, %v2668_v46  ;;  %v2969_v22 = vadd.f32 %v11840_v29, %v2813_v53 }
 0x2d3   : > { %v11844_v0 = vpop.f32.mrf.mxu1  ;;  %v11846_v18 = vpop.f32.mrf.mxu0 }
 0x2d5   : > { %v11848_v58 = vpop.f32.mrf.mxu0  ;;  %v9729_v59 = vpop.f32.mrf.mxu1 }
 0x2d6   : > { %v3122_v44 = vadd.f32 %v9729_v59, %v2966_v4  ;;  %v2967_v59 = vadd.f32 %v11832_v31, %v2811_v37 }
 0x2d7   : > { %v3082_v28 = vpop.f32.mrf.mxu1  ;;  %v9745_v33 = vpop.f32.mrf.mxu0 }
 0x2d8   : > { %v3121_v42 = vadd.f32 %v3082_v28, %v2965_v8  ;;  %v3270_v60 = vadd.f32 %v9745_v33, %v3122_v44  ;;  %v8608_v28 = vld [vmem:[%s13732_s10] ss:$0 sm:$0xff]  ;;  %v2815_v33 = vadd.f32 %v11844_v0, %v2667_v39  ;;  %v11922_v44 = vpop.permute.xlu0 %4355 }
 0x2d9   : > { %v9732_v27 = vpop.f32.mrf.mxu1  ;;  %v3230_v7 = vpop.f32.mrf.mxu0  ;;  %13926 = vst [vmem:[#allocation39_spill] sm:$0xff] %v11922_v44 }
 0x2da   : > { %v3124_v3 = vadd.f32 %v9732_v27, %v2968_v10  ;;  %v3269_v35 = vadd.f32 %v3230_v7, %v3121_v42  ;;  %v2972_v7 = vadd.f32 %v11846_v18, %v2816_v57 }
 0x2db   : > { %v3092_v51 = vpop.f32.mrf.mxu1  ;;  %v9748_v49 = vpop.f32.mrf.mxu0 }
 0x2dc   : > { %v3123_v14 = vadd.f32 %v3092_v51, %v2967_v59  ;;  %v3272_v52 = vadd.f32 %v9748_v49, %v3124_v3  ;;  %v11909_v51 = vpop.permute.xlu1 %4425  ;;  %v2971_v49 = vadd.f32 %v11848_v58, %v2815_v33  ;;  %v11934_v59 = vpop.permute.xlu0 %4360 }
 0x2dd   : > { %v9735_v1 = vpop.f32.mrf.mxu1  ;;  %v3240_v16 = vpop.f32.mrf.mxu0  ;;  %13924 = vst [vmem:[#allocation37_spill] sm:$0xff] %v11909_v51  ;;  %13928 = vst [vmem:[#allocation41_spill] sm:$0xff] %v11934_v59 }
 0x2de   : > { %v3126_v56 = vadd.f32 %v9735_v1, %v2970_v23  ;;  %v3271_v19 = vadd.f32 %v3240_v16, %v3123_v14 }
 0x2df   : > { %v3102_v32 = vpop.f32.mrf.mxu1  ;;  %v9751_v63 = vpop.f32.mrf.mxu0 }
 0x2e0   : > { %v3125_v43 = vadd.f32 %v3102_v32, %v2969_v22  ;;  %v3274_v55 = vadd.f32 %v9751_v63, %v3126_v56  ;;  %v11920_v37 = vpop.permute.xlu1 %5310  ;;  %v11946_v23 = vpop.permute.xlu0 %4375 }
 0x2e1   : > { %v9738_v17 = vpop.f32.mrf.mxu1  ;;  %v3250_v6 = vpop.f32.mrf.mxu0  ;;  %13925 = vst [vmem:[#allocation38_spill] sm:$0xff] %v11920_v37  ;;  %13930 = vst [vmem:[#allocation43_spill] sm:$0xff] %v11946_v23 }
 0x2e2   : > { %v3128_v18 = vadd.f32 %v9738_v17, %v2972_v7  ;;  %v3273_v4 = vadd.f32 %v3250_v6, %v3125_v43 }
 0x2e3   : > { %v3112_v34 = vpop.f32.mrf.mxu1  ;;  %v9754_v2 = vpop.f32.mrf.mxu0 }
 0x2e4   : > { %v3127_v26 = vadd.f32 %v3112_v34, %v2971_v49  ;;  %v3276_v11 = vadd.f32 %v9754_v2, %v3128_v18  ;;  %v11932_v2 = vpop.permute.xlu1 %4430  ;;  %v11956_v33 = vpop.permute.xlu0 %4380 }
 0x2e5   : > { %v3260_v20 = vpop.f32.mrf.mxu0  ;;  %v9761_v50 = vpop.f32.mrf.mxu1  ;;  %13927 = vst [vmem:[#allocation40_spill] sm:$0xff] %v11932_v2  ;;  %13932 = vst [vmem:[#allocation45_spill] sm:$0xff] %v11956_v33 }
 0x2e6   : > { %v3426_v36 = vadd.f32 %v9761_v50, %v3270_v60  ;;  %v3275_v45 = vadd.f32 %v3260_v20, %v3127_v26 }
 0x2e7   : > { %v3386_v21 = vpop.f32.mrf.mxu1  ;;  %v11902_v31 = vpop.f32.mrf.mxu0 }
 0x2e8   : > { %v3441_v15 = vadd.f32 %v8608_v28, %v3426_v36  ;;  %v3425_v27 = vadd.f32 %v3386_v21, %v3269_v35  ;;  %v11944_v50 = vpop.permute.xlu1 %5314 }
 0x2e9   : > { %v9764_v5 = vpop.f32.mrf.mxu1  ;;  %v11905_v40 = vpop.f32.mrf.mxu0  ;;  %13929 = vst [vmem:[#allocation42_spill] sm:$0xff] %v11944_v50 }
 0x2ea   : > { %3449 = vst.msk [vmem:[%s11898_s0 + $0x8] sm:$0xff] %vm842_vm1, %v3441_v15  ;;  %v3440_v29 = vadd.f32 %v8608_v28, %v3425_v27  ;;  %v3428_v0 = vadd.f32 %v9764_v5, %v3272_v52  ;;  %v11966_v5 = vpop.permute.xlu0 %4395 }
 0x2eb   : > { %v3396_v1 = vpop.f32.mrf.mxu1  ;;  %v11912_v30 = vpop.f32.mrf.mxu0  ;;  %13934 = vst [vmem:[#allocation47_spill] sm:$0xff] %v11966_v5 }
 0x2ec   : > { %3448 = vst.msk [vmem:[%s11898_s0] sm:$0xff] %vm842_vm1, %v3440_v29  ;;  %v3443_v54 = vadd.f32 %v8608_v28, %v3428_v0  ;;  %v3427_v16 = vadd.f32 %v3396_v1, %v3271_v19  ;;  %v11954_v22 = vpop.permute.xlu1 %5318  ;;  %v11971_v19 = vld [vmem:[%s13935_s7] ss:$0 sm:$0xff]  ;;  %s13359_s7 = scalar_lea.sflag [#allocation6], %s14171_s4 }
 0x2ed   : > { %v9767_v13 = vpop.f32.mrf.mxu1  ;;  %v3669_v32 = vpop.f32.mrf.mxu0  ;;  %13931 = vst [vmem:[#allocation44_spill] sm:$0xff] %v11954_v22  ;;  %v3665_v29 = vadd.f32 %v11902_v31, %v11971_v19  ;;  %v3675_v18 = vadd.f32 %v11912_v30, %v11971_v19 }
 0x2ee   : > { %3451 = vst.msk [vmem:[%s11898_s0 + $0x18] sm:$0xff] %vm842_vm1, %v3443_v54  ;;  %v3442_v47 = vadd.f32 %v8608_v28, %v3427_v16  ;;  %v3430_v38 = vadd.f32 %v9767_v13, %v3274_v55  ;;  %v3660_v55 = vadd.f32 %v11971_v19, %v11905_v40  ;;  %v11985_v13 = vpop.permute.xlu0 %4400 }
 0x2ef   : > { %v3406_v58 = vpop.f32.mrf.mxu1  ;;  %v9781_v41 = vpop.f32.mrf.mxu0  ;;  %13937 = vst [vmem:[#allocation49_spill] sm:$0xff] %v11985_v13 }
 0x2f0   : > { %3450 = vst.msk [vmem:[%s11898_s0 + $0x10] sm:$0xff] %vm842_vm1, %v3442_v47  ;;  %v3445_v63 = vadd.f32 %v8608_v28, %v3430_v38  ;;  %v3429_v8 = vadd.f32 %v3406_v58, %v3273_v4  ;;  %v11964_v7 = vpop.permute.xlu1 %4445  ;;  %v3670_v38 = vadd.f32 %v11971_v19, %v3669_v32  ;;  %v3685_v40 = vadd.f32 %v9781_v41, %v11971_v19  ;;  %v12003_v32 = vld [vmem:[%s13894_s2 + $0x58] sm:$0xff] }
 0x2f1   : > { %v9770_v25 = vpop.f32.mrf.mxu1  ;;  %v3679_v3 = vpop.f32.mrf.mxu0  ;;  %13933 = vst [vmem:[#allocation46_spill] sm:$0xff] %v11964_v7  ;;  %10145 = vmatprep.subr.mxu1 %v12003_v32 }
 0x2f2   : > { %3453 = vst.msk [vmem:[%s11898_s0 + $0x28] sm:$0xff] %vm842_vm1, %v3445_v63  ;;  %v3444_v17 = vadd.f32 %v8608_v28, %v3429_v8  ;;  %v3432_v6 = vadd.f32 %v9770_v25, %v3276_v11  ;;  %v11998_v25 = vpop.permute.xlu0 %4415 }
 0x2f3   : > { %v3416_v10 = vpop.f32.mrf.mxu1  ;;  %v9784_v20 = vpop.f32.mrf.mxu0  ;;  %13939 = vst [vmem:[#allocation51_spill] sm:$0xff] %v11998_v25 }
 0x2f4   : > { %3452 = vst.msk [vmem:[%s11898_s0 + $0x20] sm:$0xff] %vm842_vm1, %v3444_v17  ;;  %v3447_v42 = vadd.f32 %v8608_v28, %v3432_v6  ;;  %v3431_v46 = vadd.f32 %v3416_v10, %v3275_v45  ;;  %v11983_v16 = vpop.permute.xlu1 %5326  ;;  %v3680_v17 = vadd.f32 %v11971_v19, %v3679_v3  ;;  %v3695_v6 = vadd.f32 %v9784_v20, %v11971_v19 }
 0x2f5   : > { %v11928_v53 = vpop.f32.mrf.mxu1  ;;  %v3689_v14 = vpop.f32.mrf.mxu0  ;;  %13936 = vst [vmem:[#allocation48_spill] sm:$0xff] %v11983_v16 }
 0x2f6   : > { %3455 = vst.msk [vmem:[%s11898_s0 + $0x38] sm:$0xff] %vm842_vm1, %v3447_v42  ;;  %v3446_v34 = vadd.f32 %v8608_v28, %v3431_v46 }
 0x2f7   : > { %v11936_v60 = vpop.f32.mrf.mxu1  ;;  %v9787_v52 = vpop.f32.mrf.mxu0 }
 0x2f8   : > { %3454 = vst.msk [vmem:[%s11898_s0 + $0x30] sm:$0xff] %vm842_vm1, %v3446_v34  ;;  %v11996_v8 = vpop.permute.xlu1 %4450  ;;  %v3690_v34 = vadd.f32 %v11971_v19, %v3689_v14  ;;  %v3705_v20 = vadd.f32 %v9787_v52, %v11971_v19 }
 0x2f9   : > { %v11940_v39 = vpop.f32.mrf.mxu1  ;;  %v3699_v27 = vpop.f32.mrf.mxu0  ;;  %13938 = vst [vmem:[#allocation50_spill] sm:$0xff] %v11996_v8 }
 0x2fb   : > { %v11942_v57 = vpop.f32.mrf.mxu1  ;;  %v9790_v49 = vpop.f32.mrf.mxu0 }
 0x2fd   : > { %v11948_v35 = vpop.f32.mrf.mxu1  ;;  %v11987_v26 = vpop.f32.mrf.mxu0 }
 0x2ff   : > { %v11950_v28 = vpop.f32.mrf.mxu1  ;;  %v11993_v11 = vpop.f32.mrf.mxu0 }
 0x301   : > { %v11952_v36 = vpop.f32.mrf.mxu1  ;;  %v12009_v42 = vpop.f32.mrf.mxu0 }
 0x303   : > { %v11958_v21 = vpop.f32.mrf.mxu1  ;;  %v9796_v52 = vpop.f32.mrf.mxu0 }
 0x305   : > { %v11960_v56 = vpop.f32.mrf.mxu1 }
 0x307   : > { %v11962_v15 = vpop.f32.mrf.mxu1 }
 0x309   : > { %v11973_v43 = vpop.f32.mrf.mxu1 }
 0x30b   : > { %v11977_v0 = vpop.f32.mrf.mxu1 }
 0x30d   : > { %v9839_v1 = vpop.f32.mrf.mxu1 }
 0x30e   : > { %v4173_v54 = vadd.f32 %v9839_v1, %v3665_v29 }
 0x30f   : > { %v4013_v4 = vpop.f32.mrf.mxu1 }
 0x310   : > { %4243 = vst.msk [vmem:[#allocation2 + $0x20] sm:$0xff] %vm842_vm1, %v4173_v54  ;;  %v4172_v31 = vadd.f32 %v4013_v4, %v3660_v55 }
 0x311   : > { %v9842_v47 = vpop.f32.mrf.mxu1 }
 0x312   : > { %4242 = vst.msk [vmem:[#allocation2 + $0x18] sm:$0xff] %vm842_vm1, %v4172_v31  ;;  %v4175_v58 = vadd.f32 %v9842_v47, %v3675_v18  ;;  %v12029_v31 = vpop.permute.xlu1 %5330  ;;  %v12031_v47 = vpop.permute.xlu0 %4420 }
 0x313   : > { %v4023_v30 = vpop.f32.mrf.mxu1  ;;  %13942 = vst [vmem:[#allocation54_spill] sm:$0xff] %v12029_v31  ;;  %13943 = vst [vmem:[#allocation55_spill] sm:$0xff] %v12031_v47 }
 0x314   : > { %4245 = vst.msk [vmem:[#allocation2 + $0x30] sm:$0xff] %vm842_vm1, %v4175_v58  ;;  %v4174_v63 = vadd.f32 %v4023_v30, %v3670_v38  ;;  %v3700_v58 = vadd.f32 %v11971_v19, %v3699_v27 }
 0x315   : > { %v9845_v45 = vpop.f32.mrf.mxu1 }
 0x316   : > { %4244 = vst.msk [vmem:[#allocation2 + $0x28] sm:$0xff] %vm842_vm1, %v4174_v63  ;;  %v4177_v10 = vadd.f32 %v9845_v45, %v3685_v40 }
 0x317   : > { %v4033_v41 = vpop.f32.mrf.mxu1  ;;  %v12023_v54 = vld [vmem:[#allocation2 + $0x20] sm:$0xff] }
 0x318   : > { %4247 = vst.msk [vmem:[#allocation2 + $0x40] sm:$0xff] %vm842_vm1, %v4177_v10  ;;  %v4176_v46 = vadd.f32 %v4033_v41, %v3680_v17  ;;  %13941 = vst [vmem:[#allocation53_spill] sm:$0xff] %v12023_v54 }
 0x319   : > { %v9848_v29 = vpop.f32.mrf.mxu1  ;;  %v12013_v1 = vld [vmem:[#allocation2 + $0x18] sm:$0xff] }
 0x31a   : > { %13940 = vst [vmem:[#allocation52_spill] sm:$0xff] %v12013_v1  ;;  %v12015_v55 = vld [vmem:[#allocation2 + $0x17] sm:$0xff]  ;;  %v12017_v3 = vld [vmem:[#allocation2 + $0x1f] sm:$0xff]  ;;  %4246 = vst.msk [vmem:[#allocation2 + $0x38] sm:$0xff] %vm842_vm1, %v4176_v46  ;;  %v4179_v18 = vadd.f32 %v9848_v29, %v3695_v6  ;;  %9892 = vmatprep.mubr.msk.f32.mxu0 %vm842_vm1, %v12013_v1  ;;  %v3715_v6 = vadd.f32 %v9790_v49, %v11971_v19  ;;  %v3729_v29 = vpop.f32.mrf.mxu0 }
 0x31b   : > { %v4500_v14 = vmul.f32 %v11737_v48, %v12015_v55  ;;  %v4501_v4 = vmul.f32 %v11922_v44, %v12017_v3  ;;  %v4043_v38 = vpop.f32.mrf.mxu1  ;;  %9893 = vmatmul.mubr.msk.f32.gmra.mxu0 %vm842_vm1, %v12023_v54  ;;  %v12049_v41 = vld [vmem:[#allocation2 + $0x30] sm:$0xff] }
 0x31c   : > { %4249 = vst.msk [vmem:[#allocation2 + $0x50] sm:$0xff] %vm842_vm1, %v4179_v18  ;;  %v4178_v40 = vadd.f32 %v4043_v38, %v3690_v34  ;;  %13945 = vst [vmem:[#allocation57_spill] sm:$0xff] %v12049_v41  ;;  %v12061_v18 = vpop.permute.xlu0 %4435 }
 0x31d   : > { %9944 = vmatprep.mubr.msk.f32.mxu1 %vm842_vm1, %v4500_v14  ;;  %v9851_v30 = vpop.f32.mrf.mxu1  ;;  %v12039_v63 = vld [vmem:[#allocation2 + $0x28] sm:$0xff]  ;;  %13947 = vst [vmem:[#allocation59_spill] sm:$0xff] %v12061_v18  ;;  %v3710_v14 = vadd.f32 %v11971_v19, %v11987_v26 }
 0x31e   : > { %9945 = vmatmul.mubr.msk.f32.gmra.mxu1 %vm842_vm1, %v4501_v4  ;;  %13944 = vst [vmem:[#allocation56_spill] sm:$0xff] %v12039_v63  ;;  %v12041_v45 = vld [vmem:[#allocation2 + $0x27] sm:$0xff]  ;;  %v12043_v17 = vld [vmem:[#allocation2 + $0x2f] sm:$0xff]  ;;  %4248 = vst.msk [vmem:[#allocation2 + $0x48] sm:$0xff] %vm842_vm1, %v4178_v40  ;;  %v4181_v10 = vadd.f32 %v9851_v30, %v3705_v20  ;;  %9895 = vmatprep.mubr.msk.f32.mxu0 %vm842_vm1, %v12039_v63  ;;  %v12059_v20 = vpop.permute.xlu1 %5334 }
 0x31f   : > { %v4502_v27 = vmul.f32 %v11934_v59, %v12041_v45  ;;  %v4503_v46 = vmul.f32 %v11768_v61, %v12043_v17  ;;  %v4053_v34 = vpop.f32.mrf.mxu1  ;;  %9896 = vmatmul.mubr.msk.f32.gmra.mxu0 %vm842_vm1, %v12049_v41  ;;  %13946 = vst [vmem:[#allocation58_spill] sm:$0xff] %v12059_v20 }
 0x320   : > { %4251 = vst.msk [vmem:[#allocation2 + $0x60] sm:$0xff] %vm842_vm1, %v4181_v10  ;;  %v4180_v49 = vadd.f32 %v4053_v34, %v3700_v58  ;;  %v3725_v58 = vadd.f32 %v11993_v11, %v11971_v19 }
 0x321   : > { %9947 = vmatprep.mubr.msk.f32.mxu1 %vm842_vm1, %v4502_v27  ;;  %v9854_v4 = vpop.f32.mrf.mxu1  ;;  %v12066_v38 = vld [vmem:[#allocation2 + $0x38] sm:$0xff]  ;;  %v12077_v27 = vld [vmem:[#allocation2 + $0x40] sm:$0xff] }
 0x322   : > { %9948 = vmatmul.mubr.msk.f32.gmra.mxu1 %vm842_vm1, %v4503_v46  ;;  %13948 = vst [vmem:[#allocation60_spill] sm:$0xff] %v12066_v38  ;;  %v12068_v40 = vld [vmem:[#allocation2 + $0x37] sm:$0xff]  ;;  %v12070_v30 = vld [vmem:[#allocation2 + $0x3f] sm:$0xff]  ;;  %4250 = vst.msk [vmem:[#allocation2 + $0x58] sm:$0xff] %vm842_vm1, %v4180_v49  ;;  %v4183_v10 = vadd.f32 %v9854_v4, %v3715_v6  ;;  %9898 = vmatprep.mubr.msk.f32.mxu0 %vm842_vm1, %v12066_v38  ;;  %v9799_v49 = vpop.f32.mrf.mxu0  ;;  %v3720_v6 = vadd.f32 %v11971_v19, %v12009_v42 }
 0x323   : > { %13949 = vst [vmem:[#allocation61_spill] sm:$0xff] %v12077_v27  ;;  %v4504_v26 = vmul.f32 %v11775_v9, %v12068_v40  ;;  %v4505_v46 = vmul.f32 %v11946_v23, %v12070_v30  ;;  %v4063_v34 = vpop.f32.mrf.mxu1  ;;  %9899 = vmatmul.mubr.msk.f32.gmra.mxu0 %vm842_vm1, %v12077_v27  ;;  %v3735_v27 = vadd.f32 %v9796_v52, %v11971_v19 }
 0x324   : > { %4253 = vst.msk [vmem:[#allocation2 + $0x70] sm:$0xff] %vm842_vm1, %v4183_v10  ;;  %v4182_v11 = vadd.f32 %v4063_v34, %v3710_v14  ;;  %v12100_v14 = vld [vmem:[#allocation2 + $0x50] sm:$0xff]  ;;  %v12108_v34 = vpop.permute.xlu0 %4440  ;;  %v3739_v52 = vpop.f32.mrf.mxu0 }
 0x325   : > { %9950 = vmatprep.mubr.msk.f32.mxu1 %vm842_vm1, %v4504_v26  ;;  %v9857_v4 = vpop.f32.mrf.mxu1  ;;  %v12090_v38 = vld [vmem:[#allocation2 + $0x48] sm:$0xff]  ;;  %13951 = vst [vmem:[#allocation63_spill] sm:$0xff] %v12100_v14  ;;  %13953 = vst [vmem:[#allocation65_spill] sm:$0xff] %v12108_v34 }
 0x326   : > { %9951 = vmatmul.mubr.msk.f32.gmra.mxu1 %vm842_vm1, %v4505_v46  ;;  %13950 = vst [vmem:[#allocation62_spill] sm:$0xff] %v12090_v38  ;;  %v12092_v41 = vld [vmem:[#allocation2 + $0x47] sm:$0xff]  ;;  %v12094_v63 = vld [vmem:[#allocation2 + $0x4f] sm:$0xff]  ;;  %4252 = vst.msk [vmem:[#allocation2 + $0x68] sm:$0xff] %vm842_vm1, %v4182_v11  ;;  %v4185_v10 = vadd.f32 %v9857_v4, %v3725_v58  ;;  %9901 = vmatprep.mubr.msk.f32.mxu0 %vm842_vm1, %v12090_v38  ;;  %v12106_v46 = vpop.permute.xlu1 %4465  ;;  %v3730_v11 = vadd.f32 %v11971_v19, %v3729_v29 }
 0x327   : > { %v4506_v42 = vmul.f32 %v11956_v33, %v12092_v41  ;;  %v4507_v26 = vmul.f32 %v11785_v24, %v12094_v63  ;;  %13952 = vst [vmem:[#allocation64_spill] sm:$0xff] %v12106_v46  ;;  %v4073_v54 = vpop.f32.mrf.mxu1  ;;  %9902 = vmatmul.mubr.msk.f32.gmra.mxu0 %vm842_vm1, %v12100_v14  ;;  %v3745_v14 = vadd.f32 %v9799_v49, %v11971_v19  ;;  %v13956_v29 = vld [vmem:[#allocation29_spill] sm:$0xff] }
 0x328   : > { %4255 = vst.msk [vmem:[#allocation2 + $0x80] sm:$0xff] %vm842_vm1, %v4185_v10  ;;  %v4184_v58 = vadd.f32 %v4073_v54, %v3720_v6  ;;  %v12126_v54 = vld [vmem:[#allocation2 + $0x60] sm:$0xff] }
 0x329   : > { %9953 = vmatprep.mubr.msk.f32.mxu1 %vm842_vm1, %v4506_v42  ;;  %v9860_v4 = vpop.f32.mrf.mxu1  ;;  %v12116_v38 = vld [vmem:[#allocation2 + $0x58] sm:$0xff]  ;;  %13955 = vst [vmem:[#allocation67_spill] sm:$0xff] %v12126_v54 }
 0x32a   : > { %9954 = vmatmul.mubr.msk.f32.gmra.mxu1 %vm842_vm1, %v4507_v26  ;;  %13954 = vst [vmem:[#allocation66_spill] sm:$0xff] %v12116_v38  ;;  %v12118_v1 = vld [vmem:[#allocation2 + $0x57] sm:$0xff]  ;;  %v12120_v20 = vld [vmem:[#allocation2 + $0x5f] sm:$0xff]  ;;  %4254 = vst.msk [vmem:[#allocation2 + $0x78] sm:$0xff] %vm842_vm1, %v4184_v58  ;;  %v4187_v31 = vadd.f32 %v9860_v4, %v3735_v27  ;;  %9904 = vmatprep.mubr.msk.f32.mxu0 %vm842_vm1, %v12116_v38  ;;  %v9802_v26 = vpop.f32.mrf.mxu0  ;;  %v12136_v27 = vpop.permute.xlu1 %5342  ;;  %v3740_v58 = vadd.f32 %v11971_v19, %v3739_v52 }
 0x32b   : > { %v4508_v6 = vmul.f32 %v13956_v29, %v12118_v1  ;;  %v4509_v10 = vmul.f32 %v11966_v5, %v12120_v20  ;;  %v4083_v42 = vpop.f32.mrf.mxu1  ;;  %9905 = vmatmul.mubr.msk.f32.gmra.mxu0 %vm842_vm1, %v12126_v54  ;;  %13957 = vst [vmem:[#allocation68_spill] sm:$0xff] %v12136_v27  ;;  %v12146_v54 = vpop.permute.xlu0 %4455  ;;  %v12152_v52 = vld [vmem:[#allocation2 + $0x70] sm:$0xff] }
 0x32c   : > { %4257 = vst.msk [vmem:[#allocation2 + $0x90] sm:$0xff] %vm842_vm1, %v4187_v31  ;;  %v4186_v49 = vadd.f32 %v4083_v42, %v3730_v11  ;;  %13959 = vst [vmem:[#allocation70_spill] sm:$0xff] %v12146_v54  ;;  %v3755_v31 = vadd.f32 %v9802_v26, %v11971_v19  ;;  %v3749_v27 = vpop.f32.mrf.mxu0 }
 0x32d   : > { %9956 = vmatprep.mubr.msk.f32.mxu1 %vm842_vm1, %v4508_v6  ;;  %v9863_v4 = vpop.f32.mrf.mxu1  ;;  %v12140_v38 = vld [vmem:[#allocation2 + $0x68] sm:$0xff]  ;;  %13960 = vst [vmem:[#allocation71_spill] sm:$0xff] %v12152_v52  ;;  %v3750_v37 = vadd.f32 %v11971_v19, %v3749_v27 }
 0x32e   : > { %9957 = vmatmul.mubr.msk.f32.gmra.mxu1 %vm842_vm1, %v4509_v10  ;;  %13958 = vst [vmem:[#allocation69_spill] sm:$0xff] %v12140_v38  ;;  %v12142_v16 = vld [vmem:[#allocation2 + $0x67] sm:$0xff]  ;;  %v12144_v22 = vld [vmem:[#allocation2 + $0x6f] sm:$0xff]  ;;  %4256 = vst.msk [vmem:[#allocation2 + $0x88] sm:$0xff] %vm842_vm1, %v4186_v49  ;;  %v4189_v11 = vadd.f32 %v9863_v4, %v3745_v14  ;;  %9907 = vmatprep.mubr.msk.f32.mxu0 %vm842_vm1, %v12140_v38 }
 0x32f   : > { %v4510_v6 = vmul.f32 %v11985_v13, %v12142_v16  ;;  %v13961_v10 = vld [vmem:[#allocation32_spill] sm:$0xff]  ;;  %v4093_v50 = vpop.f32.mrf.mxu1  ;;  %9908 = vmatmul.mubr.msk.f32.gmra.mxu0 %vm842_vm1, %v12152_v52  ;;  %v12183_v27 = vpop.permute.xlu0 %4460 }
 0x330   : > { %v4511_v42 = vmul.f32 %v13961_v10, %v12144_v22  ;;  %4259 = vst.msk [vmem:[#allocation2 + $0xa0] sm:$0xff] %vm842_vm1, %v4189_v11  ;;  %v4188_v26 = vadd.f32 %v4093_v50, %v3740_v58  ;;  %v12173_v50 = vld [vmem:[#allocation2 + $0x80] sm:$0xff]  ;;  %v13964_v58 = vld [vmem:[#allocation35_spill] sm:$0xff]  ;;  %13966 = vst [vmem:[#allocation75_spill] sm:$0xff] %v12183_v27 }
 0x331   : > { %9959 = vmatprep.mubr.msk.f32.mxu1 %vm842_vm1, %v4510_v6  ;;  %v9866_v14 = vpop.f32.mrf.mxu1  ;;  %v12163_v49 = vld [vmem:[#allocation2 + $0x78] sm:$0xff]  ;;  %13963 = vst [vmem:[#allocation73_spill] sm:$0xff] %v12173_v50 }
 0x332   : > { %9960 = vmatmul.mubr.msk.f32.gmra.mxu1 %vm842_vm1, %v4511_v42  ;;  %13962 = vst [vmem:[#allocation72_spill] sm:$0xff] %v12163_v49  ;;  %v12165_v4 = vld [vmem:[#allocation2 + $0x77] sm:$0xff]  ;;  %v12167_v38 = vld [vmem:[#allocation2 + $0x7f] sm:$0xff]  ;;  %4258 = vst.msk [vmem:[#allocation2 + $0x98] sm:$0xff] %vm842_vm1, %v4188_v26  ;;  %v4191_v12 = vadd.f32 %v9866_v14, %v3755_v31  ;;  %9910 = vmatprep.mubr.msk.f32.mxu0 %vm842_vm1, %v12163_v49  ;;  %v12179_v42 = vpop.permute.xlu1 %4470  ;;  %v3765_v31 = vadd.f32 %v11928_v53, %v11971_v19 }
 0x333   : > { %v4512_v11 = vmul.f32 %v13964_v58, %v12165_v4  ;;  %v4513_v6 = vmul.f32 %v11998_v25, %v12167_v38  ;;  %13965 = vst [vmem:[#allocation74_spill] sm:$0xff] %v12179_v42  ;;  %v4103_v52 = vpop.f32.mrf.mxu1  ;;  %9911 = vmatmul.mubr.msk.f32.gmra.mxu0 %vm842_vm1, %v12173_v50  ;;  %v3760_v50 = vadd.f32 %v11971_v19, %v11936_v60 }
 0x334   : > { %4261 = vst.msk [vmem:[#allocation2 + $0xb0] sm:$0xff] %vm842_vm1, %v4191_v12  ;;  %v4190_v26 = vadd.f32 %v4103_v52, %v3750_v37  ;;  %v12201_v12 = vld [vmem:[#allocation2 + $0x90] sm:$0xff]  ;;  %v3775_v60 = vadd.f32 %v11940_v39, %v11971_v19  ;;  %v3770_v39 = vadd.f32 %v11971_v19, %v11942_v57  ;;  %v3785_v57 = vadd.f32 %v11948_v35, %v11971_v19 }
 0x335   : > { %9962 = vmatprep.mubr.msk.f32.mxu1 %vm842_vm1, %v4512_v11  ;;  %v9869_v14 = vpop.f32.mrf.mxu1  ;;  %v12190_v49 = vld [vmem:[#allocation2 + $0x88] sm:$0xff]  ;;  %13968 = vst [vmem:[#allocation77_spill] sm:$0xff] %v12201_v12 }
 0x336   : > { %9963 = vmatmul.mubr.msk.f32.gmra.mxu1 %vm842_vm1, %v4513_v6  ;;  %13967 = vst [vmem:[#allocation76_spill] sm:$0xff] %v12190_v49  ;;  %v12192_v25 = vld [vmem:[#allocation2 + $0x87] sm:$0xff]  ;;  %v12194_v58 = vld [vmem:[#allocation2 + $0x8f] sm:$0xff]  ;;  %4260 = vst.msk [vmem:[#allocation2 + $0xa8] sm:$0xff] %vm842_vm1, %v4190_v26  ;;  %v4193_v53 = vadd.f32 %v9869_v14, %v3765_v31  ;;  %9913 = vmatprep.mubr.msk.f32.mxu0 %vm842_vm1, %v12190_v49  ;;  %v12213_v31 = vpop.permute.xlu1 %5346 }
 0x337   : > { %v4514_v37 = vmul.f32 %v12031_v47, %v12192_v25  ;;  %v4515_v52 = vmul.f32 %v11909_v51, %v12194_v58  ;;  %v4113_v11 = vpop.f32.mrf.mxu1  ;;  %9914 = vmatmul.mubr.msk.f32.gmra.mxu0 %vm842_vm1, %v12201_v12  ;;  %13969 = vst [vmem:[#allocation78_spill] sm:$0xff] %v12213_v31  ;;  %v12220_v51 = vpop.permute.xlu0 %4475 }
 0x338   : > { %4263 = vst.msk [vmem:[#allocation2 + $0xc0] sm:$0xff] %vm842_vm1, %v4193_v53  ;;  %v4192_v6 = vadd.f32 %v4113_v11, %v3760_v50  ;;  %13971 = vst [vmem:[#allocation80_spill] sm:$0xff] %v12220_v51  ;;  %v12229_v53 = vld [vmem:[#allocation2 + $0xa0] sm:$0xff] }
 0x339   : > { %9965 = vmatprep.mubr.msk.f32.mxu1 %vm842_vm1, %v4514_v37  ;;  %v9872_v26 = vpop.f32.mrf.mxu1  ;;  %v12216_v14 = vld [vmem:[#allocation2 + $0x98] sm:$0xff]  ;;  %13972 = vst [vmem:[#allocation81_spill] sm:$0xff] %v12229_v53 }
 0x33a   : > { %9966 = vmatmul.mubr.msk.f32.gmra.mxu1 %vm842_vm1, %v4515_v52  ;;  %13970 = vst [vmem:[#allocation79_spill] sm:$0xff] %v12216_v14  ;;  %v12218_v49 = vld [vmem:[#allocation2 + $0x97] sm:$0xff]  ;;  %v12222_v12 = vld [vmem:[#allocation2 + $0x9f] sm:$0xff]  ;;  %4262 = vst.msk [vmem:[#allocation2 + $0xb8] sm:$0xff] %vm842_vm1, %v4192_v6  ;;  %v4195_v50 = vadd.f32 %v9872_v26, %v3775_v60  ;;  %9916 = vmatprep.mubr.msk.f32.mxu0 %vm842_vm1, %v12216_v14 }
 0x33b   : > { %v4516_v37 = vmul.f32 %v11932_v2, %v12218_v49  ;;  %v4517_v52 = vmul.f32 %v12061_v18, %v12222_v12  ;;  %v4123_v11 = vpop.f32.mrf.mxu1  ;;  %9917 = vmatmul.mubr.msk.f32.gmra.mxu0 %vm842_vm1, %v12229_v53  ;;  %v3780_v53 = vadd.f32 %v11971_v19, %v11950_v28  ;;  %v12263_v28 = vpop.permute.xlu0 %4480 }
 0x33c   : > { %4265 = vst.msk [vmem:[#allocation2 + $0xd0] sm:$0xff] %vm842_vm1, %v4195_v50  ;;  %v4194_v60 = vadd.f32 %v4123_v11, %v3770_v39  ;;  %v12253_v39 = vpop.permute.xlu1 %5350  ;;  %v12255_v50 = vld [vmem:[#allocation2 + $0xb0] sm:$0xff]  ;;  %13976 = vst [vmem:[#allocation85_spill] sm:$0xff] %v12263_v28 }
 0x33d   : > { %9968 = vmatprep.mubr.msk.f32.mxu1 %vm842_vm1, %v4516_v37  ;;  %v9875_v6 = vpop.f32.mrf.mxu1  ;;  %v12242_v26 = vld [vmem:[#allocation2 + $0xa8] sm:$0xff]  ;;  %13974 = vst [vmem:[#allocation83_spill] sm:$0xff] %v12253_v39  ;;  %13975 = vst [vmem:[#allocation84_spill] sm:$0xff] %v12255_v50 }
 0x33e   : > { %9969 = vmatmul.mubr.msk.f32.gmra.mxu1 %vm842_vm1, %v4517_v52  ;;  %13973 = vst [vmem:[#allocation82_spill] sm:$0xff] %v12242_v26  ;;  %v12244_v14 = vld [vmem:[#allocation2 + $0xa7] sm:$0xff]  ;;  %v12246_v31 = vld [vmem:[#allocation2 + $0xaf] sm:$0xff]  ;;  %4264 = vst.msk [vmem:[#allocation2 + $0xc8] sm:$0xff] %vm842_vm1, %v4194_v60  ;;  %v4197_v35 = vadd.f32 %v9875_v6, %v3785_v57  ;;  %9919 = vmatprep.mubr.msk.f32.mxu0 %vm842_vm1, %v12242_v26  ;;  %v3795_v57 = vadd.f32 %v11952_v36, %v11971_v19 }
 0x33f   : > { %v4518_v37 = vmul.f32 %v12108_v34, %v12244_v14  ;;  %v4519_v52 = vmul.f32 %v11964_v7, %v12246_v31  ;;  %v4133_v11 = vpop.f32.mrf.mxu1  ;;  %9920 = vmatmul.mubr.msk.f32.gmra.mxu0 %vm842_vm1, %v12255_v50  ;;  %v3790_v50 = vadd.f32 %v11971_v19, %v11958_v21  ;;  %v3805_v21 = vadd.f32 %v11960_v56, %v11971_v19 }
 0x340   : > { %4267 = vst.msk [vmem:[#allocation2 + $0xe0] sm:$0xff] %vm842_vm1, %v4197_v35  ;;  %v4196_v60 = vadd.f32 %v4133_v11, %v3780_v53  ;;  %v12281_v53 = vld [vmem:[#allocation2 + $0xc0] sm:$0xff]  ;;  %v12292_v11 = vpop.permute.xlu1 %4485 }
 0x341   : > { %9971 = vmatprep.mubr.msk.f32.mxu1 %vm842_vm1, %v4518_v37  ;;  %v9878_v6 = vpop.f32.mrf.mxu1  ;;  %v12270_v26 = vld [vmem:[#allocation2 + $0xb8] sm:$0xff]  ;;  %13978 = vst [vmem:[#allocation87_spill] sm:$0xff] %v12281_v53  ;;  %13979 = vst [vmem:[#allocation88_spill] sm:$0xff] %v12292_v11 }
 0x342   : > { %9972 = vmatmul.mubr.msk.f32.gmra.mxu1 %vm842_vm1, %v4519_v52  ;;  %13977 = vst [vmem:[#allocation86_spill] sm:$0xff] %v12270_v26  ;;  %v12272_v39 = vld [vmem:[#allocation2 + $0xb7] sm:$0xff]  ;;  %v12274_v7 = vld [vmem:[#allocation2 + $0xbf] sm:$0xff]  ;;  %4266 = vst.msk [vmem:[#allocation2 + $0xd8] sm:$0xff] %vm842_vm1, %v4196_v60  ;;  %v4199_v36 = vadd.f32 %v9878_v6, %v3795_v57  ;;  %9922 = vmatprep.mubr.msk.f32.mxu0 %vm842_vm1, %v12270_v26  ;;  %v12295_v60 = vpop.permute.xlu0 %5338 }
 0x343   : > { %v4520_v35 = vmul.f32 %v11996_v8, %v12272_v39  ;;  %v4521_v37 = vmul.f32 %v12146_v54, %v12274_v7  ;;  %v4143_v52 = vpop.f32.mrf.mxu1  ;;  %9923 = vmatmul.mubr.msk.f32.gmra.mxu0 %vm842_vm1, %v12281_v53  ;;  %13980 = vst [vmem:[#allocation89_spill] sm:$0xff] %v12295_v60  ;;  %v3800_v53 = vadd.f32 %v11971_v19, %v11962_v15 }
 0x344   : > { %4269 = vst.msk [vmem:[#allocation2 + $0xf0] sm:$0xff] %vm842_vm1, %v4199_v36  ;;  %v4198_v57 = vadd.f32 %v4143_v52, %v3790_v50  ;;  %v12307_v50 = vld [vmem:[#allocation2 + $0xd0] sm:$0xff]  ;;  %v3815_v52 = vadd.f32 %v11973_v43, %v11971_v19 }
 0x345   : > { %9974 = vmatprep.mubr.msk.f32.mxu1 %vm842_vm1, %v4520_v35  ;;  %v9881_v6 = vpop.f32.mrf.mxu1  ;;  %v12298_v26 = vld [vmem:[#allocation2 + $0xc8] sm:$0xff]  ;;  %13982 = vst [vmem:[#allocation91_spill] sm:$0xff] %v12307_v50 }
 0x346   : > { %9975 = vmatmul.mubr.msk.f32.gmra.mxu1 %vm842_vm1, %v4521_v37  ;;  %13981 = vst [vmem:[#allocation90_spill] sm:$0xff] %v12298_v26  ;;  %v12300_v54 = vld [vmem:[#allocation2 + $0xc7] sm:$0xff]  ;;  %4268 = vst.msk [vmem:[#allocation2 + $0xe8] sm:$0xff] %vm842_vm1, %v4198_v57  ;;  %v4201_v56 = vadd.f32 %v9881_v6, %v3805_v21  ;;  %9925 = vmatprep.mubr.msk.f32.mxu0 %vm842_vm1, %v12298_v26  ;;  %v12311_v35 = vld [vmem:[#allocation2 + $0xcf] sm:$0xff] }
 0x347   : > { %v4522_v36 = vmul.f32 %v12183_v27, %v12300_v54  ;;  %v4153_v37 = vpop.f32.mrf.mxu1  ;;  %9926 = vmatmul.mubr.msk.f32.gmra.mxu0 %vm842_vm1, %v12307_v50  ;;  %v4523_v15 = vmul.f32 %v12106_v46, %v12311_v35  ;;  %v12326_v27 = vpop.permute.xlu0 %5354  ;;  %v3810_v50 = vadd.f32 %v11971_v19, %v11977_v0 }
 0x348   : > { %4271 = vst.msk [vmem:[#allocation2 + $0x100] sm:$0xff] %vm842_vm1, %v4201_v56  ;;  %v4200_v21 = vadd.f32 %v4153_v37, %v3800_v53  ;;  %13984 = vst [vmem:[#allocation93_spill] sm:$0xff] %v12326_v27  ;;  %v12330_v46 = vpop.permute.xlu1 %5358  ;;  %v12335_v53 = vld [vmem:[#allocation2 + $0xe0] sm:$0xff]  ;;  %v9891_v19 = vpop.f32.mrf.mxu0 }
 0x349   : > { %9977 = vmatprep.mubr.msk.f32.mxu1 %vm842_vm1, %v4522_v36  ;;  %v9884_v57 = vpop.f32.mrf.mxu1  ;;  %v12322_v6 = vld [vmem:[#allocation2 + $0xd8] sm:$0xff]  ;;  %13985 = vst [vmem:[#allocation94_spill] sm:$0xff] %v12330_v46  ;;  %13986 = vst [vmem:[#allocation95_spill] sm:$0xff] %v12335_v53 }
 0x34a   : > { %9978 = vmatmul.mubr.msk.f32.gmra.mxu1 %vm842_vm1, %v4523_v15  ;;  %13983 = vst [vmem:[#allocation92_spill] sm:$0xff] %v12322_v6  ;;  %v12324_v26 = vld [vmem:[#allocation2 + $0xd7] sm:$0xff]  ;;  %4270 = vst.msk [vmem:[#allocation2 + $0xf8] sm:$0xff] %vm842_vm1, %v4200_v21  ;;  %v4203_v43 = vadd.f32 %v9884_v57, %v3815_v52  ;;  %9928 = vmatprep.mubr.msk.f32.mxu0 %vm842_vm1, %v12322_v6  ;;  %v12339_v36 = vld [vmem:[#allocation2 + $0xdf] sm:$0xff] }
 0x34b   : > { %v4524_v56 = vmul.f32 %v12179_v42, %v12324_v26  ;;  %v4163_v37 = vpop.f32.mrf.mxu1  ;;  %9929 = vmatmul.mubr.msk.f32.gmra.mxu0 %vm842_vm1, %v12335_v53  ;;  %v4525_v0 = vmul.f32 %v12220_v51, %v12339_v36  ;;  %v12357_v53 = vld [vmem:[#allocation2 + $0xf0] sm:$0xff] }
 0x34c   : > { %4273 = vst.msk [vmem:[#allocation2 + $0x110] sm:$0xff] %vm842_vm1, %v4203_v43  ;;  %v4202_v15 = vadd.f32 %v4163_v37, %v3810_v50  ;;  %13989 = vst [vmem:[#allocation98_spill] sm:$0xff] %v12357_v53 }
 0x34d   : > { %9980 = vmatprep.mubr.msk.f32.mxu1 %vm842_vm1, %v4524_v56  ;;  %v9943_v52 = vpop.f32.mrf.mxu1  ;;  %v12348_v21 = vld [vmem:[#allocation2 + $0xe8] sm:$0xff]  ;;  %v12365_v56 = vpop.permute.xlu0 %4495 }
 0x34e   : > { %9981 = vmatmul.mubr.msk.f32.gmra.mxu1 %vm842_vm1, %v4525_v0  ;;  %13987 = vst [vmem:[#allocation96_spill] sm:$0xff] %v12348_v21  ;;  %v12350_v57 = vld [vmem:[#allocation2 + $0xe7] sm:$0xff]  ;;  %4272 = vst.msk [vmem:[#allocation2 + $0x108] sm:$0xff] %vm842_vm1, %v4202_v15  ;;  %v12353_v6 = vadd.f32 %v9943_v52, %v9891_v19  ;;  %9931 = vmatprep.mubr.msk.f32.mxu0 %vm842_vm1, %v12348_v21  ;;  %v12361_v43 = vld [vmem:[#allocation2 + $0xef] sm:$0xff]  ;;  %v12370_v0 = vpop.permute.xlu1 %4490 }
 0x34f   : > { %v4526_v50 = vmul.f32 %v12263_v28, %v12350_v57  ;;  %9932 = vmatmul.mubr.msk.f32.gmra.mxu0 %vm842_vm1, %v12357_v53  ;;  %13990 = vst [vmem:[#allocation99_spill] sm:$0xff] %v12365_v56  ;;  %v4527_v37 = vmul.f32 %v12292_v11, %v12361_v43  ;;  %v5209_v19 = vld [vmem:[#allocation2 + $0x9] sm:$0xff]  ;;  %13991 = vst [vmem:[#allocation100_spill] sm:$0xff] %v12370_v0  ;;  %v5210_v28 = vld [vmem:[#allocation2 + $0x11] sm:$0xff] }
 0x350   : > { %13988 = vst [vmem:[#allocation97_spill] sm:$0xff] %v12353_v6  ;;  %v13995_v11 = vld [vmem:[#allocation10_spill] sm:$0xff] }
 0x351   : > { %9983 = vmatprep.mubr.msk.f32.mxu1 %vm842_vm1, %v4526_v50  ;;  %v12372_v15 = vld [vmem:[#allocation2 + $0xf7] sm:$0xff]  ;;  %v12374_v52 = vld [vmem:[#allocation2 + $0xff] sm:$0xff]  ;;  %v5369_v46 = vmul.f32 %v13995_v11, %v5209_v19 }
 0x352   : > { %13992 = vst [vmem:[#allocation101_spill] sm:$0xff] %v12372_v15  ;;  %13993 = vst [vmem:[#allocation102_spill] sm:$0xff] %v12374_v52  ;;  %9984 = vmatmul.mubr.msk.f32.gmra.mxu1 %vm842_vm1, %v4527_v37  ;;  %v4528_v6 = vmul.f32 %v12370_v0, %v12372_v15  ;;  %v4529_v53 = vmul.f32 %v12365_v56, %v12374_v52  ;;  %v12381_v21 = vld [vmem:[#allocation2 + $0xf8] sm:$0xff]  ;;  %v12386_v50 = vld [vmem:[#allocation2 + $0x100] sm:$0xff] }
 0x353   : > { %13994 = vst [vmem:[#allocation103_spill] sm:$0xff] %v12381_v21  ;;  %9934 = vmatprep.mubr.msk.f32.mxu0 %vm842_vm1, %v12381_v21  ;;  %13996 = vst [vmem:[#allocation104_spill] sm:$0xff] %v12386_v50  ;;  %v13997_v37 = vld [vmem:[#allocation19_spill] sm:$0xff]  ;;  %v13998_v19 = vld [vmem:[#allocation16_spill] sm:$0xff] }
 0x354   : > { %9935 = vmatmul.mubr.msk.f32.gmra.mxu0 %vm842_vm1, %v12386_v50  ;;  %9986 = vmatprep.mubr.msk.f32.mxu1 %vm842_vm1, %v4528_v6  ;;  %v5789_v0 = vmul.f32 %v13997_v37, %v12015_v55  ;;  %v12393_v15 = vld [vmem:[#allocation2 + $0x19] sm:$0xff]  ;;  %v5370_v21 = vmul.f32 %v13998_v19, %v5210_v28  ;;  %v12401_v52 = vld [vmem:[#allocation2 + $0x21] sm:$0xff]  ;;  %v14000_v55 = vld [vmem:[#allocation14_spill] sm:$0xff]  ;;  %v5791_v28 = vmul.f32 %v11737_v48, %v12041_v45 }
 0x355   : > { %9993 = vmatprep.mubr.msk.f32.mxu0 %vm842_vm1, %v5369_v46  ;;  %v13999_v11 = vld [vmem:[#allocation20_spill] sm:$0xff]  ;;  %v5790_v46 = vmul.f32 %v14000_v55, %v12017_v3  ;;  %v12409_v37 = vld [vmem:[#allocation2 + $0x29] sm:$0xff]  ;;  %v14003_v3 = vld [vmem:[#allocation11_spill] sm:$0xff] }
 0x356   : > { %9987 = vmatmul.mubr.msk.f32.gmra.mxu1 %vm842_vm1, %v4529_v53  ;;  %v5371_v56 = vmul.f32 %v13999_v11, %v12393_v15  ;;  %v8808_v6 = vld [vmem:[%s13894_s2 + $0x40] sm:$0xff]  ;;  %v14001_v53 = vld [vmem:[#allocation34_spill] sm:$0xff] }
 0x357   : > { %10045 = vmatprep.mubr.msk.f32.mxu1 %vm842_vm1, %v5789_v0  ;;  %v14002_v0 = vld [vmem:[#allocation21_spill] sm:$0xff]  ;;  %v8842_v45 = vld [vmem:[%s13894_s2 + $0x50] sm:$0xff]  ;;  %v12434_v48 = vld [vmem:[#allocation2 + $0x39] sm:$0xff] }
 0x358   : > { %9994 = vmatmul.mubr.msk.f32.vlgmr.msra.gmra.mxu0 %vm842_vm1, %v5370_v21  ;;  %v5372_v50 = vmul.f32 %v14002_v0, %v12401_v52  ;;  %v12421_v21 = vld [vmem:[%s13894_s2 + $0x68] sm:$0xff] }
 0x359   : > { %10094 = vmatpush3.msra.mxu0 %v14001_v53  ;;  %9996 = vmatprep.mubr.msk.f32.mxu0 %vm842_vm1, %v5371_v56  ;;  %v5373_v53 = vmul.f32 %v14003_v3, %v12409_v37  ;;  %v12426_v56 = vld [vmem:[#allocation2 + $0x31] sm:$0xff] }
 0x35a   : > { %10046 = vmatmul.mubr.msk.f32.vlgmr.msra.gmra.mxu1 %vm842_vm1, %v5790_v46  ;;  %10095 = vmatprep.subr.mxu0 %v8808_v6  ;;  %v5792_v46 = vmul.f32 %v11922_v44, %v12043_v17  ;;  %v14004_v17 = vld [vmem:[#allocation23_spill] sm:$0xff]  ;;  %v12452_v44 = vld [vmem:[#allocation2 + $0x41] sm:$0xff] }
 0x35b   : > { %10048 = vmatprep.mubr.msk.f32.mxu1 %vm842_vm1, %v5791_v28  ;;  %10096 = vmatpush3.msra.mxu0 %v8808_v6  ;;  %v5793_v28 = vmul.f32 %v11934_v59, %v12068_v40  ;;  %v12444_v6 = vld [vmem:[%s13894_s2 + $0x78] sm:$0xff]  ;;  %v5794_v40 = vmul.f32 %v11768_v61, %v12070_v30  ;;  %v12457_v59 = vld [vmem:[#allocation2 + $0x49] sm:$0xff] }
 0x35c   : > { %9997 = vmatmul.mubr.msk.f32.gmra.mxu0 %vm842_vm1, %v5372_v50  ;;  %10146 = vmatpush3.msra.mxu1 %v12003_v32  ;;  %v5374_v50 = vmul.f32 %v14004_v17, %v12426_v56  ;;  %v14005_v32 = vld [vmem:[#allocation25_spill] sm:$0xff]  ;;  %v12469_v30 = vld [vmem:[#allocation2 + $0x51] sm:$0xff]  ;;  %v12474_v61 = vld [vmem:[#allocation2 + $0x59] sm:$0xff] }
 0x35d   : > { %9999 = vmatprep.mubr.msk.f32.mxu0 %vm842_vm1, %v5373_v53  ;;  %10197 = vmatprep.subr.mxu0 %v12421_v21  ;;  %v5375_v53 = vmul.f32 %v14005_v32, %v12434_v48 }
 0x35e   : > { %10049 = vmatmul.mubr.msk.f32.gmra.mxu1 %vm842_vm1, %v5792_v46  ;;  %10147 = vmatprep.subr.mxu1 %v8842_v45  ;;  %v5795_v46 = vmul.f32 %v11775_v9, %v12092_v41  ;;  %v5797_v41 = vmul.f32 %v11956_v33, %v12118_v1  ;;  %v14009_v9 = vld [vmem:[#allocation30_spill] sm:$0xff]  ;;  %v5799_v1 = vmul.f32 %v13956_v29, %v12142_v16  ;;  %v14011_v33 = vld [vmem:[#allocation13_spill] sm:$0xff] }
 0x35f   : > { %10051 = vmatprep.mubr.msk.f32.mxu1 %vm842_vm1, %v5793_v28  ;;  %10148 = vmatpush3.msra.mxu1 %v8842_v45  ;;  %v14006_v28 = vld [vmem:[#allocation26_spill] sm:$0xff]  ;;  %v14007_v45 = vld [vmem:[#allocation12_spill] sm:$0xff]  ;;  %v5801_v16 = vmul.f32 %v11985_v13, %v12165_v4  ;;  %v14013_v4 = vld [vmem:[#allocation35_spill] sm:$0xff] }
 0x360   : > { %10000 = vmatmul.mubr.msk.f32.gmra.mxu0 %vm842_vm1, %v5374_v50  ;;  %10249 = vmatprep.subr.mxu1 %v12444_v6  ;;  %v5376_v55 = vmul.f32 %v14006_v28, %v12452_v44  ;;  %v5377_v50 = vmul.f32 %v14007_v45, %v12457_v59  ;;  %v12485_v45 = vld [vmem:[#allocation2 + $0x61] sm:$0xff] }
 0x361   : > { %10002 = vmatprep.mubr.msk.f32.mxu0 %vm842_vm1, %v5375_v53  ;;  %v5796_v53 = vmul.f32 %v11946_v23, %v12094_v63  ;;  %v5798_v63 = vmul.f32 %v11785_v24, %v12120_v20  ;;  %v12501_v23 = vld [vmem:[#allocation2 + $0x71] sm:$0xff]  ;;  %v5800_v20 = vmul.f32 %v11966_v5, %v12144_v22  ;;  %v12517_v29 = vld [vmem:[#allocation2 + $0x81] sm:$0xff]  ;;  %v5802_v22 = vmul.f32 %v13961_v10, %v12167_v38  ;;  %v12538_v10 = vld [vmem:[#allocation2 + $0x99] sm:$0xff] }
 0x362   : > { %10052 = vmatmul.mubr.msk.f32.gmra.mxu1 %vm842_vm1, %v5794_v40  ;;  %v14008_v40 = vld [vmem:[#allocation28_spill] sm:$0xff]  ;;  %v14015_v5 = vld [vmem:[#allocation15_spill] sm:$0xff] }
 0x363   : > { %10054 = vmatprep.mubr.msk.f32.mxu1 %vm842_vm1, %v5795_v46  ;;  %v5378_v46 = vmul.f32 %v14008_v40, %v12469_v30  ;;  %v12533_v24 = vld [vmem:[#allocation2 + $0x91] sm:$0xff] }
 0x364   : > { %10003 = vmatmul.mubr.msk.f32.gmra.mxu0 %vm842_vm1, %v5376_v55  ;;  %v5379_v55 = vmul.f32 %v14009_v9, %v12474_v61  ;;  %v14016_v38 = vld [vmem:[#allocation51_spill] sm:$0xff] }
 0x365   : > { %10005 = vmatprep.mubr.msk.f32.mxu0 %vm842_vm1, %v5377_v50  ;;  %v12490_v50 = vld [vmem:[#allocation2 + $0x69] sm:$0xff] }
 0x366   : > { %10055 = vmatmul.mubr.msk.f32.gmra.mxu1 %vm842_vm1, %v5796_v53  ;;  %v14010_v53 = vld [vmem:[#allocation31_spill] sm:$0xff] }
 0x367   : > { %10057 = vmatprep.mubr.msk.f32.mxu1 %vm842_vm1, %v5797_v41  ;;  %v5380_v41 = vmul.f32 %v14010_v53, %v12485_v45 }
 0x368   : > { %10006 = vmatmul.mubr.msk.f32.gmra.mxu0 %vm842_vm1, %v5378_v46  ;;  %v5381_v46 = vmul.f32 %v14011_v33, %v12490_v50 }
 0x369   : > { %10008 = vmatprep.mubr.msk.f32.mxu0 %vm842_vm1, %v5379_v55  ;;  %v12506_v55 = vld [vmem:[#allocation2 + $0x79] sm:$0xff] }
 0x36a   : > { %10058 = vmatmul.mubr.msk.f32.gmra.mxu1 %vm842_vm1, %v5798_v63  ;;  %v14012_v63 = vld [vmem:[#allocation33_spill] sm:$0xff] }
 0x36b   : > { %10060 = vmatprep.mubr.msk.f32.mxu1 %vm842_vm1, %v5799_v1  ;;  %v5382_v1 = vmul.f32 %v14012_v63, %v12501_v23 }
 0x36c   : > { %10009 = vmatmul.mubr.msk.f32.gmra.mxu0 %vm842_vm1, %v5380_v41  ;;  %v5383_v41 = vmul.f32 %v11872_v62, %v12506_v55 }
 0x36d   : > { %10011 = vmatprep.mubr.msk.f32.mxu0 %vm842_vm1, %v5381_v46  ;;  %v12522_v46 = vld [vmem:[#allocation2 + $0x89] sm:$0xff] }
 0x36e   : > { %10061 = vmatmul.mubr.msk.f32.gmra.mxu1 %vm842_vm1, %v5800_v20  ;;  %v5803_v20 = vmul.f32 %v14013_v4, %v12192_v25  ;;  %v5805_v25 = vmul.f32 %v12031_v47, %v12218_v49  ;;  %v14018_v4 = vld [vmem:[#allocation42_spill] sm:$0xff]  ;;  %v5807_v49 = vmul.f32 %v11932_v2, %v12244_v14  ;;  %v14021_v47 = vld [vmem:[#allocation17_spill] sm:$0xff]  ;;  %v5809_v14 = vmul.f32 %v12108_v34, %v12272_v39 }
 0x36f   : > { %10063 = vmatprep.mubr.msk.f32.mxu1 %vm842_vm1, %v5801_v16  ;;  %v14014_v16 = vld [vmem:[#allocation36_spill] sm:$0xff]  ;;  %v14023_v2 = vld [vmem:[#allocation54_spill] sm:$0xff]  ;;  %v5811_v39 = vmul.f32 %v11996_v8, %v12300_v54 }
 0x370   : > { %10012 = vmatmul.mubr.msk.f32.gmra.mxu0 %vm842_vm1, %v5382_v1  ;;  %v5384_v13 = vmul.f32 %v14014_v16, %v12517_v29  ;;  %v5385_v1 = vmul.f32 %v14015_v5, %v12522_v46  ;;  %v12549_v5 = vld [vmem:[#allocation2 + $0xa1] sm:$0xff] }
 0x371   : > { %10014 = vmatprep.mubr.msk.f32.mxu0 %vm842_vm1, %v5383_v41  ;;  %v5804_v41 = vmul.f32 %v14016_v38, %v12194_v58  ;;  %v14019_v58 = vld [vmem:[#allocation37_spill] sm:$0xff]  ;;  %v14028_v8 = vld [vmem:[#allocation68_spill] sm:$0xff] }
 0x372   : > { %10064 = vmatmul.mubr.msk.f32.gmra.mxu1 %vm842_vm1, %v5802_v22  ;;  %v14017_v22 = vld [vmem:[#allocation38_spill] sm:$0xff] }
 0x373   : > { %10066 = vmatprep.mubr.msk.f32.mxu1 %vm842_vm1, %v5803_v20  ;;  %v5386_v20 = vmul.f32 %v14017_v22, %v12533_v24  ;;  %v12554_v38 = vld [vmem:[#allocation2 + $0xa9] sm:$0xff] }
 0x374   : > { %10015 = vmatmul.mubr.msk.f32.gmra.mxu0 %vm842_vm1, %v5384_v13  ;;  %v5387_v13 = vmul.f32 %v14018_v4, %v12538_v10  ;;  %v12565_v4 = vld [vmem:[#allocation2 + $0xb1] sm:$0xff] }
 0x375   : > { %10017 = vmatprep.mubr.msk.f32.mxu0 %vm842_vm1, %v5385_v1  ;;  %v5806_v1 = vmul.f32 %v14019_v58, %v12222_v12  ;;  %v5808_v12 = vmul.f32 %v12061_v18, %v12246_v31  ;;  %v12581_v58 = vld [vmem:[#allocation2 + $0xc1] sm:$0xff]  ;;  %v12583_v31 = vld [vmem:[#allocation2 + $0xc9] sm:$0xff] }
 0x376   : > { %10067 = vmatmul.mubr.msk.f32.gmra.mxu1 %vm842_vm1, %v5804_v41  ;;  %v14020_v41 = vld [vmem:[#allocation44_spill] sm:$0xff]  ;;  %v5393_v34 = vmul.f32 %v12295_v60, %v12583_v31 }
 0x377   : > { %10069 = vmatprep.mubr.msk.f32.mxu1 %vm842_vm1, %v5805_v25  ;;  %v5388_v25 = vmul.f32 %v14020_v41, %v12549_v5 }
 0x378   : > { %10018 = vmatmul.mubr.msk.f32.gmra.mxu0 %vm842_vm1, %v5386_v20  ;;  %v5389_v20 = vmul.f32 %v14021_v47, %v12554_v38 }
 0x379   : > { %10020 = vmatprep.mubr.msk.f32.mxu0 %vm842_vm1, %v5387_v13  ;;  %v12570_v13 = vld [vmem:[#allocation2 + $0xb9] sm:$0xff] }
 0x37a   : > { %10070 = vmatmul.mubr.msk.f32.gmra.mxu1 %vm842_vm1, %v5806_v1  ;;  %v14022_v1 = vld [vmem:[#allocation48_spill] sm:$0xff] }
 0x37b   : > { %10072 = vmatprep.mubr.msk.f32.mxu1 %vm842_vm1, %v5807_v49  ;;  %v5390_v49 = vmul.f32 %v14022_v1, %v12565_v4 }
 0x37c   : > { %10021 = vmatmul.mubr.msk.f32.gmra.mxu0 %vm842_vm1, %v5388_v25  ;;  %v5391_v25 = vmul.f32 %v14023_v2, %v12570_v13  ;;  %v12597_v2 = vld [vmem:[#allocation2 + $0xd1] sm:$0xff] }
 0x37d   : > { %10023 = vmatprep.mubr.msk.f32.mxu0 %vm842_vm1, %v5389_v20  ;;  %v14024_v20 = vld [vmem:[#allocation46_spill] sm:$0xff] }
 0x37e   : > { %10073 = vmatmul.mubr.msk.f32.gmra.mxu1 %vm842_vm1, %v5808_v12  ;;  %v5810_v18 = vmul.f32 %v14024_v20, %v12274_v7  ;;  %v14025_v12 = vld [vmem:[#allocation58_spill] sm:$0xff]  ;;  %v5394_v20 = vmul.f32 %v14028_v8, %v12597_v2 }
 0x37f   : > { %10075 = vmatprep.mubr.msk.f32.mxu1 %vm842_vm1, %v5809_v14  ;;  %v5392_v14 = vmul.f32 %v14025_v12, %v12581_v58  ;;  %v14026_v7 = vld [vmem:[#allocation70_spill] sm:$0xff]  ;;  %v12613_v12 = vld [vmem:[#allocation2 + $0xe1] sm:$0xff] }
 0x380   : > { %10024 = vmatmul.mubr.msk.f32.gmra.mxu0 %vm842_vm1, %v5390_v49  ;;  %v12599_v49 = vld [vmem:[#allocation2 + $0xd9] sm:$0xff] }
 0x381   : > { %10026 = vmatprep.mubr.msk.f32.mxu0 %vm842_vm1, %v5391_v25  ;;  %v5812_v25 = vmul.f32 %v14026_v7, %v12311_v35  ;;  %v12628_v7 = vpop.permute.xlu1 %5362 }
 0x382   : > { %10076 = vmatmul.mubr.msk.f32.gmra.mxu1 %vm842_vm1, %v5810_v18  ;;  %v14027_v18 = vld [vmem:[#allocation75_spill] sm:$0xff]  ;;  %14033 = vst [vmem:[#allocation20_spill] sm:$0xff] %v12628_v7 }
 0x383   : > { %10078 = vmatprep.mubr.msk.f32.mxu1 %vm842_vm1, %v5811_v39  ;;  %v5813_v54 = vmul.f32 %v14027_v18, %v12324_v26  ;;  %v14029_v39 = vld [vmem:[#allocation78_spill] sm:$0xff]  ;;  %v5815_v26 = vmul.f32 %v12179_v42, %v12350_v57  ;;  %v14034_v57 = vld [vmem:[#allocation101_spill] sm:$0xff] }
 0x384   : > { %10027 = vmatmul.mubr.msk.f32.gmra.mxu0 %vm842_vm1, %v5392_v14  ;;  %v5395_v60 = vmul.f32 %v12599_v49, %v14029_v39  ;;  %v12615_v14 = vld [vmem:[#allocation2 + $0xe9] sm:$0xff] }
 0x385   : > { %10029 = vmatprep.mubr.msk.f32.mxu0 %vm842_vm1, %v5393_v34  ;;  %14030 = vst [vmem:[#allocation16_spill] sm:$0xff] %v12615_v14  ;;  %v14031_v34 = vld [vmem:[#allocation64_spill] sm:$0xff]  ;;  %v5397_v18 = vmul.f32 %v12615_v14, %v12326_v27 }
 0x386   : > { %10079 = vmatmul.mubr.msk.f32.gmra.mxu1 %vm842_vm1, %v5812_v25  ;;  %v5814_v35 = vmul.f32 %v14031_v34, %v12339_v36  ;;  %v14032_v25 = vld [vmem:[#allocation83_spill] sm:$0xff]  ;;  %v14036_v34 = vld [vmem:[#allocation94_spill] sm:$0xff]  ;;  %v12648_v14 = vld [vmem:[#allocation2 + $0x101] sm:$0xff] }
 0x387   : > { %10081 = vmatprep.mubr.msk.f32.mxu1 %vm842_vm1, %v5813_v54  ;;  %v5396_v54 = vmul.f32 %v14032_v25, %v12613_v12  ;;  %v12633_v36 = vld [vmem:[#allocation2 + $0xf9] sm:$0xff] }
 0x388   : > { %10030 = vmatmul.mubr.msk.f32.gmra.mxu0 %vm842_vm1, %v5394_v20  ;;  %v12631_v20 = vld [vmem:[#allocation2 + $0xf1] sm:$0xff]  ;;  %v5399_v25 = vmul.f32 %v12633_v36, %v12628_v7 }
 0x389   : > { %10032 = vmatprep.mubr.msk.f32.mxu0 %vm842_vm1, %v5395_v60  ;;  %v5816_v60 = vmul.f32 %v12220_v51, %v12361_v43  ;;  %v5398_v27 = vmul.f32 %v14036_v34, %v12631_v20  ;;  %v14037_v43 = vld [vmem:[#allocation102_spill] sm:$0xff] }
 0x38a   : > { %10082 = vmatmul.mubr.msk.f32.gmra.mxu1 %vm842_vm1, %v5814_v35  ;;  %v14035_v35 = vld [vmem:[#allocation85_spill] sm:$0xff] }
 0x38b   : > { %10084 = vmatprep.mubr.msk.f32.mxu1 %vm842_vm1, %v5815_v26  ;;  %v5817_v42 = vmul.f32 %v14035_v35, %v14034_v57  ;;  %v12644_v26 = vld [vmem:[#allocation2 + $0x107] sm:$0xff]  ;;  %v5788_v57 = vld [vmem:[#allocation2 + $0x10f] sm:$0xff]  ;;  %v12654_v35 = vpop.permute.xlu1 %5366 }
 0x38c   : > { %10033 = vmatmul.mubr.msk.f32.gmra.mxu0 %vm842_vm1, %v5396_v54  ;;  %14039 = vst [vmem:[#allocation34_spill] sm:$0xff] %v12654_v35  ;;  %v5400_v7 = vmul.f32 %v12654_v35, %v12648_v14 }
 0x38d   : > { %10035 = vmatprep.mubr.msk.f32.mxu0 %vm842_vm1, %v5397_v18  ;;  %v14038_v18 = vld [vmem:[#allocation88_spill] sm:$0xff] }
 0x38e   : > { %10085 = vmatmul.mubr.msk.f32.gmra.mxu1 %vm842_vm1, %v5816_v60  ;;  %v5818_v54 = vmul.f32 %v14038_v18, %v14037_v43  ;;  %v14040_v60 = vld [vmem:[#allocation100_spill] sm:$0xff]  ;;  %v14043_v18 = vld [vmem:[#allocation10_spill] sm:$0xff] }
 0x38f   : > { %10087 = vmatprep.mubr.msk.f32.mxu1 %vm842_vm1, %v5817_v42  ;;  %v5819_v51 = vmul.f32 %v12644_v26, %v14040_v60  ;;  %v14041_v42 = vld [vmem:[#allocation99_spill] sm:$0xff]  ;;  %v14042_v43 = vld [vmem:[#allocation52_spill] sm:$0xff]  ;;  %v14044_v60 = vld [vmem:[#allocation53_spill] sm:$0xff] }
 0x390   : > { %10036 = vmatmul.mubr.msk.f32.gmra.mxu0 %vm842_vm1, %v5398_v27  ;;  %v5820_v27 = vmul.f32 %v5788_v57, %v14041_v42  ;;  %v12687_v57 = vld [vmem:[%s13894_s2 + $0x88] sm:$0xff] }
 0x391   : > { %10038 = vmatprep.mubr.msk.f32.mxu0 %vm842_vm1, %v5399_v25  ;;  %v6597_v25 = vmul.f32 %v14043_v18, %v12393_v15  ;;  %v6599_v15 = vmul.f32 %v13999_v11, %v12409_v37  ;;  %v6600_v37 = vmul.f32 %v14002_v0, %v12426_v56  ;;  %v6602_v56 = vmul.f32 %v14004_v17, %v12452_v44  ;;  %v14052_v44 = vld [vmem:[#allocation12_spill] sm:$0xff] }
 0x392   : > { %10088 = vmatmul.mubr.msk.f32.gmra.mxu1 %vm842_vm1, %v5818_v54  ;;  %v8876_v54 = vld [vmem:[%s13894_s2 + $0x60] sm:$0xff] }
 0x393   : > { %10090 = vmatprep.mubr.msk.f32.mxu1 %vm842_vm1, %v5819_v51  ;;  %v6598_v51 = vmul.f32 %v13998_v19, %v12401_v52  ;;  %v8910_v52 = vld [vmem:[%s13894_s2 + $0x70] sm:$0xff] }
 0x394   : > { %10039 = vmatmul.mubr.msk.f32.gmra.mxu0 %vm842_vm1, %v5400_v7  ;;  %v14045_v7 = vld [vmem:[#allocation56_spill] sm:$0xff] }
 0x395   : > { %10097 = vmatprep.mubr.msk.f32.mxu0 %vm842_vm1, %v14042_v43  ;;  %v14048_v43 = vld [vmem:[#allocation61_spill] sm:$0xff] }
 0x396   : > { %10091 = vmatmul.mubr.msk.f32.gmra.mxu1 %vm842_vm1, %v5820_v27  ;;  %v6601_v27 = vmul.f32 %v14003_v3, %v12434_v48  ;;  %v6603_v48 = vmul.f32 %v14005_v32, %v12457_v59  ;;  %v14053_v59 = vld [vmem:[#allocation67_spill] sm:$0xff] }
 0x397   : > { %10149 = vmatprep.mubr.msk.f32.mxu1 %vm842_vm1, %v6597_v25  ;;  %v14050_v25 = vld [vmem:[#allocation63_spill] sm:$0xff] }
 0x398   : > { %10098 = vmatmul.mubr.msk.f32.vlgmr.msra.gmra.mxu0 %vm842_vm1, %v14044_v60  ;;  %v14047_v60 = vld [vmem:[#allocation60_spill] sm:$0xff] }
 0x399   : > { %10198 = vmatpush3.msra.mxu0 %v12421_v21  ;;  %10100 = vmatprep.mubr.msk.f32.mxu0 %vm842_vm1, %v14045_v7  ;;  %v14046_v21 = vld [vmem:[#allocation57_spill] sm:$0xff]  ;;  %v6605_v7 = vmul.f32 %v14052_v44, %v12474_v61  ;;  %v14055_v61 = vld [vmem:[#allocation71_spill] sm:$0xff] }
 0x39a   : > { %10150 = vmatmul.mubr.msk.f32.vlgmr.msra.gmra.mxu1 %vm842_vm1, %v6598_v51  ;;  %10199 = vmatprep.subr.mxu0 %v8876_v54  ;;  %v14051_v51 = vld [vmem:[#allocation66_spill] sm:$0xff] }
 0x39b   : > { %10152 = vmatprep.mubr.msk.f32.mxu1 %vm842_vm1, %v6599_v15  ;;  %10200 = vmatpush3.msra.mxu0 %v8876_v54  ;;  %v6604_v54 = vmul.f32 %v14006_v28, %v12469_v30  ;;  %v6606_v15 = vmul.f32 %v14008_v40, %v12485_v45  ;;  %v6607_v30 = vmul.f32 %v14009_v9, %v12490_v50  ;;  %v14057_v50 = vld [vmem:[#allocation73_spill] sm:$0xff] }
 0x39c   : > { %10101 = vmatmul.mubr.msk.f32.gmra.mxu0 %vm842_vm1, %v14046_v21  ;;  %10250 = vmatpush3.msra.mxu1 %v12444_v6  ;;  %v14049_v6 = vld [vmem:[#allocation62_spill] sm:$0xff]  ;;  %v6608_v21 = vmul.f32 %v14010_v53, %v12501_v23  ;;  %v6609_v45 = vmul.f32 %v14011_v33, %v12506_v55  ;;  %v6611_v23 = vmul.f32 %v11872_v62, %v12522_v46  ;;  %v14059_v55 = vld [vmem:[#allocation77_spill] sm:$0xff] }
 0x39d   : > { %10103 = vmatprep.mubr.msk.f32.mxu0 %vm842_vm1, %v14047_v60  ;;  %10301 = vmatprep.subr.mxu0 %v12687_v57  ;;  %v6610_v60 = vmul.f32 %v14012_v63, %v12517_v29  ;;  %v14061_v29 = vld [vmem:[#allocation15_spill] sm:$0xff]  ;;  %v14062_v46 = vld [vmem:[#allocation81_spill] sm:$0xff] }
 0x39e   : > { %10153 = vmatmul.mubr.msk.f32.gmra.mxu1 %vm842_vm1, %v6600_v37  ;;  %10251 = vmatprep.subr.mxu1 %v8910_v52  ;;  %v14056_v37 = vld [vmem:[#allocation72_spill] sm:$0xff] }
 0x39f   : > { %10155 = vmatprep.mubr.msk.f32.mxu1 %vm842_vm1, %v6601_v27  ;;  %10252 = vmatpush3.msra.mxu1 %v8910_v52  ;;  %v14054_v52 = vld [vmem:[#allocation69_spill] sm:$0xff]  ;;  %v14058_v27 = vld [vmem:[#allocation76_spill] sm:$0xff] }
 0x3a0   : > { %10104 = vmatmul.mubr.msk.f32.gmra.mxu0 %vm842_vm1, %v14048_v43  ;;  %v6612_v43 = vmul.f32 %v14014_v16, %v12533_v24  ;;  %v14064_v24 = vld [vmem:[#allocation42_spill] sm:$0xff] }
 0x3a1   : > { %10106 = vmatprep.mubr.msk.f32.mxu0 %vm842_vm1, %v14049_v6  ;;  %v6613_v6 = vmul.f32 %v14061_v29, %v12538_v10  ;;  %v14065_v10 = vld [vmem:[#allocation84_spill] sm:$0xff] }
 0x3a2   : > { %10156 = vmatmul.mubr.msk.f32.gmra.mxu1 %vm842_vm1, %v6602_v56  ;;  %v14060_v56 = vld [vmem:[#allocation79_spill] sm:$0xff] }
 0x3a3   : > { %10158 = vmatprep.mubr.msk.f32.mxu1 %vm842_vm1, %v6603_v48  ;;  %v6614_v48 = vmul.f32 %v14017_v22, %v12549_v5  ;;  %v6617_v5 = vmul.f32 %v14021_v47, %v12570_v13  ;;  %v14070_v13 = vld [vmem:[#allocation91_spill] sm:$0xff] }
 0x3a4   : > { %10107 = vmatmul.mubr.msk.f32.gmra.mxu0 %vm842_vm1, %v14050_v25  ;;  %v14063_v25 = vld [vmem:[#allocation82_spill] sm:$0xff] }
 0x3a5   : > { %10109 = vmatprep.mubr.msk.f32.mxu0 %vm842_vm1, %v14051_v51  ;;  %v6616_v51 = vmul.f32 %v14020_v41, %v12565_v4  ;;  %v14069_v4 = vld [vmem:[#allocation54_spill] sm:$0xff] }
 0x3a6   : > { %10159 = vmatmul.mubr.msk.f32.gmra.mxu1 %vm842_vm1, %v6604_v54  ;;  %v6615_v54 = vmul.f32 %v14064_v24, %v12554_v38  ;;  %v14067_v38 = vld [vmem:[#allocation87_spill] sm:$0xff] }
 0x3a7   : > { %10161 = vmatprep.mubr.msk.f32.mxu1 %vm842_vm1, %v6605_v7  ;;  %v14066_v7 = vld [vmem:[#allocation86_spill] sm:$0xff] }
 0x3a8   : > { %10110 = vmatmul.mubr.msk.f32.gmra.mxu0 %vm842_vm1, %v14053_v59  ;;  %v6618_v59 = vmul.f32 %v14022_v1, %v12581_v58  ;;  %v14073_v58 = vld [vmem:[#allocation92_spill] sm:$0xff] }
 0x3a9   : > { %10112 = vmatprep.mubr.msk.f32.mxu0 %vm842_vm1, %v14054_v52  ;;  %v6619_v52 = vmul.f32 %v14069_v4, %v12583_v31  ;;  %v14074_v31 = vld [vmem:[#allocation95_spill] sm:$0xff] }
 0x3aa   : > { %10162 = vmatmul.mubr.msk.f32.gmra.mxu1 %vm842_vm1, %v6606_v15  ;;  %v14068_v15 = vld [vmem:[#allocation90_spill] sm:$0xff] }
 0x3ab   : > { %10164 = vmatprep.mubr.msk.f32.mxu1 %vm842_vm1, %v6607_v30  ;;  %v14071_v30 = vld [vmem:[#allocation58_spill] sm:$0xff] }
 0x3ac   : > { %10113 = vmatmul.mubr.msk.f32.gmra.mxu0 %vm842_vm1, %v14055_v61  ;;  %v6620_v61 = vmul.f32 %v14071_v30, %v12597_v2  ;;  %v14076_v2 = vld [vmem:[#allocation16_spill] sm:$0xff] }
 0x3ad   : > { %10115 = vmatprep.mubr.msk.f32.mxu0 %vm842_vm1, %v14056_v37 }
 0x3ae   : > { %10165 = vmatmul.mubr.msk.f32.gmra.mxu1 %vm842_vm1, %v6608_v21  ;;  %v14072_v21 = vld [vmem:[#allocation89_spill] sm:$0xff] }
 0x3af   : > { %10167 = vmatprep.mubr.msk.f32.mxu1 %vm842_vm1, %v6609_v45  ;;  %v6621_v37 = vmul.f32 %v12599_v49, %v14072_v21  ;;  %v6622_v45 = vmul.f32 %v14028_v8, %v12613_v12  ;;  %v14077_v49 = vld [vmem:[#allocation98_spill] sm:$0xff]  ;;  %v14080_v12 = vld [vmem:[#allocation103_spill] sm:$0xff] }
 0x3b0   : > { %10116 = vmatmul.mubr.msk.f32.gmra.mxu0 %vm842_vm1, %v14057_v50  ;;  %v14075_v50 = vld [vmem:[#allocation96_spill] sm:$0xff] }
 0x3b1   : > { %10118 = vmatprep.mubr.msk.f32.mxu0 %vm842_vm1, %v14058_v27  ;;  %v14078_v27 = vld [vmem:[#allocation83_spill] sm:$0xff] }
 0x3b2   : > { %10168 = vmatmul.mubr.msk.f32.gmra.mxu1 %vm842_vm1, %v6610_v60  ;;  %v6623_v60 = vmul.f32 %v14076_v2, %v14029_v39  ;;  %v7407_v2 = vld [vmem:[#allocation2 + $0x38] sm:$0xff] }
 0x3b3   : > { %10170 = vmatprep.mubr.msk.f32.mxu1 %vm842_vm1, %v6611_v23  ;;  %v6624_v23 = vmul.f32 %v14078_v27, %v12631_v20  ;;  %v6626_v20 = vmul.f32 %v14036_v34, %v12648_v14  ;;  %v6987_v14 = vld [vmem:[#allocation2 + $0x37] sm:$0xff] }
 0x3b4   : > { %10119 = vmatmul.mubr.msk.f32.gmra.mxu0 %vm842_vm1, %v14059_v55  ;;  %v14079_v55 = vld [vmem:[#allocation93_spill] sm:$0xff] }
 0x3b5   : > { %10121 = vmatprep.mubr.msk.f32.mxu0 %vm842_vm1, %v14060_v56  ;;  %v12823_v56 = vld [vmem:[#allocation2 + $0x109] sm:$0xff] }
 0x3b6   : > { %10171 = vmatmul.mubr.msk.f32.gmra.mxu1 %vm842_vm1, %v6612_v43  ;;  %v6625_v43 = vmul.f32 %v12633_v36, %v14079_v55  ;;  %14081 = vst [vmem:[#allocation21_spill] sm:$0xff] %v12823_v56 }
 0x3b7   : > { %10173 = vmatprep.mubr.msk.f32.mxu1 %vm842_vm1, %v6613_v6  ;;  %v14082_v6 = vld [vmem:[#allocation104_spill] sm:$0xff] }
 0x3b8   : > { %10122 = vmatmul.mubr.msk.f32.gmra.mxu0 %vm842_vm1, %v14062_v46  ;;  %v12829_v46 = vld [vmem:[#allocation2 + $0x108] sm:$0xff] }
 0x3b9   : > { %10124 = vmatprep.mubr.msk.f32.mxu0 %vm842_vm1, %v14063_v25  ;;  %v14083_v25 = vld [vmem:[#allocation20_spill] sm:$0xff] }
 0x3ba   : > { %10174 = vmatmul.mubr.msk.f32.gmra.mxu1 %vm842_vm1, %v6614_v48  ;;  %v6985_v48 = vld [vmem:[#allocation2 + $0x27] sm:$0xff]  ;;  %v6627_v36 = vmul.f32 %v12823_v56, %v14083_v25 }
 0x3bb   : > { %10176 = vmatprep.mubr.msk.f32.mxu1 %vm842_vm1, %v6615_v54  ;;  %v6596_v54 = vld [vmem:[#allocation2 + $0x111] sm:$0xff] }
 0x3bc   : > { %10125 = vmatmul.mubr.msk.f32.gmra.mxu0 %vm842_vm1, %v14065_v10  ;;  %v12839_v10 = vld [vmem:[#allocation2 + $0x110] sm:$0xff] }
 0x3bd   : > { %10127 = vmatprep.mubr.msk.f32.mxu0 %vm842_vm1, %v14066_v7 }
 0x3be   : > { %10177 = vmatmul.mubr.msk.f32.gmra.mxu1 %vm842_vm1, %v6616_v51  ;;  %v14084_v51 = vld [vmem:[#allocation19_spill] sm:$0xff] }
 0x3bf   : > { %10179 = vmatprep.mubr.msk.f32.mxu1 %vm842_vm1, %v6617_v5  ;;  %v7017_v7 = vmul.f32 %v6985_v48, %v14084_v51  ;;  %v6986_v5 = vld [vmem:[#allocation2 + $0x2f] sm:$0xff] }
 0x3c0   : > { %10128 = vmatmul.mubr.msk.f32.gmra.mxu0 %vm842_vm1, %v14067_v38  ;;  %v6628_v38 = vmul.f32 %v6596_v54, %v12654_v35  ;;  %v7408_v54 = vld [vmem:[#allocation2 + $0x40] sm:$0xff] }
 0x3c1   : > { %10130 = vmatprep.mubr.msk.f32.mxu0 %vm842_vm1, %v14068_v15  ;;  %v14085_v15 = vld [vmem:[#allocation14_spill] sm:$0xff] }
 0x3c2   : > { %10180 = vmatmul.mubr.msk.f32.gmra.mxu1 %vm842_vm1, %v6618_v59  ;;  %v7405_v59 = vld [vmem:[#allocation2 + $0x28] sm:$0xff] }
 0x3c3   : > { %10182 = vmatprep.mubr.msk.f32.mxu1 %vm842_vm1, %v6619_v52  ;;  %v7018_v52 = vmul.f32 %v6986_v5, %v14085_v15  ;;  %v14089_v5 = vld [vmem:[#allocation22_spill] sm:$0xff]  ;;  %v14090_v15 = vld [vmem:[#allocation24_spill] sm:$0xff] }
 0x3c4   : > { %10131 = vmatmul.mubr.msk.f32.gmra.mxu0 %vm842_vm1, %v14070_v13  ;;  %v14086_v13 = vld [vmem:[#allocation18_spill] sm:$0xff] }
 0x3c5   : > { %10133 = vmatprep.mubr.msk.f32.mxu0 %vm842_vm1, %v14073_v58  ;;  %v8944_v58 = vld [vmem:[%s13894_s2 + $0x80] sm:$0xff] }
 0x3c6   : > { %10183 = vmatmul.mubr.msk.f32.gmra.mxu1 %vm842_vm1, %v6620_v61  ;;  %v7019_v61 = vmul.f32 %v6987_v14, %v14086_v13  ;;  %v6992_v13 = vld [vmem:[#allocation2 + $0x5f] sm:$0xff] }
 0x3c7   : > { %10185 = vmatprep.mubr.msk.f32.mxu1 %vm842_vm1, %v6621_v37  ;;  %v6988_v37 = vld [vmem:[#allocation2 + $0x3f] sm:$0xff] }
 0x3c8   : > { %10134 = vmatmul.mubr.msk.f32.gmra.mxu0 %vm842_vm1, %v14074_v31  ;;  %v6989_v31 = vld [vmem:[#allocation2 + $0x47] sm:$0xff] }
 0x3c9   : > { %10136 = vmatprep.mubr.msk.f32.mxu0 %vm842_vm1, %v14075_v50  ;;  %v7406_v50 = vld [vmem:[#allocation2 + $0x30] sm:$0xff] }
 0x3ca   : > { %10186 = vmatmul.mubr.msk.f32.gmra.mxu1 %vm842_vm1, %v6622_v45  ;;  %v12854_v45 = vpop.f32.mrf.mxu0 }
 0x3cb   : > { %10188 = vmatprep.mubr.msk.f32.mxu1 %vm842_vm1, %v6623_v60  ;;  %v14087_v60 = vld [vmem:[#allocation39_spill] sm:$0xff] }
 0x3cc   : > { %10137 = vmatmul.mubr.msk.f32.gmra.mxu0 %vm842_vm1, %v14077_v49  ;;  %v7020_v49 = vmul.f32 %v6988_v37, %v14087_v60  ;;  %v6993_v37 = vld [vmem:[#allocation2 + $0x67] sm:$0xff]  ;;  %v7411_v60 = vld [vmem:[#allocation2 + $0x58] sm:$0xff] }
 0x3cd   : > { %10139 = vmatprep.mubr.msk.f32.mxu0 %vm842_vm1, %v14080_v12  ;;  %v14088_v12 = vld [vmem:[#allocation41_spill] sm:$0xff] }
 0x3ce   : > { %10189 = vmatmul.mubr.msk.f32.gmra.mxu1 %vm842_vm1, %v6624_v23  ;;  %v12860_v23 = vpop.f32.mrf.mxu1 }
 0x3cf   : > { %10191 = vmatprep.mubr.msk.f32.mxu1 %vm842_vm1, %v6625_v43 }
 0x3d0   : > { %10140 = vmatmul.mubr.msk.f32.gmra.mxu0 %vm842_vm1, %v14082_v6  ;;  %v7021_v6 = vmul.f32 %v6989_v31, %v14088_v12 }
 0x3d1   : > { %10142 = vmatprep.mubr.msk.f32.mxu0 %vm842_vm1, %v12829_v46 }
 0x3d2   : > { %10192 = vmatmul.mubr.msk.f32.gmra.mxu1 %vm842_vm1, %v6626_v20  ;;  %v6990_v20 = vld [vmem:[#allocation2 + $0x4f] sm:$0xff] }
 0x3d3   : > { %10194 = vmatprep.mubr.msk.f32.mxu1 %vm842_vm1, %v6627_v36 }
 0x3d4   : > { %10143 = vmatmul.mubr.msk.f32.gmra.mxu0 %vm842_vm1, %v12839_v10 }
 0x3d5   : > { %10201 = vmatprep.mubr.msk.f32.mxu0 %vm842_vm1, %v7017_v7  ;;  %v7409_v7 = vld [vmem:[#allocation2 + $0x48] sm:$0xff] }
 0x3d6   : > { %10195 = vmatmul.mubr.msk.f32.gmra.mxu1 %vm842_vm1, %v6628_v38  ;;  %v7022_v38 = vmul.f32 %v6990_v20, %v14089_v5  ;;  %v14092_v20 = vld [vmem:[#allocation45_spill] sm:$0xff] }
 0x3d7   : > { %10253 = vmatprep.mubr.msk.f32.mxu1 %vm842_vm1, %v7405_v59 }
 0x3d8   : > { %10202 = vmatmul.mubr.msk.f32.vlgmr.msra.gmra.mxu0 %vm842_vm1, %v7018_v52 }
 0x3d9   : > { %10302 = vmatpush3.msra.mxu0 %v12687_v57  ;;  %10204 = vmatprep.mubr.msk.f32.mxu0 %vm842_vm1, %v7019_v61  ;;  %v6991_v57 = vld [vmem:[#allocation2 + $0x57] sm:$0xff] }
 0x3da   : > { %10254 = vmatmul.mubr.msk.f32.vlgmr.msra.gmra.mxu1 %vm842_vm1, %v7406_v50  ;;  %10303 = vmatprep.subr.mxu0 %v8944_v58  ;;  %v7023_v52 = vmul.f32 %v6991_v57, %v14090_v15  ;;  %v7410_v50 = vld [vmem:[#allocation2 + $0x50] sm:$0xff]  ;;  %v7025_v57 = vmul.f32 %v6993_v37, %v14092_v20  ;;  %v14093_v15 = vld [vmem:[#allocation27_spill] sm:$0xff] }
 0x3db   : > { %10256 = vmatprep.mubr.msk.f32.mxu1 %vm842_vm1, %v7407_v2  ;;  %v9894_v43 = vpop.f32.mrf.mxu0  ;;  %10304 = vmatpush3.msra.mxu0 %v8944_v58 }
 0x3dc   : > { %10205 = vmatmul.mubr.msk.f32.gmra.mxu0 %vm842_vm1, %v7020_v49  ;;  %v14091_v49 = vld [vmem:[#allocation43_spill] sm:$0xff] }
 0x3dd   : > { %10207 = vmatprep.mubr.msk.f32.mxu0 %vm842_vm1, %v7021_v6  ;;  %v4739_v48 = vpop.f32.mrf.mxu0 }
 0x3de   : > { %v9946_v36 = vpop.f32.mrf.mxu1  ;;  %10257 = vmatmul.mubr.msk.f32.gmra.mxu1 %vm842_vm1, %v7408_v54  ;;  %v6995_v54 = vld [vmem:[#allocation2 + $0x77] sm:$0xff] }
 0x3df   : > { %v12866_v51 = vadd.f32 %v9946_v36, %v9894_v43  ;;  %10259 = vmatprep.mubr.msk.f32.mxu1 %vm842_vm1, %v7409_v7  ;;  %v9897_v14 = vpop.f32.mrf.mxu0  ;;  %v7024_v43 = vmul.f32 %v6992_v13, %v14091_v49  ;;  %v6997_v49 = vld [vmem:[#allocation2 + $0x87] sm:$0xff] }
 0x3e0   : > { %v5060_v59 = vpop.f32.mrf.mxu1  ;;  %10208 = vmatmul.mubr.msk.f32.gmra.mxu0 %vm842_vm1, %v7022_v38  ;;  %v7412_v38 = vld [vmem:[#allocation2 + $0x60] sm:$0xff] }
 0x3e1   : > { %v12872_v61 = vadd.f32 %v5060_v59, %v4739_v48  ;;  %10210 = vmatprep.mubr.msk.f32.mxu0 %vm842_vm1, %v7023_v52  ;;  %v4749_v58 = vpop.f32.mrf.mxu0  ;;  %v6994_v48 = vld [vmem:[#allocation2 + $0x6f] sm:$0xff] }
 0x3e2   : > { %v9949_v31 = vpop.f32.mrf.mxu1  ;;  %10260 = vmatmul.mubr.msk.f32.gmra.mxu1 %vm842_vm1, %v7410_v50  ;;  %v7413_v59 = vld [vmem:[#allocation2 + $0x68] sm:$0xff]  ;;  %v7026_v52 = vmul.f32 %v6994_v48, %v14093_v15  ;;  %v6996_v50 = vld [vmem:[#allocation2 + $0x7f] sm:$0xff] }
 0x3e3   : > { %v12876_v2 = vadd.f32 %v9949_v31, %v9897_v14  ;;  %10262 = vmatprep.mubr.msk.f32.mxu1 %vm842_vm1, %v7411_v60  ;;  %v9900_v12 = vpop.f32.mrf.mxu0  ;;  %v14095_v48 = vld [vmem:[#allocation47_spill] sm:$0xff]  ;;  %v6998_v15 = vld [vmem:[#allocation2 + $0x8f] sm:$0xff] }
 0x3e4   : > { %v5070_v6 = vpop.f32.mrf.mxu1  ;;  %10211 = vmatmul.mubr.msk.f32.gmra.mxu0 %vm842_vm1, %v7024_v43 }
 0x3e5   : > { %v12882_v36 = vadd.f32 %v5070_v6, %v4749_v58  ;;  %10213 = vmatprep.mubr.msk.f32.mxu0 %vm842_vm1, %v7025_v57  ;;  %v4759_v7 = vpop.f32.mrf.mxu0  ;;  %v14094_v58 = vld [vmem:[#allocation29_spill] sm:$0xff]  ;;  %v7414_v6 = vld [vmem:[#allocation2 + $0x70] sm:$0xff]  ;;  %v7415_v57 = vld [vmem:[#allocation2 + $0x78] sm:$0xff] }
 0x3e6   : > { %v9952_v5 = vpop.f32.mrf.mxu1  ;;  %10263 = vmatmul.mubr.msk.f32.gmra.mxu1 %vm842_vm1, %v7412_v38  ;;  %v7027_v31 = vmul.f32 %v6995_v54, %v14094_v58  ;;  %v14096_v38 = vld [vmem:[#allocation49_spill] sm:$0xff] }
 0x3e7   : > { %v12886_v14 = vadd.f32 %v9952_v5, %v9900_v12  ;;  %10265 = vmatprep.mubr.msk.f32.mxu1 %vm842_vm1, %v7413_v59  ;;  %v9903_v13 = vpop.f32.mrf.mxu0  ;;  %v7028_v5 = vmul.f32 %v6996_v50, %v14095_v48  ;;  %v7029_v59 = vmul.f32 %v6997_v49, %v14096_v38  ;;  %v7417_v50 = vld [vmem:[#allocation2 + $0x88] sm:$0xff]  ;;  %v14098_v48 = vld [vmem:[#allocation35_spill] sm:$0xff] }
 0x3e8   : > { %v5080_v37 = vpop.f32.mrf.mxu1  ;;  %10214 = vmatmul.mubr.msk.f32.gmra.mxu0 %vm842_vm1, %v7026_v52 }
 0x3e9   : > { %v12892_v60 = vadd.f32 %v5080_v37, %v4759_v7  ;;  %10216 = vmatprep.mubr.msk.f32.mxu0 %vm842_vm1, %v7027_v31  ;;  %v4769_v43 = vpop.f32.mrf.mxu0  ;;  %v6999_v37 = vld [vmem:[#allocation2 + $0x97] sm:$0xff]  ;;  %v7416_v31 = vld [vmem:[#allocation2 + $0x80] sm:$0xff] }
 0x3ea   : > { %v9955_v12 = vpop.f32.mrf.mxu1  ;;  %10266 = vmatmul.mubr.msk.f32.gmra.mxu1 %vm842_vm1, %v7414_v6  ;;  %v14097_v6 = vld [vmem:[#allocation32_spill] sm:$0xff] }
 0x3eb   : > { %v12896_v20 = vadd.f32 %v9955_v12, %v9903_v13  ;;  %10268 = vmatprep.mubr.msk.f32.mxu1 %vm842_vm1, %v7415_v57  ;;  %v9906_v54 = vpop.f32.mrf.mxu0  ;;  %v7030_v57 = vmul.f32 %v6998_v15, %v14097_v6  ;;  %v7419_v15 = vld [vmem:[#allocation2 + $0x98] sm:$0xff] }
 0x3ec   : > { %v5090_v7 = vpop.f32.mrf.mxu1  ;;  %10217 = vmatmul.mubr.msk.f32.gmra.mxu0 %vm842_vm1, %v7028_v5  ;;  %v7000_v5 = vld [vmem:[#allocation2 + $0x9f] sm:$0xff] }
 0x3ed   : > { %v12902_v52 = vadd.f32 %v5090_v7, %v4769_v43  ;;  %10219 = vmatprep.mubr.msk.f32.mxu0 %vm842_vm1, %v7029_v59  ;;  %v4779_v13 = vpop.f32.mrf.mxu0  ;;  %v7031_v7 = vmul.f32 %v6999_v37, %v14098_v48  ;;  %v7001_v59 = vld [vmem:[#allocation2 + $0xa7] sm:$0xff] }
 0x3ee   : > { %v9958_v58 = vpop.f32.mrf.mxu1  ;;  %10269 = vmatmul.mubr.msk.f32.gmra.mxu1 %vm842_vm1, %v7416_v31  ;;  %v7418_v31 = vld [vmem:[#allocation2 + $0x90] sm:$0xff] }
 0x3ef   : > { %v12906_v12 = vadd.f32 %v9958_v58, %v9906_v54  ;;  %10271 = vmatprep.mubr.msk.f32.mxu1 %vm842_vm1, %v7417_v50  ;;  %v9909_v49 = vpop.f32.mrf.mxu0  ;;  %v14099_v50 = vld [vmem:[#allocation51_spill] sm:$0xff] }
 0x3f0   : > { %v5100_v43 = vpop.f32.mrf.mxu1  ;;  %10220 = vmatmul.mubr.msk.f32.gmra.mxu0 %vm842_vm1, %v7030_v57  ;;  %v7032_v6 = vmul.f32 %v7000_v5, %v14099_v50  ;;  %v7002_v57 = vld [vmem:[#allocation2 + $0xaf] sm:$0xff] }
 0x3f1   : > { %v12912_v38 = vadd.f32 %v5100_v43, %v4779_v13  ;;  %10222 = vmatprep.mubr.msk.f32.mxu0 %vm842_vm1, %v7031_v7  ;;  %v4789_v54 = vpop.f32.mrf.mxu0  ;;  %v14100_v43 = vld [vmem:[#allocation55_spill] sm:$0xff]  ;;  %v7421_v5 = vld [vmem:[#allocation2 + $0xa8] sm:$0xff] }
 0x3f2   : > { %v9961_v58 = vpop.f32.mrf.mxu1  ;;  %10272 = vmatmul.mubr.msk.f32.gmra.mxu1 %vm842_vm1, %v7418_v31  ;;  %v7033_v48 = vmul.f32 %v7001_v59, %v14100_v43  ;;  %v7003_v7 = vld [vmem:[#allocation2 + $0xb7] sm:$0xff]  ;;  %v7420_v31 = vld [vmem:[#allocation2 + $0xa0] sm:$0xff] }
 0x3f3   : > { %v12916_v35 = vadd.f32 %v9961_v58, %v9909_v49  ;;  %10274 = vmatprep.mubr.msk.f32.mxu1 %vm842_vm1, %v7419_v15  ;;  %v9912_v37 = vpop.f32.mrf.mxu0  ;;  %v14101_v15 = vld [vmem:[#allocation37_spill] sm:$0xff] }
 0x3f4   : > { %v5110_v13 = vpop.f32.mrf.mxu1  ;;  %10223 = vmatmul.mubr.msk.f32.gmra.mxu0 %vm842_vm1, %v7032_v6  ;;  %v7034_v50 = vmul.f32 %v7002_v57, %v14101_v15  ;;  %v7004_v6 = vld [vmem:[#allocation2 + $0xbf] sm:$0xff] }
 0x3f5   : > { %v12922_v25 = vadd.f32 %v5110_v13, %v4789_v54  ;;  %10225 = vmatprep.mubr.msk.f32.mxu0 %vm842_vm1, %v7033_v48  ;;  %v4799_v49 = vpop.f32.mrf.mxu0  ;;  %v14102_v13 = vld [vmem:[#allocation40_spill] sm:$0xff]  ;;  %v7423_v57 = vld [vmem:[#allocation2 + $0xb8] sm:$0xff] }
 0x3f6   : > { %v9964_v58 = vpop.f32.mrf.mxu1  ;;  %10275 = vmatmul.mubr.msk.f32.gmra.mxu1 %vm842_vm1, %v7420_v31  ;;  %v7035_v43 = vmul.f32 %v7003_v7, %v14102_v13  ;;  %v7005_v48 = vld [vmem:[#allocation2 + $0xc7] sm:$0xff]  ;;  %v7422_v31 = vld [vmem:[#allocation2 + $0xb0] sm:$0xff] }
 0x3f7   : > { %v12926_v34 = vadd.f32 %v9964_v58, %v9912_v37  ;;  %10277 = vmatprep.mubr.msk.f32.mxu1 %vm842_vm1, %v7421_v5  ;;  %v9915_v59 = vpop.f32.mrf.mxu0  ;;  %v14103_v5 = vld [vmem:[#allocation59_spill] sm:$0xff] }
 0x3f8   : > { %v5120_v54 = vpop.f32.mrf.mxu1  ;;  %10226 = vmatmul.mubr.msk.f32.gmra.mxu0 %vm842_vm1, %v7034_v50  ;;  %v7036_v15 = vmul.f32 %v7004_v6, %v14103_v5  ;;  %v7006_v50 = vld [vmem:[#allocation2 + $0xcf] sm:$0xff] }
 0x3f9   : > { %v12932_v56 = vadd.f32 %v5120_v54, %v4799_v49  ;;  %10228 = vmatprep.mubr.msk.f32.mxu0 %vm842_vm1, %v7035_v43  ;;  %v4809_v37 = vpop.f32.mrf.mxu0  ;;  %v14104_v54 = vld [vmem:[#allocation65_spill] sm:$0xff]  ;;  %v7007_v43 = vld [vmem:[#allocation2 + $0xd7] sm:$0xff] }
 0x3fa   : > { %v9967_v58 = vpop.f32.mrf.mxu1  ;;  %10278 = vmatmul.mubr.msk.f32.gmra.mxu1 %vm842_vm1, %v7422_v31  ;;  %v7037_v13 = vmul.f32 %v7005_v48, %v14104_v54  ;;  %v7424_v31 = vld [vmem:[#allocation2 + $0xc0] sm:$0xff]  ;;  %v7425_v6 = vld [vmem:[#allocation2 + $0xc8] sm:$0xff] }
 0x3fb   : > { %v12936_v55 = vadd.f32 %v9967_v58, %v9915_v59  ;;  %10280 = vmatprep.mubr.msk.f32.mxu1 %vm842_vm1, %v7423_v57  ;;  %v9918_v7 = vpop.f32.mrf.mxu0  ;;  %v14105_v57 = vld [vmem:[#allocation46_spill] sm:$0xff] }
 0x3fc   : > { %v5130_v49 = vpop.f32.mrf.mxu1  ;;  %10229 = vmatmul.mubr.msk.f32.gmra.mxu0 %vm842_vm1, %v7036_v15  ;;  %v7038_v5 = vmul.f32 %v7006_v50, %v14105_v57  ;;  %v7008_v15 = vld [vmem:[#allocation2 + $0xdf] sm:$0xff] }
 0x3fd   : > { %v12942_v27 = vadd.f32 %v5130_v49, %v4809_v37  ;;  %10231 = vmatprep.mubr.msk.f32.mxu0 %vm842_vm1, %v7037_v13  ;;  %v4819_v59 = vpop.f32.mrf.mxu0  ;;  %v14106_v49 = vld [vmem:[#allocation50_spill] sm:$0xff]  ;;  %v7009_v13 = vld [vmem:[#allocation2 + $0xe7] sm:$0xff]  ;;  %v7427_v50 = vld [vmem:[#allocation2 + $0xd8] sm:$0xff] }
 0x3fe   : > { %v9970_v58 = vpop.f32.mrf.mxu1  ;;  %10281 = vmatmul.mubr.msk.f32.gmra.mxu1 %vm842_vm1, %v7424_v31  ;;  %v7039_v54 = vmul.f32 %v7007_v43, %v14106_v49  ;;  %v7426_v31 = vld [vmem:[#allocation2 + $0xd0] sm:$0xff] }
 0x3ff   : > { %v12946_v39 = vadd.f32 %v9970_v58, %v9918_v7  ;;  %10283 = vmatprep.mubr.msk.f32.mxu1 %vm842_vm1, %v7425_v6  ;;  %v9921_v48 = vpop.f32.mrf.mxu0  ;;  %v14108_v6 = vld [vmem:[#allocation70_spill] sm:$0xff] }
 0x400   : > { %v5140_v37 = vpop.f32.mrf.mxu1  ;;  %10232 = vmatmul.mubr.msk.f32.gmra.mxu0 %vm842_vm1, %v7038_v5  ;;  %v7040_v57 = vmul.f32 %v7008_v15, %v14108_v6  ;;  %v7010_v5 = vld [vmem:[#allocation2 + $0xef] sm:$0xff] }
 0x401   : > { %v12952_v8 = vadd.f32 %v5140_v37, %v4819_v59  ;;  %10234 = vmatprep.mubr.msk.f32.mxu0 %vm842_vm1, %v7039_v54  ;;  %v4829_v7 = vpop.f32.mrf.mxu0  ;;  %v14109_v37 = vld [vmem:[#allocation75_spill] sm:$0xff]  ;;  %v7429_v15 = vld [vmem:[#allocation2 + $0xe8] sm:$0xff] }
 0x402   : > { %v9973_v58 = vpop.f32.mrf.mxu1  ;;  %10284 = vmatmul.mubr.msk.f32.gmra.mxu1 %vm842_vm1, %v7426_v31  ;;  %v7041_v49 = vmul.f32 %v7009_v13, %v14109_v37  ;;  %v7011_v54 = vld [vmem:[#allocation2 + $0xf7] sm:$0xff]  ;;  %v7428_v31 = vld [vmem:[#allocation2 + $0xe0] sm:$0xff] }
 0x403   : > { %v12956_v21 = vadd.f32 %v9973_v58, %v9921_v48  ;;  %10286 = vmatprep.mubr.msk.f32.mxu1 %vm842_vm1, %v7427_v50  ;;  %v9924_v43 = vpop.f32.mrf.mxu0  ;;  %v14112_v50 = vld [vmem:[#allocation64_spill] sm:$0xff] }
 0x404   : > { %v5150_v59 = vpop.f32.mrf.mxu1  ;;  %10235 = vmatmul.mubr.msk.f32.gmra.mxu0 %vm842_vm1, %v7040_v57  ;;  %v7042_v6 = vmul.f32 %v7010_v5, %v14112_v50  ;;  %v7012_v57 = vld [vmem:[#allocation2 + $0xff] sm:$0xff] }
 0x405   : > { %14107 = vst [vmem:[#allocation11_spill] sm:$0xff] %v12956_v21  ;;  %v12962_v30 = vadd.f32 %v5150_v59, %v4829_v7  ;;  %10237 = vmatprep.mubr.msk.f32.mxu0 %vm842_vm1, %v7041_v49  ;;  %v4839_v48 = vpop.f32.mrf.mxu0  ;;  %v14113_v59 = vld [vmem:[#allocation74_spill] sm:$0xff]  ;;  %v7431_v5 = vld [vmem:[#allocation2 + $0xf8] sm:$0xff] }
 0x406   : > { %v9976_v58 = vpop.f32.mrf.mxu1  ;;  %10287 = vmatmul.mubr.msk.f32.gmra.mxu1 %vm842_vm1, %v7428_v31  ;;  %v7043_v37 = vmul.f32 %v7011_v54, %v14113_v59 }
 0x407   : > { %14110 = vst [vmem:[#allocation23_spill] sm:$0xff] %v12962_v30  ;;  %v12966_v21 = vadd.f32 %v9976_v58, %v9924_v43  ;;  %10289 = vmatprep.mubr.msk.f32.mxu1 %vm842_vm1, %v7429_v15  ;;  %v9927_v13 = vpop.f32.mrf.mxu0  ;;  %v7430_v58 = vld [vmem:[#allocation2 + $0xf0] sm:$0xff]  ;;  %v14116_v15 = vld [vmem:[#allocation80_spill] sm:$0xff] }
 0x408   : > { %v5160_v7 = vpop.f32.mrf.mxu1  ;;  %10238 = vmatmul.mubr.msk.f32.gmra.mxu0 %vm842_vm1, %v7042_v6  ;;  %v7044_v50 = vmul.f32 %v7012_v57, %v14116_v15  ;;  %v7014_v6 = vld [vmem:[#allocation2 + $0x10f] sm:$0xff]  ;;  %v14118_v57 = vld [vmem:[#allocation88_spill] sm:$0xff] }
 0x409   : > { %14111 = vst [vmem:[#allocation25_spill] sm:$0xff] %v12966_v21  ;;  %v12972_v30 = vadd.f32 %v5160_v7, %v4839_v48  ;;  %10240 = vmatprep.mubr.msk.f32.mxu0 %vm842_vm1, %v7043_v37  ;;  %v4849_v43 = vpop.f32.mrf.mxu0  ;;  %v14117_v48 = vld [vmem:[#allocation85_spill] sm:$0xff]  ;;  %v14119_v15 = vld [vmem:[#allocation100_spill] sm:$0xff] }
 0x40a   : > { %v9979_v49 = vpop.f32.mrf.mxu1  ;;  %10290 = vmatmul.mubr.msk.f32.gmra.mxu1 %vm842_vm1, %v7430_v58  ;;  %v7045_v7 = vmul.f32 %v12644_v26, %v14117_v48  ;;  %v7432_v58 = vld [vmem:[#allocation2 + $0x100] sm:$0xff]  ;;  %v7435_v48 = vld [vmem:[#allocation2 + $0x118] sm:$0xff] }
 0x40b   : > { %14114 = vst [vmem:[#allocation26_spill] sm:$0xff] %v12972_v30  ;;  %v12976_v31 = vadd.f32 %v9979_v49, %v9927_v13  ;;  %10292 = vmatprep.mubr.msk.f32.mxu1 %vm842_vm1, %v7431_v5  ;;  %v9930_v54 = vpop.f32.mrf.mxu0  ;;  %v7015_v30 = vld [vmem:[#allocation2 + $0x117] sm:$0xff]  ;;  %v7046_v5 = vmul.f32 %v7014_v6, %v14118_v57  ;;  %v7016_v26 = vld [vmem:[#allocation2 + $0x11f] sm:$0xff] }
 0x40c   : > { %v5170_v59 = vpop.f32.mrf.mxu1  ;;  %10241 = vmatmul.mubr.msk.f32.gmra.mxu0 %vm842_vm1, %v7044_v50  ;;  %v7047_v21 = vmul.f32 %v7015_v30, %v14119_v15  ;;  %v7048_v6 = vmul.f32 %v7016_v26, %v14041_v42  ;;  %v7794_v57 = vld [vmem:[#allocation2 + $0x31] sm:$0xff] }
 0x40d   : > { %14115 = vst [vmem:[#allocation28_spill] sm:$0xff] %v12976_v31  ;;  %v12983_v37 = vadd.f32 %v5170_v59, %v4849_v43  ;;  %10243 = vmatprep.mubr.msk.f32.mxu0 %vm842_vm1, %v7045_v7  ;;  %v4859_v13 = vpop.f32.mrf.mxu0  ;;  %v7793_v7 = vld [vmem:[#allocation2 + $0x29] sm:$0xff] }
 0x40e   : > { %v9982_v49 = vpop.f32.mrf.mxu1  ;;  %10293 = vmatmul.mubr.msk.f32.gmra.mxu1 %vm842_vm1, %v7432_v58 }
 0x40f   : > { %v12987_v31 = vadd.f32 %v9982_v49, %v9930_v54  ;;  %10295 = vmatprep.mubr.msk.f32.mxu1 %vm842_vm1, %v12829_v46  ;;  %v9933_v43 = vpop.f32.mrf.mxu0  ;;  %v7825_v46 = vmul.f32 %v7793_v7, %v14043_v18 }
 0x410   : > { %v5180_v59 = vpop.f32.mrf.mxu1  ;;  %10244 = vmatmul.mubr.msk.f32.gmra.mxu0 %vm842_vm1, %v7046_v5 }
 0x411   : > { %v12994_v50 = vadd.f32 %v5180_v59, %v4859_v13  ;;  %10246 = vmatprep.mubr.msk.f32.mxu0 %vm842_vm1, %v7047_v21  ;;  %v4869_v54 = vpop.f32.mrf.mxu0  ;;  %v7436_v13 = vld [vmem:[#allocation2 + $0x120] sm:$0xff] }
 0x412   : > { %v9985_v49 = vpop.f32.mrf.mxu1  ;;  %10296 = vmatmul.mubr.msk.f32.gmra.mxu1 %vm842_vm1, %v12839_v10  ;;  %v7795_v21 = vld [vmem:[#allocation2 + $0x39] sm:$0xff]  ;;  %v7826_v10 = vmul.f32 %v7794_v57, %v13998_v19 }
 0x413   : > { %v12999_v58 = vadd.f32 %v9985_v49, %v9933_v43  ;;  %10298 = vmatprep.mubr.msk.f32.mxu1 %vm842_vm1, %v7435_v48  ;;  %v7827_v18 = vmul.f32 %v7795_v21, %v13999_v11  ;;  %v7796_v48 = vld [vmem:[#allocation2 + $0x41] sm:$0xff]  ;;  %v7797_v49 = vld [vmem:[#allocation2 + $0x49] sm:$0xff] }
 0x414   : > { %v5190_v30 = vpop.f32.mrf.mxu1  ;;  %v9936_v5 = vpop.f32.mrf.mxu0  ;;  %10247 = vmatmul.mubr.msk.f32.gmra.mxu0 %vm842_vm1, %v7048_v6  ;;  %v5051_v6 = vadd.f32 %v12860_v23, %v12854_v45  ;;  %v7828_v19 = vmul.f32 %v7796_v48, %v14002_v0  ;;  %v7829_v21 = vmul.f32 %v7797_v49, %v14003_v3  ;;  %v7800_v49 = vld [vmem:[#allocation2 + $0x61] sm:$0xff] }
 0x415   : > { %v13005_v15 = vadd.f32 %v5190_v30, %v4869_v54  ;;  %10305 = vmatprep.mubr.msk.f32.mxu0 %vm842_vm1, %v7825_v46  ;;  %v14120_v30 = vld [vmem:[#allocation97_spill] sm:$0xff] }
 0x416   : > { %v9988_v42 = vpop.f32.mrf.mxu1  ;;  %v4879_v26 = vpop.f32.mrf.mxu0  ;;  %10299 = vmatmul.mubr.msk.f32.gmra.mxu1 %vm842_vm1, %v7436_v13 }
 0x417   : > { %v13009_v43 = vadd.f32 %v9988_v42, %v9936_v5  ;;  %v7798_v42 = vld [vmem:[#allocation2 + $0x51] sm:$0xff] }
 0x418   : > { %v5200_v59 = vpop.f32.mrf.mxu1  ;;  %v9995_v54 = vpop.f32.mrf.mxu0  ;;  %10306 = vmatmul.mubr.msk.f32.vlgmr.msra.gmra.mxu0 %vm842_vm1, %v7826_v10  ;;  %v7830_v0 = vmul.f32 %v7798_v42, %v14004_v17  ;;  %v7802_v42 = vld [vmem:[#allocation2 + $0x71] sm:$0xff] }
 0x419   : > { %v13014_v7 = vadd.f32 %v5200_v59, %v4879_v26  ;;  %v5726_v46 = vadd.f32 %v9995_v54, %v14120_v30  ;;  %10308 = vmatprep.mubr.msk.f32.mxu0 %vm842_vm1, %v7827_v18  ;;  %v7799_v59 = vld [vmem:[#allocation2 + $0x59] sm:$0xff] }
 0x41a   : > { %v5566_v13 = vpop.f32.mrf.mxu0  ;;  %v10047_v5 = vpop.f32.mrf.mxu1  ;;  %v7831_v3 = vmul.f32 %v7799_v59, %v14005_v32 }
 0x41b   : > { %v5725_v57 = vadd.f32 %v5566_v13, %v5051_v6  ;;  %v13022_v11 = vadd.f32 %v10047_v5, %v5726_v46 }
 0x41c   : > { %v9998_v26 = vpop.f32.mrf.mxu0  ;;  %v5986_v10 = vpop.f32.mrf.mxu1  ;;  %10309 = vmatmul.mubr.msk.f32.gmra.mxu0 %vm842_vm1, %v7828_v19 }
 0x41d   : > { %v5728_v45 = vadd.f32 %v9998_v26, %v12866_v51  ;;  %v13027_v23 = vadd.f32 %v5986_v10, %v5725_v57  ;;  %10311 = vmatprep.mubr.msk.f32.mxu0 %vm842_vm1, %v7829_v21  ;;  %v7801_v51 = vld [vmem:[#allocation2 + $0x69] sm:$0xff] }
 0x41e   : > { %v5576_v18 = vpop.f32.mrf.mxu0  ;;  %v10050_v54 = vpop.f32.mrf.mxu1  ;;  %v7833_v32 = vmul.f32 %v7801_v51, %v14052_v44 }
 0x41f   : > { %v5727_v48 = vadd.f32 %v5576_v18, %v12872_v61  ;;  %v13032_v6 = vadd.f32 %v10050_v54, %v5728_v45  ;;  %v7832_v61 = vmul.f32 %v7800_v49, %v14006_v28 }
 0x420   : > { %v10001_v30 = vpop.f32.mrf.mxu0  ;;  %v5996_v46 = vpop.f32.mrf.mxu1  ;;  %10312 = vmatmul.mubr.msk.f32.gmra.mxu0 %vm842_vm1, %v7830_v0 }
 0x421   : > { %v5730_v13 = vadd.f32 %v10001_v30, %v12876_v2  ;;  %v13037_v5 = vadd.f32 %v5996_v46, %v5727_v48  ;;  %10314 = vmatprep.mubr.msk.f32.mxu0 %vm842_vm1, %v7831_v3  ;;  %v7803_v2 = vld [vmem:[#allocation2 + $0x79] sm:$0xff]  ;;  %v7804_v48 = vld [vmem:[#allocation2 + $0x81] sm:$0xff] }
 0x422   : > { %v5586_v19 = vpop.f32.mrf.mxu0  ;;  %v10053_v17 = vpop.f32.mrf.mxu1  ;;  %v7835_v44 = vmul.f32 %v7803_v2, %v14009_v9 }
 0x423   : > { %v5729_v57 = vadd.f32 %v5586_v19, %v12882_v36  ;;  %v13042_v21 = vadd.f32 %v10053_v17, %v5730_v13  ;;  %v7834_v36 = vmul.f32 %v7802_v42, %v14008_v40  ;;  %v7806_v17 = vld [vmem:[#allocation2 + $0x91] sm:$0xff] }
 0x424   : > { %v10004_v26 = vpop.f32.mrf.mxu0  ;;  %v6006_v10 = vpop.f32.mrf.mxu1  ;;  %10315 = vmatmul.mubr.msk.f32.gmra.mxu0 %vm842_vm1, %v7832_v61 }
 0x425   : > { %v5732_v59 = vadd.f32 %v10004_v26, %v12886_v14  ;;  %v13047_v45 = vadd.f32 %v6006_v10, %v5729_v57  ;;  %10317 = vmatprep.mubr.msk.f32.mxu0 %vm842_vm1, %v7833_v32  ;;  %v7805_v14 = vld [vmem:[#allocation2 + $0x89] sm:$0xff] }
 0x426   : > { %v5596_v18 = vpop.f32.mrf.mxu0  ;;  %v10056_v28 = vpop.f32.mrf.mxu1  ;;  %v7837_v9 = vmul.f32 %v7805_v14, %v14011_v33 }
 0x427   : > { %v5731_v54 = vadd.f32 %v5596_v18, %v12892_v60  ;;  %v13052_v0 = vadd.f32 %v10056_v28, %v5732_v59  ;;  %v7836_v60 = vmul.f32 %v7804_v48, %v14010_v53  ;;  %v7808_v59 = vld [vmem:[#allocation2 + $0xa1] sm:$0xff] }
 0x428   : > { %v10007_v3 = vpop.f32.mrf.mxu0  ;;  %v6016_v49 = vpop.f32.mrf.mxu1  ;;  %10318 = vmatmul.mubr.msk.f32.gmra.mxu0 %vm842_vm1, %v7834_v36 }
 0x429   : > { %v5734_v30 = vadd.f32 %v10007_v3, %v12896_v20  ;;  %v13057_v46 = vadd.f32 %v6016_v49, %v5731_v54  ;;  %10320 = vmatprep.mubr.msk.f32.mxu0 %vm842_vm1, %v7835_v44  ;;  %v7807_v20 = vld [vmem:[#allocation2 + $0x99] sm:$0xff]  ;;  %v7810_v49 = vld [vmem:[#allocation2 + $0xb1] sm:$0xff] }
 0x42a   : > { %v5606_v51 = vpop.f32.mrf.mxu0  ;;  %v10059_v40 = vpop.f32.mrf.mxu1  ;;  %v7839_v33 = vmul.f32 %v7807_v20, %v11872_v62 }
 0x42b   : > { %v5733_v13 = vadd.f32 %v5606_v51, %v12902_v52  ;;  %v13062_v19 = vadd.f32 %v10059_v40, %v5734_v30  ;;  %v7838_v52 = vmul.f32 %v7806_v17, %v14012_v63  ;;  %v7812_v17 = vld [vmem:[#allocation2 + $0xc1] sm:$0xff] }
 0x42c   : > { %v10010_v61 = vpop.f32.mrf.mxu0  ;;  %v6026_v57 = vpop.f32.mrf.mxu1  ;;  %10321 = vmatmul.mubr.msk.f32.gmra.mxu0 %vm842_vm1, %v7836_v60 }
 0x42d   : > { %v5736_v32 = vadd.f32 %v10010_v61, %v12906_v12  ;;  %v13067_v42 = vadd.f32 %v6026_v57, %v5733_v13  ;;  %10323 = vmatprep.mubr.msk.f32.mxu0 %vm842_vm1, %v7837_v9  ;;  %v7809_v12 = vld [vmem:[#allocation2 + $0xa9] sm:$0xff] }
 0x42e   : > { %v5616_v26 = vpop.f32.mrf.mxu0  ;;  %v10062_v53 = vpop.f32.mrf.mxu1  ;;  %v7841_v62 = vmul.f32 %v7809_v12, %v14061_v29 }
 0x42f   : > { %v5735_v10 = vadd.f32 %v5616_v26, %v12912_v38  ;;  %v13072_v2 = vadd.f32 %v10062_v53, %v5736_v32  ;;  %v7840_v38 = vmul.f32 %v7808_v59, %v14014_v16 }
 0x430   : > { %v10013_v18 = vpop.f32.mrf.mxu0  ;;  %v6036_v28 = vpop.f32.mrf.mxu1  ;;  %10324 = vmatmul.mubr.msk.f32.gmra.mxu0 %vm842_vm1, %v7838_v52 }
 0x431   : > { %v5738_v36 = vadd.f32 %v10013_v18, %v12916_v35  ;;  %v13077_v54 = vadd.f32 %v6036_v28, %v5735_v10  ;;  %10326 = vmatprep.mubr.msk.f32.mxu0 %vm842_vm1, %v7839_v33  ;;  %v7811_v35 = vld [vmem:[#allocation2 + $0xb9] sm:$0xff]  ;;  %v7814_v10 = vld [vmem:[#allocation2 + $0xd1] sm:$0xff] }
 0x432   : > { %v5626_v44 = vpop.f32.mrf.mxu0  ;;  %v10065_v63 = vpop.f32.mrf.mxu1  ;;  %v7843_v29 = vmul.f32 %v7811_v35, %v14064_v24 }
 0x433   : > { %v5737_v48 = vadd.f32 %v5626_v44, %v12922_v25  ;;  %v13082_v3 = vadd.f32 %v10065_v63, %v5738_v36  ;;  %v7842_v25 = vmul.f32 %v7810_v49, %v14017_v22  ;;  %v7816_v63 = vld [vmem:[#allocation2 + $0xe1] sm:$0xff] }
 0x434   : > { %v10016_v14 = vpop.f32.mrf.mxu0  ;;  %v6046_v30 = vpop.f32.mrf.mxu1  ;;  %10327 = vmatmul.mubr.msk.f32.gmra.mxu0 %vm842_vm1, %v7840_v38 }
 0x435   : > { %v5740_v51 = vadd.f32 %v10016_v14, %v12926_v34  ;;  %v13087_v40 = vadd.f32 %v6046_v30, %v5737_v48  ;;  %10329 = vmatprep.mubr.msk.f32.mxu0 %vm842_vm1, %v7841_v62  ;;  %v7813_v34 = vld [vmem:[#allocation2 + $0xc9] sm:$0xff] }
 0x436   : > { %v5636_v60 = vpop.f32.mrf.mxu0  ;;  %v10068_v16 = vpop.f32.mrf.mxu1  ;;  %v7845_v24 = vmul.f32 %v7813_v34, %v14021_v47 }
 0x437   : > { %v5739_v13 = vadd.f32 %v5636_v60, %v12932_v56  ;;  %v13092_v9 = vadd.f32 %v10068_v16, %v5740_v51  ;;  %v7844_v56 = vmul.f32 %v7812_v17, %v14020_v41  ;;  %v14123_v51 = vld [vmem:[#allocation89_spill] sm:$0xff]  ;;  %v14124_v16 = vld [vmem:[#allocation23_spill] sm:$0xff] }
 0x438   : > { %v10019_v61 = vpop.f32.mrf.mxu0  ;;  %v6056_v57 = vpop.f32.mrf.mxu1  ;;  %10330 = vmatmul.mubr.msk.f32.gmra.mxu0 %vm842_vm1, %v7842_v25 }
 0x439   : > { %v5742_v20 = vadd.f32 %v10019_v61, %v12936_v55  ;;  %v13097_v32 = vadd.f32 %v6056_v57, %v5739_v13  ;;  %10332 = vmatprep.mubr.msk.f32.mxu0 %vm842_vm1, %v7843_v29  ;;  %v7815_v55 = vld [vmem:[#allocation2 + $0xd9] sm:$0xff]  ;;  %v7818_v13 = vld [vmem:[#allocation2 + $0xf1] sm:$0xff]  ;;  %v14125_v57 = vld [vmem:[#allocation25_spill] sm:$0xff] }
 0x43a   : > { %v5646_v26 = vpop.f32.mrf.mxu0  ;;  %v10071_v22 = vpop.f32.mrf.mxu1  ;;  %v7847_v47 = vmul.f32 %v7815_v55, %v14069_v4  ;;  %v7819_v61 = vld [vmem:[#allocation2 + $0xf9] sm:$0xff] }
 0x43b   : > { %v5741_v53 = vadd.f32 %v5646_v26, %v12942_v27  ;;  %v13102_v52 = vadd.f32 %v10071_v22, %v5742_v20  ;;  %v7846_v27 = vmul.f32 %v7814_v10, %v14022_v1  ;;  %v14122_v1 = vld [vmem:[#allocation58_spill] sm:$0xff] }
 0x43c   : > { %v10022_v33 = vpop.f32.mrf.mxu0  ;;  %v6066_v59 = vpop.f32.mrf.mxu1  ;;  %10333 = vmatmul.mubr.msk.f32.gmra.mxu0 %vm842_vm1, %v7844_v56  ;;  %v7848_v35 = vmul.f32 %v7816_v63, %v14122_v1  ;;  %v14126_v56 = vld [vmem:[#allocation68_spill] sm:$0xff] }
 0x43d   : > { %v5744_v18 = vadd.f32 %v10022_v33, %v12946_v39  ;;  %v13107_v28 = vadd.f32 %v6066_v59, %v5741_v53  ;;  %10335 = vmatprep.mubr.msk.f32.mxu0 %vm842_vm1, %v7845_v24  ;;  %v14121_v39 = vld [vmem:[#allocation11_spill] sm:$0xff]  ;;  %v7850_v53 = vmul.f32 %v7818_v13, %v14126_v56  ;;  %v14127_v24 = vld [vmem:[#allocation26_spill] sm:$0xff] }
 0x43e   : > { %v5656_v12 = vpop.f32.mrf.mxu0  ;;  %v10074_v41 = vpop.f32.mrf.mxu1  ;;  %v14128_v59 = vld [vmem:[#allocation78_spill] sm:$0xff] }
 0x43f   : > { %v5743_v36 = vadd.f32 %v5656_v12, %v12952_v8  ;;  %v13112_v44 = vadd.f32 %v10074_v41, %v5744_v18  ;;  %v10440_v8 = vld [vmem:[#allocation2 + $0xe9] sm:$0xff]  ;;  %v7851_v55 = vmul.f32 %v7819_v61, %v14128_v59  ;;  %v7820_v18 = vld [vmem:[#allocation2 + $0x101] sm:$0xff] }
 0x440   : > { %v10025_v38 = vpop.f32.mrf.mxu0  ;;  %v6076_v48 = vpop.f32.mrf.mxu1  ;;  %10336 = vmatmul.mubr.msk.f32.gmra.mxu0 %vm842_vm1, %v7846_v27  ;;  %v7849_v60 = vmul.f32 %v10440_v8, %v14123_v51  ;;  %v14129_v27 = vld [vmem:[#allocation28_spill] sm:$0xff]  ;;  %v7822_v8 = vld [vmem:[#allocation2 + $0x111] sm:$0xff] }
 0x441   : > { %v5746_v62 = vadd.f32 %v10025_v38, %v14121_v39  ;;  %v13117_v49 = vadd.f32 %v6076_v48, %v5743_v36  ;;  %10338 = vmatprep.mubr.msk.f32.mxu0 %vm842_vm1, %v7847_v47  ;;  %v14130_v48 = vld [vmem:[#allocation83_spill] sm:$0xff]  ;;  %v14133_v61 = vld [vmem:[#allocation94_spill] sm:$0xff] }
 0x442   : > { %v5666_v14 = vpop.f32.mrf.mxu0  ;;  %v10077_v30 = vpop.f32.mrf.mxu1  ;;  %v7852_v39 = vmul.f32 %v7820_v18, %v14130_v48  ;;  %v7823_v51 = vld [vmem:[#allocation2 + $0x119] sm:$0xff]  ;;  %v14135_v59 = vld [vmem:[#allocation34_spill] sm:$0xff] }
 0x443   : > { %v5745_v4 = vadd.f32 %v5666_v14, %v14124_v16  ;;  %v13123_v25 = vadd.f32 %v10077_v30, %v5746_v62  ;;  %v14131_v62 = vld [vmem:[#allocation93_spill] sm:$0xff] }
 0x444   : > { %v10028_v29 = vpop.f32.mrf.mxu0  ;;  %v6086_v17 = vpop.f32.mrf.mxu1  ;;  %10339 = vmatmul.mubr.msk.f32.gmra.mxu0 %vm842_vm1, %v7848_v35  ;;  %v14132_v14 = vld [vmem:[#allocation21_spill] sm:$0xff] }
 0x445   : > { %v5748_v34 = vadd.f32 %v10028_v29, %v14125_v57  ;;  %v13127_v20 = vadd.f32 %v6086_v17, %v5745_v4  ;;  %10341 = vmatprep.mubr.msk.f32.mxu0 %vm842_vm1, %v7849_v60  ;;  %v7853_v30 = vmul.f32 %v14132_v14, %v14131_v62  ;;  %v7854_v57 = vmul.f32 %v7822_v8, %v14133_v61 }
 0x446   : > { %v5676_v26 = vpop.f32.mrf.mxu0  ;;  %v10080_v22 = vpop.f32.mrf.mxu1 }
 0x447   : > { %v5747_v10 = vadd.f32 %v5676_v26, %v14127_v24  ;;  %v13132_v33 = vadd.f32 %v10080_v22, %v5748_v34  ;;  %v14134_v34 = vld [vmem:[#allocation20_spill] sm:$0xff] }
 0x448   : > { %v10031_v12 = vpop.f32.mrf.mxu0  ;;  %v6096_v41 = vpop.f32.mrf.mxu1  ;;  %10342 = vmatmul.mubr.msk.f32.gmra.mxu0 %vm842_vm1, %v7850_v53  ;;  %v7824_v26 = vld [vmem:[#allocation2 + $0x121] sm:$0xff] }
 0x449   : > { %v5750_v36 = vadd.f32 %v10031_v12, %v14129_v27  ;;  %v13137_v47 = vadd.f32 %v6096_v41, %v5747_v10  ;;  %10344 = vmatprep.mubr.msk.f32.mxu0 %vm842_vm1, %v7851_v55  ;;  %v7856_v55 = vmul.f32 %v7824_v26, %v14135_v59 }
 0x44a   : > { %v5686_v63 = vpop.f32.mrf.mxu0  ;;  %v10083_v38 = vpop.f32.mrf.mxu1 }
 0x44b   : > { %v5749_v1 = vadd.f32 %v5686_v63, %v12983_v37  ;;  %v13144_v35 = vadd.f32 %v10083_v38, %v5750_v36  ;;  %v7855_v37 = vmul.f32 %v7823_v51, %v14134_v34 }
 0x44c   : > { %v10034_v60 = vpop.f32.mrf.mxu0  ;;  %v6106_v16 = vpop.f32.mrf.mxu1  ;;  %10345 = vmatmul.mubr.msk.f32.gmra.mxu0 %vm842_vm1, %v7852_v39 }
 0x44d   : > { %v5752_v4 = vadd.f32 %v10034_v60, %v12987_v31  ;;  %v13148_v13 = vadd.f32 %v6106_v16, %v5749_v1  ;;  %10347 = vmatprep.mubr.msk.f32.mxu0 %vm842_vm1, %v7853_v30 }
 0x44e   : > { %v5696_v29 = vpop.f32.mrf.mxu0  ;;  %v10086_v17 = vpop.f32.mrf.mxu1 }
 0x44f   : > { %v5751_v22 = vadd.f32 %v5696_v29, %v12994_v50  ;;  %v13154_v56 = vadd.f32 %v10086_v17, %v5752_v4 }
 0x450   : > { %v10037_v53 = vpop.f32.mrf.mxu0  ;;  %v6116_v24 = vpop.f32.mrf.mxu1  ;;  %10348 = vmatmul.mubr.msk.f32.gmra.mxu0 %vm842_vm1, %v7854_v57 }
 0x451   : > { %v5754_v31 = vadd.f32 %v10037_v53, %v12999_v58  ;;  %v13158_v10 = vadd.f32 %v6116_v24, %v5751_v22  ;;  %10350 = vmatprep.mubr.msk.f32.mxu0 %vm842_vm1, %v7855_v37 }
 0x452   : > { %v5706_v18 = vpop.f32.mrf.mxu0  ;;  %v10089_v12 = vpop.f32.mrf.mxu1 }
 0x453   : > { %v5753_v41 = vadd.f32 %v5706_v18, %v13005_v15  ;;  %v13163_v27 = vadd.f32 %v10089_v12, %v5754_v31 }
 0x454   : > { %v10040_v50 = vpop.f32.mrf.mxu0  ;;  %v6126_v36 = vpop.f32.mrf.mxu1  ;;  %10351 = vmatmul.mubr.msk.f32.gmra.mxu0 %vm842_vm1, %v7856_v55 }
 0x455   : > { %v5756_v63 = vadd.f32 %v10040_v50, %v13009_v43  ;;  %v13167_v38 = vadd.f32 %v6126_v36, %v5753_v41 }
 0x456   : > { %v5716_v58 = vpop.f32.mrf.mxu0  ;;  %v10092_v48 = vpop.f32.mrf.mxu1 }
 0x457   : > { %v5755_v39 = vadd.f32 %v5716_v58, %v13014_v7  ;;  %v13170_v62 = vadd.f32 %v10092_v48, %v5756_v63 }
 0x458   : > { %v6136_v14 = vpop.f32.mrf.mxu1  ;;  %v10099_v30 = vpop.f32.mrf.mxu0 }
 0x459   : > { %v13172_v1 = vadd.f32 %v6136_v14, %v5755_v39  ;;  %v13175_v15 = vadd.f32 %v10099_v30, %v13022_v11 }
 0x45a   : > { %v6374_v8 = vpop.f32.mrf.mxu0  ;;  %v13177_v51 = vpop.f32.mrf.mxu1 }
 0x45b   : > { %v13180_v43 = vadd.f32 %v6374_v8, %v13027_v23 }
 0x45c   : > { %v10102_v60 = vpop.f32.mrf.mxu0  ;;  %v13182_v16 = vpop.f32.mrf.mxu1 }
 0x45d   : > { %v13185_v7 = vadd.f32 %v10102_v60, %v13032_v6 }
 0x45e   : > { %v6384_v4 = vpop.f32.mrf.mxu0  ;;  %v13187_v29 = vpop.f32.mrf.mxu1 }
 0x45f   : > { %v13190_v17 = vadd.f32 %v6384_v4, %v13037_v5 }
 0x460   : > { %v10105_v11 = vpop.f32.mrf.mxu0  ;;  %v13192_v61 = vpop.f32.mrf.mxu1 }
 0x461   : > { %v13195_v57 = vadd.f32 %v10105_v11, %v13042_v21 }
 0x462   : > { %v6394_v23 = vpop.f32.mrf.mxu0  ;;  %v13197_v34 = vpop.f32.mrf.mxu1 }
 0x463   : > { %v13200_v37 = vadd.f32 %v6394_v23, %v13047_v45 }
 0x464   : > { %v10108_v6 = vpop.f32.mrf.mxu0  ;;  %v13202_v26 = vpop.f32.mrf.mxu1 }
 0x465   : > { %v13205_v22 = vadd.f32 %v10108_v6, %v13052_v0 }
 0x466   : > { %v6404_v5 = vpop.f32.mrf.mxu0  ;;  %v13207_v53 = vpop.f32.mrf.mxu1 }
 0x467   : > { %v13210_v24 = vadd.f32 %v6404_v5, %v13057_v46 }
 0x468   : > { %v10111_v21 = vpop.f32.mrf.mxu0  ;;  %v13212_v31 = vpop.f32.mrf.mxu1 }
 0x469   : > { %v13215_v59 = vadd.f32 %v10111_v21, %v13062_v19 }
 0x46a   : > { %v6414_v45 = vpop.f32.mrf.mxu0  ;;  %v13217_v55 = vpop.f32.mrf.mxu1 }
 0x46b   : > { %v13220_v18 = vadd.f32 %v6414_v45, %v13067_v42 }
 0x46c   : > { %v10114_v0 = vpop.f32.mrf.mxu0  ;;  %v13222_v12 = vpop.f32.mrf.mxu1 }
 0x46d   : > { %v13225_v41 = vadd.f32 %v10114_v0, %v13072_v2 }
 0x46e   : > { %v6424_v46 = vpop.f32.mrf.mxu0  ;;  %v13227_v50 = vpop.f32.mrf.mxu1 }
 0x46f   : > { %v13230_v36 = vadd.f32 %v6424_v46, %v13077_v54 }
 0x470   : > { %v10117_v19 = vpop.f32.mrf.mxu0  ;;  %v13232_v63 = vpop.f32.mrf.mxu1 }
 0x471   : > { %v13235_v58 = vadd.f32 %v10117_v19, %v13082_v3 }
 0x472   : > { %v6434_v42 = vpop.f32.mrf.mxu0  ;;  %v13237_v48 = vpop.f32.mrf.mxu1 }
 0x473   : > { %v13240_v39 = vadd.f32 %v6434_v42, %v13087_v40 }
 0x474   : > { %v10120_v2 = vpop.f32.mrf.mxu0  ;;  %v13242_v14 = vpop.f32.mrf.mxu1 }
 0x475   : > { %v13245_v30 = vadd.f32 %v10120_v2, %v13092_v9 }
 0x476   : > { %v6444_v54 = vpop.f32.mrf.mxu0  ;;  %v13247_v8 = vpop.f32.mrf.mxu1 }
 0x477   : > { %14136 = vst [vmem:[#allocation30_spill] sm:$0xff] %v13247_v8  ;;  %v13250_v60 = vadd.f32 %v6444_v54, %v13097_v32 }
 0x478   : > { %v10123_v3 = vpop.f32.mrf.mxu0  ;;  %v13252_v4 = vpop.f32.mrf.mxu1 }
 0x479   : > { %14137 = vst [vmem:[#allocation31_spill] sm:$0xff] %v13250_v60  ;;  %14138 = vst [vmem:[#allocation13_spill] sm:$0xff] %v13252_v4  ;;  %v13255_v11 = vadd.f32 %v10123_v3, %v13102_v52 }
 0x47a   : > { %v6454_v40 = vpop.f32.mrf.mxu0  ;;  %v13257_v23 = vpop.f32.mrf.mxu1 }
 0x47b   : > { %14139 = vst [vmem:[#allocation33_spill] sm:$0xff] %v13255_v11  ;;  %14140 = vst [vmem:[#allocation36_spill] sm:$0xff] %v13257_v23  ;;  %v13260_v6 = vadd.f32 %v6454_v40, %v13107_v28 }
 0x47c   : > { %v10126_v9 = vpop.f32.mrf.mxu0  ;;  %v13262_v5 = vpop.f32.mrf.mxu1 }
 0x47d   : > { %14141 = vst [vmem:[#allocation38_spill] sm:$0xff] %v13260_v6  ;;  %14142 = vst [vmem:[#allocation44_spill] sm:$0xff] %v13262_v5  ;;  %v13265_v21 = vadd.f32 %v10126_v9, %v13112_v44 }
 0x47e   : > { %v6464_v32 = vpop.f32.mrf.mxu0  ;;  %v13267_v45 = vpop.f32.mrf.mxu1 }
 0x47f   : > { %14143 = vst [vmem:[#allocation17_spill] sm:$0xff] %v13265_v21  ;;  %14144 = vst [vmem:[#allocation48_spill] sm:$0xff] %v13267_v45  ;;  %v13270_v0 = vadd.f32 %v6464_v32, %v13117_v49 }
 0x480   : > { %v10129_v52 = vpop.f32.mrf.mxu0  ;;  %v13272_v46 = vpop.f32.mrf.mxu1 }
 0x481   : > { %14145 = vst [vmem:[#allocation101_spill] sm:$0xff] %v13270_v0  ;;  %14146 = vst [vmem:[#allocation102_spill] sm:$0xff] %v13272_v46  ;;  %v13275_v19 = vadd.f32 %v10129_v52, %v13123_v25 }
 0x482   : > { %v6474_v28 = vpop.f32.mrf.mxu0  ;;  %v13277_v42 = vpop.f32.mrf.mxu1 }
 0x483   : > { %14147 = vst [vmem:[#allocation99_spill] sm:$0xff] %v13275_v19  ;;  %14148 = vst [vmem:[#allocation52_spill] sm:$0xff] %v13277_v42  ;;  %v13280_v2 = vadd.f32 %v6474_v28, %v13127_v20 }
 0x484   : > { %v10132_v44 = vpop.f32.mrf.mxu0  ;;  %v13282_v54 = vpop.f32.mrf.mxu1 }
 0x485   : > { %14149 = vst [vmem:[#allocation10_spill] sm:$0xff] %v13280_v2  ;;  %14150 = vst [vmem:[#allocation53_spill] sm:$0xff] %v13282_v54  ;;  %v13285_v3 = vadd.f32 %v10132_v44, %v13132_v33 }
 0x486   : > { %v6484_v49 = vpop.f32.mrf.mxu0  ;;  %v13287_v40 = vpop.f32.mrf.mxu1 }
 0x487   : > { %14151 = vst [vmem:[#allocation56_spill] sm:$0xff] %v13285_v3  ;;  %14152 = vst [vmem:[#allocation57_spill] sm:$0xff] %v13287_v40  ;;  %v13290_v9 = vadd.f32 %v6484_v49, %v13137_v47 }
 0x488   : > { %v10135_v25 = vpop.f32.mrf.mxu0  ;;  %v13292_v32 = vpop.f32.mrf.mxu1 }
 0x489   : > { %14153 = vst [vmem:[#allocation60_spill] sm:$0xff] %v13290_v9  ;;  %14154 = vst [vmem:[#allocation61_spill] sm:$0xff] %v13292_v32  ;;  %v13295_v52 = vadd.f32 %v10135_v25, %v13144_v35 }
 0x48a   : > { %v6494_v20 = vpop.f32.mrf.mxu0  ;;  %v13297_v28 = vpop.f32.mrf.mxu1 }
 0x48b   : > { %14155 = vst [vmem:[#allocation62_spill] sm:$0xff] %v13295_v52  ;;  %14156 = vst [vmem:[#allocation63_spill] sm:$0xff] %v13297_v28  ;;  %v13300_v54 = vadd.f32 %v6494_v20, %v13148_v13 }
 0x48c   : > { %v10138_v33 = vpop.f32.mrf.mxu0  ;;  %v13302_v44 = vpop.f32.mrf.mxu1 }
 0x48d   : > { %14157 = vst [vmem:[#allocation66_spill] sm:$0xff] %v13300_v54  ;;  %14158 = vst [vmem:[#allocation12_spill] sm:$0xff] %v13302_v44  ;;  %v13305_v40 = vadd.f32 %v10138_v33, %v13154_v56 }
 0x48e   : > { %v6504_v47 = vpop.f32.mrf.mxu0  ;;  %v13307_v49 = vpop.f32.mrf.mxu1 }
 0x48f   : > { %14159 = vst [vmem:[#allocation67_spill] sm:$0xff] %v13305_v40  ;;  %14160 = vst [vmem:[#allocation69_spill] sm:$0xff] %v13307_v49  ;;  %v13310_v32 = vadd.f32 %v6504_v47, %v13158_v10 }
 0x490   : > { %v10141_v35 = vpop.f32.mrf.mxu0  ;;  %v13312_v25 = vpop.f32.mrf.mxu1 }
 0x491   : > { %14161 = vst [vmem:[#allocation71_spill] sm:$0xff] %v13310_v32  ;;  %14162 = vst [vmem:[#allocation72_spill] sm:$0xff] %v13312_v25  ;;  %v13315_v28 = vadd.f32 %v10141_v35, %v13163_v27 }
 0x492   : > { %v6514_v13 = vpop.f32.mrf.mxu0  ;;  %v13317_v20 = vpop.f32.mrf.mxu1 }
 0x493   : > { %14163 = vst [vmem:[#allocation73_spill] sm:$0xff] %v13315_v28  ;;  %14164 = vst [vmem:[#allocation76_spill] sm:$0xff] %v13317_v20  ;;  %v13320_v56 = vadd.f32 %v6514_v13, %v13167_v38 }
 0x494   : > { %v10144_v33 = vpop.f32.mrf.mxu0  ;;  %v13322_v40 = vpop.f32.mrf.mxu1 }
 0x495   : > { %14165 = vst [vmem:[#allocation77_spill] sm:$0xff] %v13320_v56  ;;  %14166 = vst [vmem:[#allocation79_spill] sm:$0xff] %v13322_v40  ;;  %v13325_v10 = vadd.f32 %v10144_v33, %v13170_v62 }
 0x496   : > { %v6524_v47 = vpop.f32.mrf.mxu0  ;;  %v13327_v32 = vpop.f32.mrf.mxu1 }
 0x497   : > { %14167 = vst [vmem:[#allocation15_spill] sm:$0xff] %v13325_v10  ;;  %14168 = vst [vmem:[#allocation81_spill] sm:$0xff] %v13327_v32  ;;  %v13330_v27 = vadd.f32 %v6524_v47, %v13172_v1 }
 0x498   : > { %v13332_v35 = vpop.f32.mrf.mxu1  ;;  %v13334_v20 = vpop.f32.mrf.mxu0 }
 0x499   : > { %14169 = vst [vmem:[#allocation82_spill] sm:$0xff] %v13330_v27  ;;  %14170 = vst [vmem:[#allocation42_spill] sm:$0xff] %v13332_v35 }
 0x49a   : > { %v13336_v38 = vpop.f32.mrf.mxu0  ;;  %v13338_v13 = vpop.f32.mrf.mxu1 }
 0x49c   : > { %v13341_v40 = vpop.f32.mrf.mxu0  ;;  %v13343_v62 = vpop.f32.mrf.mxu1 }
 0x49e   : > { %v13353_v1 = vpop.f32.mrf.mxu0  ;;  %v13355_v33 = vpop.f32.mrf.mxu1 }
 0x49f   : > { %10454 = shalt.err (!%p10451_p3)
}
 0x4a0   : > { %s10455_s12 = scalar_lea.hbm %s13348_s29, 256  ;;  %s10459_s27 = scalar_lea.hbm %s13744_s22, 512 }
 0x4a1   : > { %p10456_p4 = scmp.ne.s32.totalorder %s13348_s29, %s10455_s12  ;;  %p10460_p9 = scmp.lt.s32.totalorder %s13348_s29, %s13744_s22 }
 0x4a2   : > { %p10461_p10 = scmp.lt.s32.totalorder %s10459_s27, %s10455_s12 }
 0x4a3   : > { %p10457_p7 = pnand %p10456_p4, %p10662_p5 }
 0x4a4   : > { %p10462_p11 = por %p10461_p10, %p10460_p9 }
 0x4a5   : > { %p10458_p8 = pneg %p10457_p7 }
 0x4a7   : > { %p10463_p12 = pnand %p10462_p11, %p10458_p8 }
 0x4a9   : > { %10466 = shalt.err (!%p10463_p12)
}
 0x4aa   : > { %s10507_s17 = smov 128   ;;  %s10508_s1 = smov 8   ;;  %v10209_v47 = vpop.f32.mrf.mxu0  ;;  %v13382_v35 = vpop.f32.mrf.mxu1 }
 0x4ab   : > { %10355 = dma.vmem_to_hbm [thread:$0]  (%p10662_p5), %s13351_s5, 256, %s13348_s29, %s13359_s7, %s10507_s17, %s10507_s17, %s10508_s1  }
 0x4ac   : > { %v13384_v27 = vpop.f32.mrf.mxu0  ;;  %v13388_v10 = vpop.f32.mrf.mxu1  ;;  %s14191_s2 = sld [smem:[#allocation109_spill]]  ;;  %s14192_s29 = sshll.u32 %s10687_s26, 8 }
 0x4ad   : > { %s13490_s11 = scalar_lea.vmem %s13742_s20, %s14192_s29 }
 0x4ae   : > { %v13386_v32 = vpop.f32.mrf.mxu0  ;;  %v13394_v25 = vpop.f32.mrf.mxu1 }
 0x4b0   : > { %v13390_v56 = vpop.f32.mrf.mxu0  ;;  %v13400_v54 = vpop.f32.mrf.mxu1 }
 0x4b2   : > { %v13392_v28 = vpop.f32.mrf.mxu0  ;;  %v13406_v3 = vpop.f32.mrf.mxu1 }
 0x4b4   : > { %v13396_v49 = vpop.f32.mrf.mxu0  ;;  %v13412_v19 = vpop.f32.mrf.mxu1 }
 0x4b6   : > { %v13398_v44 = vpop.f32.mrf.mxu0  ;;  %v13418_v45 = vpop.f32.mrf.mxu1 }
 0x4b8   : > { %v13402_v52 = vpop.f32.mrf.mxu0  ;;  %v13424_v6 = vpop.f32.mrf.mxu1 }
 0x4ba   : > { %v13404_v9 = vpop.f32.mrf.mxu0  ;;  %v13430_v4 = vpop.f32.mrf.mxu1 }
 0x4bb   : > { %14180 = vst [vmem:[#allocation96_spill] sm:$0xff] %v13430_v4 }
 0x4bc   : > { %v13408_v2 = vpop.f32.mrf.mxu0 }
 0x4bd   : > { %14172 = vst [vmem:[#allocation84_spill] sm:$0xff] %v13408_v2 }
 0x4be   : > { %v13410_v42 = vpop.f32.mrf.mxu0 }
 0x4bf   : > { %14173 = vst [vmem:[#allocation86_spill] sm:$0xff] %v13410_v42 }
 0x4c0   : > { %v13414_v46 = vpop.f32.mrf.mxu0 }
 0x4c1   : > { %14174 = vst [vmem:[#allocation87_spill] sm:$0xff] %v13414_v46  ;;  %v13436_v46 = vpop.f32.mrf.mxu1 }
 0x4c2   : > { %v13416_v0 = vpop.f32.mrf.mxu0 }
 0x4c3   : > { %14175 = vst [vmem:[#allocation90_spill] sm:$0xff] %v13416_v0 }
 0x4c4   : > { %v13420_v21 = vpop.f32.mrf.mxu0 }
 0x4c5   : > { %14176 = vst [vmem:[#allocation54_spill] sm:$0xff] %v13420_v21  ;;  %v13442_v21 = vpop.f32.mrf.mxu1 }
 0x4c6   : > { %v13422_v5 = vpop.f32.mrf.mxu0 }
 0x4c7   : > { %14177 = vst [vmem:[#allocation91_spill] sm:$0xff] %v13422_v5 }
 0x4c8   : > { %v13426_v23 = vpop.f32.mrf.mxu0 }
 0x4c9   : > { %14178 = vst [vmem:[#allocation92_spill] sm:$0xff] %v13426_v23  ;;  %v13448_v23 = vpop.f32.mrf.mxu1 }
 0x4ca   : > { %v13428_v11 = vpop.f32.mrf.mxu0  ;;  %14187 = vst [vmem:[#allocation18_spill] sm:$0xff] %v13448_v23 }
 0x4cb   : > { %14179 = vst [vmem:[#allocation95_spill] sm:$0xff] %v13428_v11 }
 0x4cc   : > { %v13432_v42 = vpop.f32.mrf.mxu0 }
 0x4cd   : > { %14181 = vst [vmem:[#allocation16_spill] sm:$0xff] %v13432_v42  ;;  %v13456_v42 = vpop.f32.mrf.mxu1 }
 0x4ce   : > { %v13434_v60 = vpop.f32.mrf.mxu0 }
 0x4cf   : > { %14182 = vst [vmem:[#allocation98_spill] sm:$0xff] %v13434_v60  ;;  %v6954_v60 = vadd.f32 %v13177_v51, %v13175_v15  ;;  %v13468_v23 = vpop.f32.mrf.mxu1  ;;  %v6955_v51 = vadd.f32 %v13192_v61, %v13190_v17  ;;  %v6957_v17 = vadd.f32 %v13202_v26, %v13200_v37 }
 0x4d0   : > { %v13438_v0 = vpop.f32.mrf.mxu0 }
 0x4d1   : > { %14183 = vst [vmem:[#allocation103_spill] sm:$0xff] %v13438_v0  ;;  %v13494_v61 = vpop.f32.mrf.mxu1 }
 0x4d2   : > { %v13440_v2 = vpop.f32.mrf.mxu0 }
 0x4d3   : > { %14184 = vst [vmem:[#allocation104_spill] sm:$0xff] %v13440_v2  ;;  %v6953_v2 = vadd.f32 %v13182_v16, %v13180_v43 }
 0x4d4   : > { %v13444_v5 = vpop.f32.mrf.mxu0 }
 0x4d5   : > { %14185 = vst [vmem:[#allocation19_spill] sm:$0xff] %v13444_v5  ;;  %v7374_v5 = vadd.f32 %v13334_v20, %v6954_v60  ;;  %v13479_v60 = vld [vmem:[%s14191_s2] ss:$0 sm:$0xff] }
 0x4d6   : > { %v13446_v8 = vpop.f32.mrf.mxu0 }
 0x4d7   : > { %14186 = vst [vmem:[#allocation14_spill] sm:$0xff] %v13446_v8 }
 0x4d8   : > { %v13450_v11 = vpop.f32.mrf.mxu0 }
 0x4d9   : > { %14188 = vst [vmem:[#allocation39_spill] sm:$0xff] %v13450_v11  ;;  %v6956_v11 = vadd.f32 %v13187_v29, %v13185_v7  ;;  %v6958_v7 = vadd.f32 %v13197_v34, %v13195_v57 }
 0x4da   : > { %v13452_v4 = vpop.f32.mrf.mxu0 }
 0x4db   : > { %14189 = vst [vmem:[#allocation41_spill] sm:$0xff] %v13452_v4  ;;  %v7373_v4 = vadd.f32 %v13336_v38, %v6953_v2  ;;  %v7376_v43 = vadd.f32 %v13341_v40, %v6956_v11  ;;  %v7375_v2 = vadd.f32 %v13353_v1, %v6955_v51  ;;  %v7378_v34 = vadd.f32 %v10209_v47, %v6958_v7  ;;  %v13507_v1 = vpop.f32.mrf.mxu1 }
 0x4dc   : > { %v13458_v0 = vpop.f32.mrf.mxu0 }
 0x4dd   : > { %14190 = vst [vmem:[#allocation22_spill] sm:$0xff] %v13458_v0  ;;  %v7762_v0 = vadd.f32 %v13338_v13, %v7374_v5  ;;  %v7761_v29 = vadd.f32 %v13343_v62, %v7373_v4  ;;  %v7764_v57 = vadd.f32 %v13355_v33, %v7376_v43  ;;  %v7763_v38 = vadd.f32 %v13382_v35, %v7375_v2 }
 0x4de   : > { %v13463_v8 = vpop.f32.mrf.mxu0  ;;  %v7377_v13 = vadd.f32 %v13384_v27, %v6957_v17  ;;  %v6959_v62 = vadd.f32 %v13212_v31, %v13210_v24  ;;  %v7766_v47 = vadd.f32 %v13388_v10, %v7378_v34  ;;  %v6962_v35 = vadd.f32 %v13217_v55, %v13215_v59 }
 0x4df   : > { %v6961_v10 = vadd.f32 %v13222_v12, %v13220_v18 }
 0x4e0   : > { %v13470_v15 = vpop.f32.mrf.mxu0  ;;  %v7765_v43 = vadd.f32 %v13394_v25, %v7377_v13  ;;  %v7379_v24 = vadd.f32 %v13390_v56, %v6959_v62  ;;  %v7382_v59 = vadd.f32 %v13392_v28, %v6962_v35  ;;  %v6964_v56 = vadd.f32 %v13227_v50, %v13225_v41  ;;  %v14196_v62 = vld [vmem:[#allocation31_spill] sm:$0xff] }
 0x4e1   : > { %v7381_v18 = vadd.f32 %v13396_v49, %v6961_v10  ;;  %v6963_v28 = vadd.f32 %v13232_v63, %v13230_v36  ;;  %v6966_v49 = vadd.f32 %v13237_v48, %v13235_v58 }
 0x4e2   : > { %v10307_v16 = vpop.f32.mrf.mxu0  ;;  %v7384_v41 = vadd.f32 %v13398_v44, %v6964_v56  ;;  %v6965_v44 = vadd.f32 %v13242_v14, %v13240_v39  ;;  %v14195_v39 = vld [vmem:[#allocation84_spill] sm:$0xff] }
 0x4e3   : > { %v8182_v20 = vadd.f32 %v10307_v16, %v7762_v0  ;;  %v6960_v0 = vadd.f32 %v13207_v53, %v13205_v22  ;;  %v13523_v16 = vpop.f32.mrf.mxu1  ;;  %v7383_v36 = vadd.f32 %v13402_v52, %v6963_v28  ;;  %v7386_v58 = vadd.f32 %v13404_v9, %v6966_v49  ;;  %v14193_v52 = vld [vmem:[#allocation30_spill] sm:$0xff]  ;;  %v14203_v56 = vld [vmem:[#allocation44_spill] sm:$0xff] }
 0x4e4   : > { %v8022_v11 = vpop.f32.mrf.mxu0  ;;  %v7385_v14 = vadd.f32 %v14195_v39, %v6965_v44  ;;  %v14205_v28 = vld [vmem:[#allocation90_spill] sm:$0xff]  ;;  %v14209_v44 = vld [vmem:[#allocation101_spill] sm:$0xff] }
 0x4e5   : > { %v8221_v4 = vadd.f32 %v13479_v60, %v8182_v20  ;;  %v8181_v5 = vadd.f32 %v8022_v11, %v7761_v29  ;;  %v7380_v22 = vadd.f32 %v13386_v32, %v6960_v0  ;;  %v7767_v20 = vadd.f32 %v13406_v3, %v7379_v24  ;;  %v13539_v17 = vpop.f32.mrf.mxu1  ;;  %v14199_v24 = vld [vmem:[#allocation33_spill] sm:$0xff] }
 0x4e6   : > { %v10310_v40 = vpop.f32.mrf.mxu0 }
 0x4e7   : > { %8253 = vst.msk [vmem:[%s13490_s11 + $0x8] sm:$0xff] %vm842_vm1, %v8221_v4  ;;  %v8220_v37 = vadd.f32 %v13479_v60, %v8181_v5  ;;  %v8184_v26 = vadd.f32 %v10310_v40, %v7764_v57  ;;  %v7768_v29 = vadd.f32 %v13400_v54, %v7380_v22  ;;  %v7770_v57 = vadd.f32 %v13412_v19, %v7382_v59  ;;  %v13555_v5 = vpop.f32.mrf.mxu1 }
 0x4e8   : > { %v8032_v33 = vpop.f32.mrf.mxu0  ;;  %v7769_v4 = vadd.f32 %v13418_v45, %v7381_v18  ;;  %v7772_v40 = vadd.f32 %v13424_v6, %v7384_v41  ;;  %v14206_v41 = vld [vmem:[#allocation17_spill] sm:$0xff] }
 0x4e9   : > { %8252 = vst.msk [vmem:[%s13490_s11] sm:$0xff] %vm842_vm1, %v8220_v37  ;;  %v8223_v53 = vadd.f32 %v13479_v60, %v8184_v26  ;;  %v8183_v27 = vadd.f32 %v8032_v33, %v7763_v38  ;;  %v6968_v38 = vadd.f32 %v14193_v52, %v13245_v30  ;;  %v14194_v37 = vld [vmem:[#allocation96_spill] sm:$0xff]  ;;  %v14197_v33 = vld [vmem:[#allocation13_spill] sm:$0xff]  ;;  %v13571_v22 = vpop.f32.mrf.mxu1  ;;  %v14198_v30 = vld [vmem:[#allocation86_spill] sm:$0xff] }
 0x4ea   : > { %v10313_v51 = vpop.f32.mrf.mxu0  ;;  %v7771_v26 = vadd.f32 %v14194_v37, %v7383_v36  ;;  %v14211_v52 = vld [vmem:[#allocation91_spill] sm:$0xff] }
 0x4eb   : > { %8255 = vst.msk [vmem:[%s13490_s11 + $0x18] sm:$0xff] %vm842_vm1, %v8223_v53  ;;  %v8222_v31 = vadd.f32 %v13479_v60, %v8183_v27  ;;  %v8186_v32 = vadd.f32 %v10313_v51, %v7766_v47  ;;  %v6967_v47 = vadd.f32 %v14197_v33, %v14196_v62  ;;  %v7774_v27 = vadd.f32 %v13436_v46, %v7386_v58  ;;  %v14212_v37 = vld [vmem:[#allocation99_spill] sm:$0xff] }
 0x4ec   : > { %v8042_v7 = vpop.f32.mrf.mxu0  ;;  %v7388_v35 = vadd.f32 %v14198_v30, %v6968_v38 }
 0x4ed   : > { %8254 = vst.msk [vmem:[%s13490_s11 + $0x10] sm:$0xff] %vm842_vm1, %v8222_v31  ;;  %v8225_v55 = vadd.f32 %v13479_v60, %v8186_v32  ;;  %v8185_v25 = vadd.f32 %v8042_v7, %v7765_v43  ;;  %v14200_v31 = vld [vmem:[#allocation36_spill] sm:$0xff]  ;;  %v7773_v7 = vadd.f32 %v13442_v21, %v7385_v14 }
 0x4ee   : > { %v10316_v2 = vpop.f32.mrf.mxu0  ;;  %v6970_v32 = vadd.f32 %v14200_v31, %v14199_v24 }
 0x4ef   : > { %8257 = vst.msk [vmem:[%s13490_s11 + $0x28] sm:$0xff] %vm842_vm1, %v8225_v55  ;;  %v8224_v12 = vadd.f32 %v13479_v60, %v8185_v25  ;;  %v8188_v54 = vadd.f32 %v10316_v2, %v7768_v29  ;;  %v14201_v29 = vld [vmem:[#allocation87_spill] sm:$0xff]  ;;  %v14202_v25 = vld [vmem:[#allocation38_spill] sm:$0xff] }
 0x4f0   : > { %v8052_v11 = vpop.f32.mrf.mxu0  ;;  %v7387_v59 = vadd.f32 %v14201_v29, %v6967_v47  ;;  %v6969_v2 = vadd.f32 %v14203_v56, %v14202_v25  ;;  %v14215_v47 = vld [vmem:[#allocation10_spill] sm:$0xff]  ;;  %v14221_v56 = vld [vmem:[#allocation60_spill] sm:$0xff] }
 0x4f1   : > { %8256 = vst.msk [vmem:[%s13490_s11 + $0x20] sm:$0xff] %vm842_vm1, %v8224_v12  ;;  %v8227_v50 = vadd.f32 %v13479_v60, %v8188_v54  ;;  %v8187_v3 = vadd.f32 %v8052_v11, %v7767_v20  ;;  %v13587_v20 = vpop.f32.mrf.mxu1  ;;  %v14204_v12 = vld [vmem:[#allocation18_spill] sm:$0xff]  ;;  %v7390_v11 = vadd.f32 %v14205_v28, %v6970_v32  ;;  %v14218_v32 = vld [vmem:[#allocation56_spill] sm:$0xff] }
 0x4f2   : > { %v10319_v34 = vpop.f32.mrf.mxu0  ;;  %v7776_v54 = vadd.f32 %v14204_v12, %v7388_v35 }
 0x4f3   : > { %8259 = vst.msk [vmem:[%s13490_s11 + $0x38] sm:$0xff] %vm842_vm1, %v8227_v50  ;;  %v8226_v63 = vadd.f32 %v13479_v60, %v8187_v3  ;;  %v8190_v19 = vadd.f32 %v10319_v34, %v7770_v57  ;;  %v14207_v50 = vld [vmem:[#allocation48_spill] sm:$0xff]  ;;  %v7775_v34 = vadd.f32 %v13456_v42, %v7387_v59  ;;  %v10291_v58 = vpop.f32.mrf.mxu1 }
 0x4f4   : > { %v8062_v0 = vpop.f32.mrf.mxu0  ;;  %v6972_v3 = vadd.f32 %v14207_v50, %v14206_v41  ;;  %v14224_v41 = vld [vmem:[#allocation62_spill] sm:$0xff]  ;;  %v14225_v50 = vld [vmem:[#allocation63_spill] sm:$0xff] }
 0x4f5   : > { %8258 = vst.msk [vmem:[%s13490_s11 + $0x30] sm:$0xff] %vm842_vm1, %v8226_v63  ;;  %v8229_v48 = vadd.f32 %v13479_v60, %v8190_v19  ;;  %v8189_v45 = vadd.f32 %v8062_v0, %v7769_v4  ;;  %v14208_v4 = vld [vmem:[#allocation54_spill] sm:$0xff]  ;;  %v7722_v30 = vpop.f32.mrf.mxu1 }
 0x4f6   : > { %v10322_v13 = vpop.f32.mrf.mxu0  ;;  %v7389_v36 = vadd.f32 %v14208_v4, %v6969_v2  ;;  %v14210_v0 = vld [vmem:[#allocation102_spill] sm:$0xff]  ;;  %v7392_v38 = vadd.f32 %v14211_v52, %v6972_v3  ;;  %v14222_v2 = vld [vmem:[#allocation61_spill] sm:$0xff]  ;;  %v6978_v3 = vadd.f32 %v14225_v50, %v14224_v41  ;;  %v14226_v4 = vld [vmem:[#allocation103_spill] sm:$0xff] }
 0x4f7   : > { %8261 = vst.msk [vmem:[%s13490_s11 + $0x48] sm:$0xff] %vm842_vm1, %v8229_v48  ;;  %v8228_v6 = vadd.f32 %v13479_v60, %v8189_v45  ;;  %v8192_v9 = vadd.f32 %v10322_v13, %v7772_v40  ;;  %v6971_v40 = vadd.f32 %v14210_v0, %v14209_v44  ;;  %v7778_v45 = vadd.f32 %v13468_v23, %v7390_v11  ;;  %v10294_v12 = vpop.f32.mrf.mxu1  ;;  %v14223_v11 = vld [vmem:[#allocation98_spill] sm:$0xff]  ;;  %v14228_v44 = vld [vmem:[#allocation12_spill] sm:$0xff] }
 0x4f8   : > { %v8072_v53 = vpop.f32.mrf.mxu0  ;;  %v14229_v52 = vld [vmem:[#allocation104_spill] sm:$0xff] }
 0x4f9   : > { %8260 = vst.msk [vmem:[%s13490_s11 + $0x40] sm:$0xff] %vm842_vm1, %v8228_v6  ;;  %v8231_v51 = vadd.f32 %v13479_v60, %v8192_v9  ;;  %v8191_v43 = vadd.f32 %v8072_v53, %v7771_v26  ;;  %v14213_v26 = vld [vmem:[#allocation52_spill] sm:$0xff]  ;;  %v7777_v6 = vadd.f32 %v13494_v61, %v7389_v36  ;;  %v14216_v53 = vld [vmem:[#allocation53_spill] sm:$0xff] }
 0x4fa   : > { %v10325_v10 = vpop.f32.mrf.mxu0  ;;  %v6974_v39 = vadd.f32 %v14213_v26, %v14212_v37  ;;  %v14214_v9 = vld [vmem:[#allocation92_spill] sm:$0xff]  ;;  %v14231_v37 = vld [vmem:[#allocation69_spill] sm:$0xff] }
 0x4fb   : > { %8263 = vst.msk [vmem:[%s13490_s11 + $0x58] sm:$0xff] %vm842_vm1, %v8231_v51  ;;  %v8230_v46 = vadd.f32 %v13479_v60, %v8191_v43  ;;  %v8194_v55 = vadd.f32 %v10325_v10, %v7774_v27  ;;  %v7391_v62 = vadd.f32 %v14214_v9, %v6971_v40  ;;  %v6973_v27 = vadd.f32 %v14216_v53, %v14215_v47  ;;  %v14217_v43 = vld [vmem:[#allocation95_spill] sm:$0xff]  ;;  %v14219_v10 = vld [vmem:[#allocation57_spill] sm:$0xff]  ;;  %v7732_v40 = vpop.f32.mrf.mxu1 }
 0x4fc   : > { %v8082_v18 = vpop.f32.mrf.mxu0  ;;  %v7780_v51 = vadd.f32 %v13507_v1, %v7392_v38  ;;  %v7394_v24 = vadd.f32 %v14217_v43, %v6974_v39  ;;  %v7398_v38 = vadd.f32 %v14229_v52, %v6978_v3  ;;  %v14244_v3 = vld [vmem:[#allocation22_spill] sm:$0xff] }
 0x4fd   : > { %8262 = vst.msk [vmem:[%s13490_s11 + $0x50] sm:$0xff] %vm842_vm1, %v8230_v46  ;;  %v8233_v21 = vadd.f32 %v13479_v60, %v8194_v55  ;;  %v8193_v57 = vadd.f32 %v8082_v18, %v7773_v7  ;;  %v6976_v7 = vadd.f32 %v14219_v10, %v14218_v32  ;;  %v7779_v59 = vadd.f32 %v13523_v16, %v7391_v62  ;;  %v14220_v46 = vld [vmem:[#allocation16_spill] sm:$0xff]  ;;  %v10297_v53 = vpop.f32.mrf.mxu1 }
 0x4fe   : > { %v10328_v49 = vpop.f32.mrf.mxu0  ;;  %v7393_v55 = vadd.f32 %v14220_v46, %v6973_v27  ;;  %v6975_v18 = vadd.f32 %v14222_v2, %v14221_v56  ;;  %v7782_v28 = vadd.f32 %v13539_v17, %v7394_v24 }
 0x4ff   : > { %8265 = vst.msk [vmem:[%s13490_s11 + $0x68] sm:$0xff] %vm842_vm1, %v8233_v21  ;;  %v8232_v63 = vadd.f32 %v13479_v60, %v8193_v57  ;;  %v8196_v19 = vadd.f32 %v10328_v49, %v7776_v54  ;;  %v7396_v21 = vadd.f32 %v14223_v11, %v6976_v7  ;;  %v7742_v56 = vpop.f32.mrf.mxu1 }
 0x500   : > { %v8092_v48 = vpop.f32.mrf.mxu0  ;;  %v7395_v36 = vadd.f32 %v14226_v4, %v6975_v18  ;;  %v14245_v4 = vld [vmem:[#allocation82_spill] sm:$0xff] }
 0x501   : > { %8264 = vst.msk [vmem:[%s13490_s11 + $0x60] sm:$0xff] %vm842_vm1, %v8232_v63  ;;  %v8235_v42 = vadd.f32 %v13479_v60, %v8196_v19  ;;  %v8195_v13 = vadd.f32 %v8092_v48, %v7775_v34  ;;  %v7781_v34 = vadd.f32 %v13555_v5, %v7393_v55  ;;  %v14227_v19 = vld [vmem:[#allocation66_spill] sm:$0xff]  ;;  %v14239_v55 = vld [vmem:[#allocation77_spill] sm:$0xff] }
 0x502   : > { %v10331_v14 = vpop.f32.mrf.mxu0  ;;  %v6977_v0 = vadd.f32 %v14228_v44, %v14227_v19 }
 0x503   : > { %8267 = vst.msk [vmem:[%s13490_s11 + $0x78] sm:$0xff] %vm842_vm1, %v8235_v42  ;;  %v8234_v23 = vadd.f32 %v13479_v60, %v8195_v13  ;;  %v8198_v33 = vadd.f32 %v10331_v14, %v7778_v45  ;;  %v7784_v45 = vadd.f32 %v13571_v22, %v7396_v21  ;;  %v14230_v13 = vld [vmem:[#allocation67_spill] sm:$0xff]  ;;  %v7783_v14 = vadd.f32 %v13587_v20, %v7395_v36  ;;  %v14246_v36 = vld [vmem:[#allocation42_spill] sm:$0xff] }
 0x504   : > { %v8102_v35 = vpop.f32.mrf.mxu0  ;;  %v6980_v26 = vadd.f32 %v14231_v37, %v14230_v13  ;;  %v14242_v21 = vld [vmem:[#allocation15_spill] sm:$0xff] }
 0x505   : > { %8266 = vst.msk [vmem:[%s13490_s11 + $0x70] sm:$0xff] %vm842_vm1, %v8234_v23  ;;  %v8237_v61 = vadd.f32 %v13479_v60, %v8198_v33  ;;  %v8197_v31 = vadd.f32 %v8102_v35, %v7777_v6  ;;  %v14232_v6 = vld [vmem:[#allocation19_spill] sm:$0xff]  ;;  %v14234_v33 = vld [vmem:[#allocation72_spill] sm:$0xff]  ;;  %v7786_v35 = vadd.f32 %v10291_v58, %v7398_v38 }
 0x506   : > { %v10334_v29 = vpop.f32.mrf.mxu0  ;;  %v7397_v9 = vadd.f32 %v14232_v6, %v6977_v0  ;;  %v14233_v23 = vld [vmem:[#allocation71_spill] sm:$0xff] }
 0x507   : > { %8269 = vst.msk [vmem:[%s13490_s11 + $0x88] sm:$0xff] %vm842_vm1, %v8237_v61  ;;  %v8236_v1 = vadd.f32 %v13479_v60, %v8197_v31  ;;  %v8200_v25 = vadd.f32 %v10334_v29, %v7780_v51  ;;  %v6979_v47 = vadd.f32 %v14234_v33, %v14233_v23  ;;  %v14235_v51 = vld [vmem:[#allocation14_spill] sm:$0xff]  ;;  %v14236_v61 = vld [vmem:[#allocation73_spill] sm:$0xff]  ;;  %v14237_v31 = vld [vmem:[#allocation76_spill] sm:$0xff] }
 0x508   : > { %v8112_v54 = vpop.f32.mrf.mxu0  ;;  %v7400_v43 = vadd.f32 %v14235_v51, %v6980_v26  ;;  %v6982_v32 = vadd.f32 %v14237_v31, %v14236_v61  ;;  %v7785_v7 = vadd.f32 %v7722_v30, %v7397_v9  ;;  %v14238_v29 = vld [vmem:[#allocation39_spill] sm:$0xff] }
 0x509   : > { %8268 = vst.msk [vmem:[%s13490_s11 + $0x80] sm:$0xff] %vm842_vm1, %v8236_v1  ;;  %v8239_v16 = vadd.f32 %v13479_v60, %v8200_v25  ;;  %v8199_v57 = vadd.f32 %v8112_v54, %v7779_v59  ;;  %v7399_v59 = vadd.f32 %v14238_v29, %v6979_v47  ;;  %v14240_v1 = vld [vmem:[#allocation79_spill] sm:$0xff]  ;;  %v14241_v54 = vld [vmem:[#allocation41_spill] sm:$0xff] }
 0x50a   : > { %v10337_v49 = vpop.f32.mrf.mxu0  ;;  %v6981_v25 = vadd.f32 %v14240_v1, %v14239_v55  ;;  %v7788_v18 = vadd.f32 %v10294_v12, %v7400_v43 }
 0x50b   : > { %8271 = vst.msk [vmem:[%s13490_s11 + $0x98] sm:$0xff] %vm842_vm1, %v8239_v16  ;;  %v8238_v17 = vadd.f32 %v13479_v60, %v8199_v57  ;;  %v8202_v63 = vadd.f32 %v10337_v49, %v7782_v28  ;;  %v7402_v28 = vadd.f32 %v14241_v54, %v6982_v32  ;;  %v14243_v16 = vld [vmem:[#allocation81_spill] sm:$0xff]  ;;  %v7787_v50 = vadd.f32 %v7732_v40, %v7399_v59 }
 0x50c   : > { %v8122_v48 = vpop.f32.mrf.mxu0  ;;  %v6984_v57 = vadd.f32 %v14243_v16, %v14242_v21  ;;  %v7401_v49 = vadd.f32 %v14244_v3, %v6981_v25 }
 0x50d   : > { %8270 = vst.msk [vmem:[%s13490_s11 + $0x90] sm:$0xff] %vm842_vm1, %v8238_v17  ;;  %v8241_v5 = vadd.f32 %v13479_v60, %v8202_v63  ;;  %v8201_v42 = vadd.f32 %v8122_v48, %v7781_v34  ;;  %v6983_v17 = vadd.f32 %v14246_v36, %v14245_v4  ;;  %v10300_v63 = vpop.f32.mrf.mxu1  ;;  %v7790_v44 = vadd.f32 %v10297_v53, %v7402_v28 }
 0x50e   : > { %v10340_v39 = vpop.f32.mrf.mxu0  ;;  %v7404_v0 = vadd.f32 %v13463_v8, %v6984_v57  ;;  %v7789_v52 = vadd.f32 %v7742_v56, %v7401_v49 }
 0x50f   : > { %8273 = vst.msk [vmem:[%s13490_s11 + $0xa8] sm:$0xff] %vm842_vm1, %v8241_v5  ;;  %v8240_v22 = vadd.f32 %v13479_v60, %v8201_v42  ;;  %v8204_v62 = vadd.f32 %v10340_v39, %v7784_v45  ;;  %v7403_v38 = vadd.f32 %v13470_v15, %v6983_v17  ;;  %v7752_v13 = vpop.f32.mrf.mxu1 }
 0x510   : > { %v8132_v27 = vpop.f32.mrf.mxu0  ;;  %v7792_v8 = vadd.f32 %v10300_v63, %v7404_v0 }
 0x511   : > { %8272 = vst.msk [vmem:[%s13490_s11 + $0xa0] sm:$0xff] %vm842_vm1, %v8240_v22  ;;  %v8243_v20 = vadd.f32 %v13479_v60, %v8204_v62  ;;  %v8203_v24 = vadd.f32 %v8132_v27, %v7783_v14  ;;  %v7791_v6 = vadd.f32 %v7752_v13, %v7403_v38 }
 0x512   : > { %v10343_v10 = vpop.f32.mrf.mxu0 }
 0x513   : > { %8275 = vst.msk [vmem:[%s13490_s11 + $0xb8] sm:$0xff] %vm842_vm1, %v8243_v20  ;;  %v8242_v58 = vadd.f32 %v13479_v60, %v8203_v24  ;;  %v8206_v46 = vadd.f32 %v10343_v10, %v7786_v35 }
 0x514   : > { %v8142_v2 = vpop.f32.mrf.mxu0 }
 0x515   : > { %8274 = vst.msk [vmem:[%s13490_s11 + $0xb0] sm:$0xff] %vm842_vm1, %v8242_v58  ;;  %v8245_v30 = vadd.f32 %v13479_v60, %v8206_v46  ;;  %v8205_v11 = vadd.f32 %v8142_v2, %v7785_v7 }
 0x516   : > { %v10346_v41 = vpop.f32.mrf.mxu0 }
 0x517   : > { %8277 = vst.msk [vmem:[%s13490_s11 + $0xc8] sm:$0xff] %vm842_vm1, %v8245_v30  ;;  %v8244_v12 = vadd.f32 %v13479_v60, %v8205_v11  ;;  %v8208_v34 = vadd.f32 %v10346_v41, %v7788_v18 }
 0x518   : > { %v8152_v19 = vpop.f32.mrf.mxu0 }
 0x519   : > { %8276 = vst.msk [vmem:[%s13490_s11 + $0xc0] sm:$0xff] %vm842_vm1, %v8244_v12  ;;  %v8247_v40 = vadd.f32 %v13479_v60, %v8208_v34  ;;  %v8207_v48 = vadd.f32 %v8152_v19, %v7787_v50 }
 0x51a   : > { %v10349_v45 = vpop.f32.mrf.mxu0 }
 0x51b   : > { %8279 = vst.msk [vmem:[%s13490_s11 + $0xd8] sm:$0xff] %vm842_vm1, %v8247_v40  ;;  %v8246_v5 = vadd.f32 %v13479_v60, %v8207_v48  ;;  %v8210_v42 = vadd.f32 %v10349_v45, %v7790_v44 }
 0x51c   : > { %v8162_v37 = vpop.f32.mrf.mxu0 }
 0x51d   : > { %8278 = vst.msk [vmem:[%s13490_s11 + $0xd0] sm:$0xff] %vm842_vm1, %v8246_v5  ;;  %v8249_v26 = vadd.f32 %v13479_v60, %v8210_v42  ;;  %v8209_v39 = vadd.f32 %v8162_v37, %v7789_v52 }
 0x51e   : > { %v10352_v14 = vpop.f32.mrf.mxu0 }
 0x51f   : > { %8281 = vst.msk [vmem:[%s13490_s11 + $0xe8] sm:$0xff] %vm842_vm1, %v8249_v26  ;;  %v8248_v15 = vadd.f32 %v13479_v60, %v8209_v39  ;;  %v8212_v9 = vadd.f32 %v10352_v14, %v7792_v8 }
 0x520   : > { %v8172_v22 = vpop.f32.mrf.mxu0 }
 0x521   : > { %8280 = vst.msk [vmem:[%s13490_s11 + $0xe0] sm:$0xff] %vm842_vm1, %v8248_v15  ;;  %v8251_v62 = vadd.f32 %v13479_v60, %v8212_v9  ;;  %v8211_v23 = vadd.f32 %v8172_v22, %v7791_v6 }
 0x523   : > { %8283 = vst.msk [vmem:[%s13490_s11 + $0xf8] sm:$0xff] %vm842_vm1, %v8251_v62  ;;  %v8250_v33 = vadd.f32 %v13479_v60, %v8211_v23 }
 0x525   : > { %8282 = vst.msk [vmem:[%s13490_s11 + $0xf0] sm:$0xff] %vm842_vm1, %v8250_v33 }
 0x526 PF: > { %p10361_p5 = scmp.ge.s32.totalorder %s10501_s30, 2  ;;  %s8345_s26 = sand.u32 1, %s10489_s3  }
 0x527   : > { %s8346_s12 = scalar_lea.sflag [#allocation6], %s8345_s26 }
 0x528   : > { %p10358_p13 = pnand %p10361_p5, %p10666_p6 }
 0x52a   : > { %p10359_p0 = pneg %p10358_p13 }
 0x52c   : > { %10484 = dma.done.wait (%p10359_p0), %s8346_s12, 256  }
 0x52d   : > { %10486 = vsyncadd (%p10359_p0), %s8346_s12, 4294967040  ;;  %s14247_s0 = sld [smem:[#allocation8_spill]]  ;;  %p33_p1 = scmp.ge.s32.totalorder %s10649_s23, 4  }
 0x52e   : > { %s14248_s29 = sld [smem:[#allocation9_spill]]  ;;  %s14249_s3 = smov %s10493_s28 }
 0x52f   : > { %s14251_s30 = smov %s10649_s23  ;;  %35 = sbr.rel (!%p33_p1) target bundleno = 16 (0x10), region = 189 }
 0x533   : > { %s14250_s28 = smov %s14247_s0 }
 0x534   :  { %8351 = vsyncpa [#allocation6], 1 }
 0x535   :  { %8353 = vsyncpa [#allocation6 + $0x1], 1 }

</bundles_post_ra>
